<compile_context>
chip_gen: v6e
topology: v6e:2x2x1
jax: 0.10.0
libtpu: 0.0.40
codegen_flags: <defaults>
</compile_context>

<pallas_src>
import numpy as np
import jax
import jax.numpy as jnp
from jax.experimental import pallas as pl
from jax.experimental.pallas import tpu as pltpu


# ----------------------------------------------------------------------------
# Pallas kernel: fused (block-diagonal) pipeline for all 4 branches + fuse +
# residual, on one pixel tile.
# ----------------------------------------------------------------------------
def jpu_kernel(dw_ref, resid_ref,
               w_pw_ref, b_pw_ref,
               w_a1_ref, b_a1_ref,
               w_a2_ref, b_a2_ref,
               w_a3_ref, b_a3_ref,
               s_sum_ref, e_exp_ref,
               w_att_ref, b_att_ref,
               w_c_ref, b_c_ref,
               w_fuse_ref, b_fuse_ref,
               gamma_ref,
               out_ref):
    def leaky(v):                       # LeakyReLU(0.01): 2 VALU ops, no select
        return jnp.maximum(v, 0.01 * v)

    def bdot(a, w_ref):                 # bf16 x bf16 MXU matmul, f32 accumulate
        return jnp.dot(a.astype(jnp.bfloat16), w_ref[...],
                       preferred_element_type=jnp.float32)

    # ---- dilation blocks: pointwise conv (BN + depthwise-bias folded) -------
    f = leaky(bdot(dw_ref[...], w_pw_ref) + b_pw_ref[...])          # [TN, 4W]

    # ---- SPG_.aux_pred (block-diagonal over the 4 branches) ----------------
    a = leaky(bdot(f, w_a1_ref) + b_a1_ref[...])                    # [TN, 4W]
    a = leaky(bdot(a, w_a2_ref) + b_a2_ref[...])                    # [TN, 2W]
    coarse = bdot(a, w_a3_ref) + b_a3_ref[...]                      # [TN, 4*nc]

    # ---- per-branch softmax in fused layout ---------------------------------
    # Global row max is a valid stabilizer for every branch block; per-branch
    # sums via the block-indicator matmul s_sum; 1/sum is applied to the att
    # matmul output blocks via the expand matrix e_exp (exactly p @ W_att).
    m = jnp.max(coarse, axis=-1, keepdims=True)
    e = jnp.exp(coarse - m)                                         # [TN, 4*nc]
    s4 = jnp.dot(e, s_sum_ref[...], preferred_element_type=jnp.float32)  # [TN,4]
    inv = pl.reciprocal(s4, approx=True)                            # EUP
    scale = jnp.dot(inv, e_exp_ref[...],
                    preferred_element_type=jnp.float32)             # [TN, 4W]

    # ---- SPG_.att: conv (BN folded) + sigmoid -------------------------------
    att_lin = bdot(e, w_att_ref) * scale + b_att_ref[...]           # [TN, 4W]
    att = pl.reciprocal(1.0 + jnp.exp(-att_lin), approx=True)       # sigmoid

    # ---- gate + SPG_.conv ----------------------------------------------------
    o = leaky(bdot(f * att, w_c_ref) + b_c_ref[...])                # [TN, 4W]

    # ---- fuse (concat over branches == single [4W, C] matmul) + residual ----
    fused = leaky(bdot(o, w_fuse_ref) + b_fuse_ref[...])            # [TN, C]
    out_ref[...] = fused * gamma_ref[0] + resid_ref[...]


# ----------------------------------------------------------------------------
# Wrapper: BlockSpecs / grid / pallas_call
# ----------------------------------------------------------------------------
def jpu_pallas(dw_list, resid, FP, gamma, *, tile_n=512):
    N, C = resid.shape
    tn = min(tile_n, N)
    while N % tn:
        tn //= 2
    assert tn % 8 == 0 or tn == N, "pixel count must tile by 8"

    dw_cat = jnp.concatenate(dw_list, axis=-1).astype(jnp.bfloat16)  # [N, 4C]
    gamma_arr = jnp.asarray(gamma, jnp.float32).reshape(1)

    weights = [FP["w_pw"], FP["b_pw"], FP["w_a1"], FP["b_a1"],
               FP["w_a2"], FP["b_a2"], FP["w_a3"], FP["b_a3"],
               FP["s_sum"], FP["e_exp"],
               FP["w_att"], FP["b_att"], FP["w_c"], FP["b_c"],
               FP["w_fuse"], FP["b_fuse"]]

    def _const(shape):                      # resident weight block (never re-DMA'd)
        return pl.BlockSpec(shape, lambda i: (0, 0))

    C4 = dw_cat.shape[1]
    in_specs = [pl.BlockSpec((tn, C4), lambda i: (i, 0)),
                pl.BlockSpec((tn, C), lambda i: (i, 0))]
    in_specs += [_const(tuple(w.shape)) for w in weights]
    in_specs += [pl.BlockSpec(memory_space=pltpu.MemorySpace.SMEM)]  # gamma scalar

    # advisory cost estimate (matmul flops + softmax/sigmoid exps + HBM bytes)
    W4, W24, NC4 = FP["w_pw"].shape[1], FP["w_a2"].shape[1], FP["w_a3"].shape[1]
    flops = 2 * N * (C4 * W4 + W4 * W4 + W4 * W24 + W24 * NC4
                     + NC4 * 4 + 4 * W4 + NC4 * W4 + W4 * W4 + W4 * C)
    bytes_accessed = int(sum(a.size * a.dtype.itemsize
                             for a in (dw_cat, resid, *weights, gamma_arr))
                         + N * C * 4)
    ce = pl.CostEstimate(flops=int(flops),
                         transcendentals=int(N * (NC4 + W4)),
                         bytes_accessed=bytes_accessed)

    return pl.pallas_call(
        jpu_kernel,
        out_shape=jax.ShapeDtypeStruct((N, C), jnp.float32),
        grid_spec=pltpu.PrefetchScalarGridSpec(
            num_scalar_prefetch=0,
            grid=(N // tn,),
            in_specs=in_specs,
            out_specs=pl.BlockSpec((tn, C), lambda i: (i, 0)),
        ),
        compiler_params=pltpu.CompilerParams(
            dimension_semantics=("parallel",),
            vmem_limit_bytes=32 * 1024 * 1024),
        cost_estimate=ce,
    )(dw_cat, resid, *weights, gamma_arr)


# ----------------------------------------------------------------------------
# Glue: per-branch depthwise (dilated 3x3 / 1x1) maps, BN scale folded in.
# The 9-tap accumulation happens here (cheap shifted adds); only 4 [N, C] maps
# reach HBM/the kernel instead of 36 tap planes.
# ----------------------------------------------------------------------------
def build_dw_maps(x_nhwc, P, dilations=(1, 2, 4, 8)):
    B, H, W, C = x_nhwc.shape
    dw_w = P["dw_w"]                                   # [4, 9, C]
    maps = [(x_nhwc * dw_w[0, 4]).reshape(B * H * W, C)]   # 1x1 branch: center tap
    for b, d in zip(range(1, 4), dilations[1:]):
        xp = jnp.pad(x_nhwc, ((0, 0), (d, d), (d, d), (0, 0)))
        acc = jnp.zeros_like(x_nhwc)
        k = 0
        for i in range(3):
            for j in range(3):
                acc = acc + xp[:, i * d:i * d + H, j * d:j * d + W, :] * dw_w[b, k]
                k += 1
        maps.append(acc.reshape(B * H * W, C))
    return maps


# ----------------------------------------------------------------------------
# Deterministic per-branch parameter init (eval-mode BatchNorm folded in)
# ----------------------------------------------------------------------------
def init_params(key, C, width, nclass=10):
    w2 = width // 2
    eps = 1e-5
    keys = iter(jax.random.split(key, 256))

    def nrm(shape, scale):
        return jax.random.normal(next(keys), shape, jnp.float32) * scale

    def bn(c):  # (scale, bias) of eval-mode BatchNorm folding
        g = jax.random.uniform(next(keys), (c,), jnp.float32, 0.8, 1.2)
        beta = nrm((c,), 0.1)
        mean = nrm((c,), 0.1)
        var = jax.random.uniform(next(keys), (c,), jnp.float32, 0.5, 1.5)
        s = g / jnp.sqrt(var + eps)
        return s, beta - mean * s

    dw_w, dw_b = [], []
    w_pw, b_pw, w_a1, b_a1, w_a2, b_a2, w_a3, b_a3 = [], [], [], [], [], [], [], []
    w_att, b_att, w_c, b_c = [], [], [], []
    for b in range(4):
        if b == 0:  # kernel_size=1 branch: only the center tap exists
            dw_raw = jnp.zeros((9, C), jnp.float32).at[4].set(nrm((C,), 0.5))
        else:
            dw_raw = nrm((9, C), 0.2)
        s, t = bn(C)
        dw_w.append(dw_raw * s[None, :]); dw_b.append(t)
        w = nrm((C, width), 1.0 / np.sqrt(C)); s, t = bn(width)
        w_pw.append(w * s[None, :]); b_pw.append(t)
        w = nrm((width, width), 1.0 / np.sqrt(width)); s, t = bn(width)
        w_a1.append(w * s[None, :]); b_a1.append(t)
        w = nrm((width, w2), 1.0 / np.sqrt(width)); s, t = bn(w2)
        w_a2.append(w * s[None, :]); b_a2.append(t)
        w_a3.append(nrm((w2, nclass), 1.0 / np.sqrt(w2)))
        b_a3.append(nrm((nclass,), 0.1))           # conv has bias, no BN
        w = nrm((nclass, width), 1.0 / np.sqrt(nclass)); s, t = bn(width)
        w_att.append(w * s[None, :]); b_att.append(t)
        w = nrm((width, width), 1.0 / np.sqrt(width)); s, t = bn(width)
        w_c.append(w * s[None, :]); b_c.append(t)
    wf = nrm((4 * width, C), 1.0 / np.sqrt(4 * width)); s, t = bn(C)
    wf = wf * s[None, :]

    return dict(
        dw_w=jnp.stack(dw_w), dw_b=jnp.stack(dw_b),
        w_pw=jnp.stack(w_pw), b_pw=jnp.stack(b_pw),
        w_a1=jnp.stack(w_a1), b_a1=jnp.stack(b_a1),
        w_a2=jnp.stack(w_a2), b_a2=jnp.stack(b_a2),
        w_a3=jnp.stack(w_a3), b_a3=jnp.stack(b_a3),
        w_att=jnp.stack(w_att), b_att=jnp.stack(b_att),
        w_c=jnp.stack(w_c), b_c=jnp.stack(b_c),
        w_fuse=wf.reshape(4, width, C), b_fuse=t,
    )


# ----------------------------------------------------------------------------
# Fuse the per-branch params into block-diagonal bf16 matrices (one-time prep)
# ----------------------------------------------------------------------------
def fuse_params(P, C, width, nclass=10):
    def bd(mats):  # block-diagonal of a list of [k, n] matrices
        K = sum(m.shape[0] for m in mats)
        N = sum(m.shape[1] for m in mats)
        out = jnp.zeros((K, N), jnp.float32)
        ko = no = 0
        for m in mats:
            out = out.at[ko:ko + m.shape[0], no:no + m.shape[1]].set(m)
            ko += m.shape[0]; no += m.shape[1]
        return out

    per_b = lambda name: [P[name][b] for b in range(4)]
    bf16 = lambda a: a.astype(jnp.bfloat16)
    cat = lambda xs: jnp.concatenate(xs, axis=-1)[None, :]

    # fold the depthwise-BN bias forward through the (BN-folded) pointwise conv
    b_pw_eff = [P["dw_b"][b] @ P["w_pw"][b] + P["b_pw"][b] for b in range(4)]

    nc4, w4 = 4 * nclass, 4 * width
    s_sum = (jnp.arange(nc4)[:, None] // nclass ==
             jnp.arange(4)[None, :]).astype(jnp.float32)        # [4*nc, 4]
    e_exp = (jnp.arange(4)[:, None] ==
             jnp.arange(w4)[None, :] // width).astype(jnp.float32)  # [4, 4W]

    return dict(
        w_pw=bf16(bd(per_b("w_pw"))),   b_pw=cat(b_pw_eff),
        w_a1=bf16(bd(per_b("w_a1"))),   b_a1=cat(per_b("b_a1")),
        w_a2=bf16(bd(per_b("w_a2"))),   b_a2=cat(per_b("b_a2")),
        w_a3=bf16(bd(per_b("w_a3"))),   b_a3=cat(per_b("b_a3")),
        s_sum=s_sum, e_exp=e_exp,
        w_att=bf16(bd(per_b("w_att"))), b_att=cat(per_b("b_att")),
        w_c=bf16(bd(per_b("w_c"))),     b_c=cat(per_b("b_c")),
        w_fuse=bf16(jnp.concatenate(per_b("w_fuse"), axis=0)),  # [4W, C]
        b_fuse=P["b_fuse"][None, :],
    )


# ----------------------------------------------------------------------------
# Pure-JAX per-branch reference (mirrors the kernel's bf16-in / f32-acc dots)
# ----------------------------------------------------------------------------
def jpu_reference(dw_list, resid, P, gamma):
    leaky = lambda v: jnp.maximum(v, 0.01 * v)

    def mdot(a, w):
        return jnp.dot(a.astype(jnp.bfloat16), w.astype(jnp.bfloat16),
                       preferred_element_type=jnp.float32)

    fuse_acc = 0.0
    for b in range(4):
        dw = dw_list[b]
        f = leaky(mdot(dw, P["w_pw"][b])
                  + (P["dw_b"][b] @ P["w_pw"][b] + P["b_pw"][b]))
        a = leaky(mdot(f, P["w_a1"][b]) + P["b_a1"][b])
        a = leaky(mdot(a, P["w_a2"][b]) + P["b_a2"][b])
        coarse = mdot(a, P["w_a3"][b]) + P["b_a3"][b]
        p = jax.nn.softmax(coarse, axis=-1)
        att = jax.nn.sigmoid(mdot(p, P["w_att"][b]) + P["b_att"][b])
        o = leaky(mdot(f * att, P["w_c"][b]) + P["b_c"][b])
        fuse_acc = fuse_acc + mdot(o, P["w_fuse"][b])
    fused = leaky(fuse_acc + P["b_fuse"])
    return fused * gamma + resid


# ----------------------------------------------------------------------------
# NCHW-facing forward (matches the PyTorch module's calling convention)
# ----------------------------------------------------------------------------
def jpu_forward(feat_nchw, P, FP, gamma):
    B, C, H, W = feat_nchw.shape
    x = jnp.transpose(feat_nchw, (0, 2, 3, 1))                   # NHWC
    dw_list = build_dw_maps(x, P)
    resid = x.reshape(B * H * W, C)
    out = jpu_pallas(dw_list, resid, FP, gamma)
    return jnp.transpose(out.reshape(B, H, W, C), (0, 3, 1, 2))  # back to NCHW


if __name__ == "__main__":
    key = jax.random.PRNGKey(0)
    kx, kp = jax.random.split(key)

    B, C, H, W = 2, 32, 32, 32        # in_channels=32 -> width=8, nclass=10
    width, nclass = C // 4, 10
    feat = jax.random.normal(kx, (B, C, H, W), jnp.float32)

    P = init_params(kp, C, width, nclass)
    FP = fuse_params(P, C, width, nclass)

    # internal numerical check (gamma=1 exercises the whole pipeline)
    x_nhwc = jnp.transpose(feat, (0, 2, 3, 1))
    dw_list = build_dw_maps(x_nhwc, P)
    resid = x_nhwc.reshape(B * H * W, C)
    out_kernel = jpu_pallas(dw_list, resid, FP, 1.0)
    out_ref = jpu_reference(dw_list, resid, P, 1.0)
    np.testing.assert_allclose(np.asarray(out_kernel), np.asarray(out_ref),
                               rtol=2e-2, atol=2e-2)

    # module-faithful run: nn.Parameter gamma is initialized to zeros
    fwd = jax.jit(jpu_forward)
    out = fwd(feat, P, FP, 0.0)
    jax.block_until_ready(out)
    assert out.shape == (B, C, H, W)
    print("KERNEL_OK")
</pallas_src>

<mosaic_0001>
module attributes {stable_mosaic.version = 11 : i64} {
  func.func @jpu_kernel(%arg0: i32, %arg1: memref<512x128xbf16, #tpu.memory_space<vmem>>, %arg2: memref<512x32xf32, #tpu.memory_space<vmem>>, %arg3: memref<128x32xbf16, #tpu.memory_space<vmem>>, %arg4: memref<1x32xf32, #tpu.memory_space<vmem>>, %arg5: memref<32x32xbf16, #tpu.memory_space<vmem>>, %arg6: memref<1x32xf32, #tpu.memory_space<vmem>>, %arg7: memref<32x16xbf16, #tpu.memory_space<vmem>>, %arg8: memref<1x16xf32, #tpu.memory_space<vmem>>, %arg9: memref<16x40xbf16, #tpu.memory_space<vmem>>, %arg10: memref<1x40xf32, #tpu.memory_space<vmem>>, %arg11: memref<40x4xf32, #tpu.memory_space<vmem>>, %arg12: memref<4x32xf32, #tpu.memory_space<vmem>>, %arg13: memref<40x32xbf16, #tpu.memory_space<vmem>>, %arg14: memref<1x32xf32, #tpu.memory_space<vmem>>, %arg15: memref<32x32xbf16, #tpu.memory_space<vmem>>, %arg16: memref<1x32xf32, #tpu.memory_space<vmem>>, %arg17: memref<32x32xbf16, #tpu.memory_space<vmem>>, %arg18: memref<1x32xf32, #tpu.memory_space<vmem>>, %arg19: memref<1xf32, #tpu.memory_space<smem>>, %arg20: memref<512x32xf32, #tpu.memory_space<vmem>>) attributes {dimension_semantics = [#tpu.dimension_semantics<parallel>], iteration_bounds = array<i64: 4>, scalar_prefetch = 0 : i64, scratch_operands = 0 : i64, tpu.core_type = #tpu.core_type<tc>, window_params = [{transform_indices = @transform_0, window_bounds = array<i64: 512, 128>}, {transform_indices = @transform_1, window_bounds = array<i64: 512, 32>}, {pipeline_mode = #tpu.pipeline_mode<synchronous>, transform_indices = @transform_2, window_bounds = array<i64: 128, 32>}, {pipeline_mode = #tpu.pipeline_mode<synchronous>, transform_indices = @transform_3, window_bounds = array<i64: 1, 32>}, {pipeline_mode = #tpu.pipeline_mode<synchronous>, transform_indices = @transform_4, window_bounds = array<i64: 32, 32>}, {pipeline_mode = #tpu.pipeline_mode<synchronous>, transform_indices = @transform_5, window_bounds = array<i64: 1, 32>}, {pipeline_mode = #tpu.pipeline_mode<synchronous>, transform_indices = @transform_6, window_bounds = array<i64: 32, 16>}, {pipeline_mode = #tpu.pipeline_mode<synchronous>, transform_indices = @transform_7, window_bounds = array<i64: 1, 16>}, {pipeline_mode = #tpu.pipeline_mode<synchronous>, transform_indices = @transform_8, window_bounds = array<i64: 16, 40>}, {pipeline_mode = #tpu.pipeline_mode<synchronous>, transform_indices = @transform_9, window_bounds = array<i64: 1, 40>}, {pipeline_mode = #tpu.pipeline_mode<synchronous>, transform_indices = @transform_10, window_bounds = array<i64: 40, 4>}, {pipeline_mode = #tpu.pipeline_mode<synchronous>, transform_indices = @transform_11, window_bounds = array<i64: 4, 32>}, {pipeline_mode = #tpu.pipeline_mode<synchronous>, transform_indices = @transform_12, window_bounds = array<i64: 40, 32>}, {pipeline_mode = #tpu.pipeline_mode<synchronous>, transform_indices = @transform_13, window_bounds = array<i64: 1, 32>}, {pipeline_mode = #tpu.pipeline_mode<synchronous>, transform_indices = @transform_14, window_bounds = array<i64: 32, 32>}, {pipeline_mode = #tpu.pipeline_mode<synchronous>, transform_indices = @transform_15, window_bounds = array<i64: 1, 32>}, {pipeline_mode = #tpu.pipeline_mode<synchronous>, transform_indices = @transform_16, window_bounds = array<i64: 32, 32>}, {pipeline_mode = #tpu.pipeline_mode<synchronous>, transform_indices = @transform_17, window_bounds = array<i64: 1, 32>}, {transform_indices = @transform_18, window_bounds = array<i64: 1>}, {transform_indices = @transform_19, window_bounds = array<i64: 512, 32>}]} {
    %c0 = arith.constant 0 : index
    %c0_0 = arith.constant 0 : index
    %0 = vector.load %arg1[%c0, %c0_0] : memref<512x128xbf16, #tpu.memory_space<vmem>>, vector<512x128xbf16>
    %c0_1 = arith.constant 0 : index
    %c0_2 = arith.constant 0 : index
    %1 = vector.load %arg3[%c0_1, %c0_2] : memref<128x32xbf16, #tpu.memory_space<vmem>>, vector<128x32xbf16>
    %cst = arith.constant dense<0.000000e+00> : vector<512x32xf32>
    %2 = tpu.matmul %0, %1, %cst {dimension_numbers = #tpu.dot_dimension_numbers<[1], [0], [0], [1], [0, 0, 1, 1], [], []>} : vector<512x128xbf16>, vector<128x32xbf16>, vector<512x32xf32> -> vector<512x32xf32>
    %c0_3 = arith.constant 0 : index
    %c0_4 = arith.constant 0 : index
    %3 = vector.load %arg4[%c0_3, %c0_4] : memref<1x32xf32, #tpu.memory_space<vmem>>, vector<1x32xf32>
    %4 = vector.broadcast %3 : vector<1x32xf32> to vector<512x32xf32>
    %5 = arith.addf %2, %4 : vector<512x32xf32>
    %cst_5 = arith.constant 0.00999999977 : f32
    %6 = vector.broadcast %cst_5 : f32 to vector<512x32xf32>
    %7 = arith.mulf %6, %5 : vector<512x32xf32>
    %8 = arith.maximumf %5, %7 : vector<512x32xf32>
    %9 = arith.truncf %8 : vector<512x32xf32> to vector<512x32xbf16>
    %c0_6 = arith.constant 0 : index
    %c0_7 = arith.constant 0 : index
    %10 = vector.load %arg5[%c0_6, %c0_7] : memref<32x32xbf16, #tpu.memory_space<vmem>>, vector<32x32xbf16>
    %cst_8 = arith.constant dense<0.000000e+00> : vector<512x32xf32>
    %11 = tpu.matmul %9, %10, %cst_8 {dimension_numbers = #tpu.dot_dimension_numbers<[1], [0], [0], [1], [0, 0, 1, 1], [], []>} : vector<512x32xbf16>, vector<32x32xbf16>, vector<512x32xf32> -> vector<512x32xf32>
    %c0_9 = arith.constant 0 : index
    %c0_10 = arith.constant 0 : index
    %12 = vector.load %arg6[%c0_9, %c0_10] : memref<1x32xf32, #tpu.memory_space<vmem>>, vector<1x32xf32>
    %13 = vector.broadcast %12 : vector<1x32xf32> to vector<512x32xf32>
    %14 = arith.addf %11, %13 : vector<512x32xf32>
    %cst_11 = arith.constant 0.00999999977 : f32
    %15 = vector.broadcast %cst_11 : f32 to vector<512x32xf32>
    %16 = arith.mulf %15, %14 : vector<512x32xf32>
    %17 = arith.maximumf %14, %16 : vector<512x32xf32>
    %18 = arith.truncf %17 : vector<512x32xf32> to vector<512x32xbf16>
    %c0_12 = arith.constant 0 : index
    %c0_13 = arith.constant 0 : index
    %19 = vector.load %arg7[%c0_12, %c0_13] : memref<32x16xbf16, #tpu.memory_space<vmem>>, vector<32x16xbf16>
    %cst_14 = arith.constant dense<0.000000e+00> : vector<512x16xf32>
    %20 = tpu.matmul %18, %19, %cst_14 {dimension_numbers = #tpu.dot_dimension_numbers<[1], [0], [0], [1], [0, 0, 1, 1], [], []>} : vector<512x32xbf16>, vector<32x16xbf16>, vector<512x16xf32> -> vector<512x16xf32>
    %c0_15 = arith.constant 0 : index
    %c0_16 = arith.constant 0 : index
    %21 = vector.load %arg8[%c0_15, %c0_16] : memref<1x16xf32, #tpu.memory_space<vmem>>, vector<1x16xf32>
    %22 = vector.broadcast %21 : vector<1x16xf32> to vector<512x16xf32>
    %23 = arith.addf %20, %22 : vector<512x16xf32>
    %cst_17 = arith.constant 0.00999999977 : f32
    %24 = vector.broadcast %cst_17 : f32 to vector<512x16xf32>
    %25 = arith.mulf %24, %23 : vector<512x16xf32>
    %26 = arith.maximumf %23, %25 : vector<512x16xf32>
    %27 = arith.truncf %26 : vector<512x16xf32> to vector<512x16xbf16>
    %c0_18 = arith.constant 0 : index
    %c0_19 = arith.constant 0 : index
    %28 = vector.load %arg9[%c0_18, %c0_19] : memref<16x40xbf16, #tpu.memory_space<vmem>>, vector<16x40xbf16>
    %cst_20 = arith.constant dense<0.000000e+00> : vector<512x40xf32>
    %29 = tpu.matmul %27, %28, %cst_20 {dimension_numbers = #tpu.dot_dimension_numbers<[1], [0], [0], [1], [0, 0, 1, 1], [], []>} : vector<512x16xbf16>, vector<16x40xbf16>, vector<512x40xf32> -> vector<512x40xf32>
    %c0_21 = arith.constant 0 : index
    %c0_22 = arith.constant 0 : index
    %30 = vector.load %arg10[%c0_21, %c0_22] : memref<1x40xf32, #tpu.memory_space<vmem>>, vector<1x40xf32>
    %31 = vector.broadcast %30 : vector<1x40xf32> to vector<512x40xf32>
    %32 = arith.addf %29, %31 : vector<512x40xf32>
    %cst_23 = arith.constant dense<0xFF800000> : vector<512xf32>
    %33 = vector.multi_reduction <maximumf>, %32, %cst_23 [1] : vector<512x40xf32> to vector<512xf32>
    %34 = vector.shape_cast %33 : vector<512xf32> to vector<512x1xf32>
    %35 = vector.broadcast %34 : vector<512x1xf32> to vector<512x40xf32>
    %36 = arith.subf %32, %35 : vector<512x40xf32>
    %37 = math.exp %36 : vector<512x40xf32>
    %c0_24 = arith.constant 0 : index
    %c0_25 = arith.constant 0 : index
    %38 = vector.load %arg11[%c0_24, %c0_25] : memref<40x4xf32, #tpu.memory_space<vmem>>, vector<40x4xf32>
    %cst_26 = arith.constant dense<0.000000e+00> : vector<512x4xf32>
    %39 = tpu.matmul %37, %38, %cst_26 {dimension_numbers = #tpu.dot_dimension_numbers<[1], [0], [0], [1], [0, 0, 1, 1], [], []>} : vector<512x40xf32>, vector<40x4xf32>, vector<512x4xf32> -> vector<512x4xf32>
    %40 = tpu.reciprocal %39 {approx = true} : vector<512x4xf32> -> vector<512x4xf32>
    %c0_27 = arith.constant 0 : index
    %c0_28 = arith.constant 0 : index
    %41 = vector.load %arg12[%c0_27, %c0_28] : memref<4x32xf32, #tpu.memory_space<vmem>>, vector<4x32xf32>
    %cst_29 = arith.constant dense<0.000000e+00> : vector<512x32xf32>
    %42 = tpu.matmul %40, %41, %cst_29 {dimension_numbers = #tpu.dot_dimension_numbers<[1], [0], [0], [1], [0, 0, 1, 1], [], []>} : vector<512x4xf32>, vector<4x32xf32>, vector<512x32xf32> -> vector<512x32xf32>
    %43 = arith.truncf %37 : vector<512x40xf32> to vector<512x40xbf16>
    %c0_30 = arith.constant 0 : index
    %c0_31 = arith.constant 0 : index
    %44 = vector.load %arg13[%c0_30, %c0_31] : memref<40x32xbf16, #tpu.memory_space<vmem>>, vector<40x32xbf16>
    %cst_32 = arith.constant dense<0.000000e+00> : vector<512x32xf32>
    %45 = tpu.matmul %43, %44, %cst_32 {dimension_numbers = #tpu.dot_dimension_numbers<[1], [0], [0], [1], [0, 0, 1, 1], [], []>} : vector<512x40xbf16>, vector<40x32xbf16>, vector<512x32xf32> -> vector<512x32xf32>
    %46 = arith.mulf %45, %42 : vector<512x32xf32>
    %c0_33 = arith.constant 0 : index
    %c0_34 = arith.constant 0 : index
    %47 = vector.load %arg14[%c0_33, %c0_34] : memref<1x32xf32, #tpu.memory_space<vmem>>, vector<1x32xf32>
    %48 = vector.broadcast %47 : vector<1x32xf32> to vector<512x32xf32>
    %49 = arith.addf %46, %48 : vector<512x32xf32>
    %cst_35 = arith.constant 0.000000e+00 : f32
    %50 = vector.broadcast %cst_35 : f32 to vector<512x32xf32>
    %51 = arith.subf %50, %49 : vector<512x32xf32>
    %52 = math.exp %51 : vector<512x32xf32>
    %cst_36 = arith.constant 1.000000e+00 : f32
    %53 = vector.broadcast %cst_36 : f32 to vector<512x32xf32>
    %54 = arith.addf %53, %52 : vector<512x32xf32>
    %55 = tpu.reciprocal %54 {approx = true} : vector<512x32xf32> -> vector<512x32xf32>
    %56 = arith.mulf %8, %55 : vector<512x32xf32>
    %57 = arith.truncf %56 : vector<512x32xf32> to vector<512x32xbf16>
    %c0_37 = arith.constant 0 : index
    %c0_38 = arith.constant 0 : index
    %58 = vector.load %arg15[%c0_37, %c0_38] : memref<32x32xbf16, #tpu.memory_space<vmem>>, vector<32x32xbf16>
    %cst_39 = arith.constant dense<0.000000e+00> : vector<512x32xf32>
    %59 = tpu.matmul %57, %58, %cst_39 {dimension_numbers = #tpu.dot_dimension_numbers<[1], [0], [0], [1], [0, 0, 1, 1], [], []>} : vector<512x32xbf16>, vector<32x32xbf16>, vector<512x32xf32> -> vector<512x32xf32>
    %c0_40 = arith.constant 0 : index
    %c0_41 = arith.constant 0 : index
    %60 = vector.load %arg16[%c0_40, %c0_41] : memref<1x32xf32, #tpu.memory_space<vmem>>, vector<1x32xf32>
    %61 = vector.broadcast %60 : vector<1x32xf32> to vector<512x32xf32>
    %62 = arith.addf %59, %61 : vector<512x32xf32>
    %cst_42 = arith.constant 0.00999999977 : f32
    %63 = vector.broadcast %cst_42 : f32 to vector<512x32xf32>
    %64 = arith.mulf %63, %62 : vector<512x32xf32>
    %65 = arith.maximumf %62, %64 : vector<512x32xf32>
    %66 = arith.truncf %65 : vector<512x32xf32> to vector<512x32xbf16>
    %c0_43 = arith.constant 0 : index
    %c0_44 = arith.constant 0 : index
    %67 = vector.load %arg17[%c0_43, %c0_44] : memref<32x32xbf16, #tpu.memory_space<vmem>>, vector<32x32xbf16>
    %cst_45 = arith.constant dense<0.000000e+00> : vector<512x32xf32>
    %68 = tpu.matmul %66, %67, %cst_45 {dimension_numbers = #tpu.dot_dimension_numbers<[1], [0], [0], [1], [0, 0, 1, 1], [], []>} : vector<512x32xbf16>, vector<32x32xbf16>, vector<512x32xf32> -> vector<512x32xf32>
    %c0_46 = arith.constant 0 : index
    %c0_47 = arith.constant 0 : index
    %69 = vector.load %arg18[%c0_46, %c0_47] : memref<1x32xf32, #tpu.memory_space<vmem>>, vector<1x32xf32>
    %70 = vector.broadcast %69 : vector<1x32xf32> to vector<512x32xf32>
    %71 = arith.addf %68, %70 : vector<512x32xf32>
    %cst_48 = arith.constant 0.00999999977 : f32
    %72 = vector.broadcast %cst_48 : f32 to vector<512x32xf32>
    %73 = arith.mulf %72, %71 : vector<512x32xf32>
    %74 = arith.maximumf %71, %73 : vector<512x32xf32>
    %c0_49 = arith.constant 0 : index
    %75 = memref.load %arg19[%c0_49] : memref<1xf32, #tpu.memory_space<smem>>
    %76 = vector.broadcast %75 : f32 to vector<512x32xf32>
    %77 = arith.mulf %74, %76 : vector<512x32xf32>
    %c0_50 = arith.constant 0 : index
    %c0_51 = arith.constant 0 : index
    %78 = vector.load %arg2[%c0_50, %c0_51] : memref<512x32xf32, #tpu.memory_space<vmem>>, vector<512x32xf32>
    %79 = arith.addf %77, %78 : vector<512x32xf32>
    %c0_52 = arith.constant 0 : index
    %c0_53 = arith.constant 0 : index
    %80 = vector.load %arg20[%c0_52, %c0_53] : memref<512x32xf32, #tpu.memory_space<vmem>>, vector<512x32xf32>
    tpu.vector_store %arg20[%c0_52, %c0_53], %79 {strides = array<i32>} : memref<512x32xf32, #tpu.memory_space<vmem>>, vector<512x32xf32>,
    return
  }
  func.func @transform_0(%arg0: i32) -> (i32, i32) {
    %c0_i32 = arith.constant 0 : i32
    %c0_i32_0 = arith.constant 0 : i32
    return %arg0, %c0_i32 : i32, i32
  }
  func.func @transform_1(%arg0: i32) -> (i32, i32) {
    %c0_i32 = arith.constant 0 : i32
    %c0_i32_0 = arith.constant 0 : i32
    return %arg0, %c0_i32 : i32, i32
  }
  func.func @transform_2(%arg0: i32) -> (i32, i32) {
    %c0_i32 = arith.constant 0 : i32
    %c0_i32_0 = arith.constant 0 : i32
    %c0_i32_1 = arith.constant 0 : i32
    return %c0_i32, %c0_i32_0 : i32, i32
  }
  func.func @transform_3(%arg0: i32) -> (i32, i32) {
    %c0_i32 = arith.constant 0 : i32
    %c0_i32_0 = arith.constant 0 : i32
    %c0_i32_1 = arith.constant 0 : i32
    return %c0_i32, %c0_i32_0 : i32, i32
  }
  func.func @transform_4(%arg0: i32) -> (i32, i32) {
    %c0_i32 = arith.constant 0 : i32
    %c0_i32_0 = arith.constant 0 : i32
    %c0_i32_1 = arith.constant 0 : i32
    return %c0_i32, %c0_i32_0 : i32, i32
  }
  func.func @transform_5(%arg0: i32) -> (i32, i32) {
    %c0_i32 = arith.constant 0 : i32
    %c0_i32_0 = arith.constant 0 : i32
    %c0_i32_1 = arith.constant 0 : i32
    return %c0_i32, %c0_i32_0 : i32, i32
  }
  func.func @transform_6(%arg0: i32) -> (i32, i32) {
    %c0_i32 = arith.constant 0 : i32
    %c0_i32_0 = arith.constant 0 : i32
    %c0_i32_1 = arith.constant 0 : i32
    return %c0_i32, %c0_i32_0 : i32, i32
  }
  func.func @transform_7(%arg0: i32) -> (i32, i32) {
    %c0_i32 = arith.constant 0 : i32
    %c0_i32_0 = arith.constant 0 : i32
    %c0_i32_1 = arith.constant 0 : i32
    return %c0_i32, %c0_i32_0 : i32, i32
  }
  func.func @transform_8(%arg0: i32) -> (i32, i32) {
    %c0_i32 = arith.constant 0 : i32
    %c0_i32_0 = arith.constant 0 : i32
    %c0_i32_1 = arith.constant 0 : i32
    return %c0_i32, %c0_i32_0 : i32, i32
  }
  func.func @transform_9(%arg0: i32) -> (i32, i32) {
    %c0_i32 = arith.constant 0 : i32
    %c0_i32_0 = arith.constant 0 : i32
    %c0_i32_1 = arith.constant 0 : i32
    return %c0_i32, %c0_i32_0 : i32, i32
  }
  func.func @transform_10(%arg0: i32) -> (i32, i32) {
    %c0_i32 = arith.constant 0 : i32
    %c0_i32_0 = arith.constant 0 : i32
    %c0_i32_1 = arith.constant 0 : i32
    return %c0_i32, %c0_i32_0 : i32, i32
  }
  func.func @transform_11(%arg0: i32) -> (i32, i32) {
    %c0_i32 = arith.constant 0 : i32
    %c0_i32_0 = arith.constant 0 : i32
    %c0_i32_1 = arith.constant 0 : i32
    return %c0_i32, %c0_i32_0 : i32, i32
  }
  func.func @transform_12(%arg0: i32) -> (i32, i32) {
    %c0_i32 = arith.constant 0 : i32
    %c0_i32_0 = arith.constant 0 : i32
    %c0_i32_1 = arith.constant 0 : i32
    return %c0_i32, %c0_i32_0 : i32, i32
  }
  func.func @transform_13(%arg0: i32) -> (i32, i32) {
    %c0_i32 = arith.constant 0 : i32
    %c0_i32_0 = arith.constant 0 : i32
    %c0_i32_1 = arith.constant 0 : i32
    return %c0_i32, %c0_i32_0 : i32, i32
  }
  func.func @transform_14(%arg0: i32) -> (i32, i32) {
    %c0_i32 = arith.constant 0 : i32
    %c0_i32_0 = arith.constant 0 : i32
    %c0_i32_1 = arith.constant 0 : i32
    return %c0_i32, %c0_i32_0 : i32, i32
  }
  func.func @transform_15(%arg0: i32) -> (i32, i32) {
    %c0_i32 = arith.constant 0 : i32
    %c0_i32_0 = arith.constant 0 : i32
    %c0_i32_1 = arith.constant 0 : i32
    return %c0_i32, %c0_i32_0 : i32, i32
  }
  func.func @transform_16(%arg0: i32) -> (i32, i32) {
    %c0_i32 = arith.constant 0 : i32
    %c0_i32_0 = arith.constant 0 : i32
    %c0_i32_1 = arith.constant 0 : i32
    return %c0_i32, %c0_i32_0 : i32, i32
  }
  func.func @transform_17(%arg0: i32) -> (i32, i32) {
    %c0_i32 = arith.constant 0 : i32
    %c0_i32_0 = arith.constant 0 : i32
    %c0_i32_1 = arith.constant 0 : i32
    return %c0_i32, %c0_i32_0 : i32, i32
  }
  func.func @transform_18(%arg0: i32) -> i32 {
    %c0_i32 = arith.constant 0 : i32
    %c0_i32_0 = arith.constant 0 : i32
    return %c0_i32 : i32
  }
  func.func @transform_19(%arg0: i32) -> (i32, i32) {
    %c0_i32 = arith.constant 0 : i32
    %c0_i32_0 = arith.constant 0 : i32
    return %arg0, %c0_i32 : i32, i32
  }
}

</mosaic_0001>

<bundles_post_ra>
// kernel: tpu_custom_call.1
= control target key start
LH: loop header
LB: loop body
LE: loop exit
PB: predicated region body
PF: predicated region fallthrough
CT: control target
= control target key end

     0   :  { %s9137_s20 = smov 0   ;;  %s11471_s0 = inlined_call_operand.vmem [shape: bf16[2048,128], index: 0, kind: input, shape index: {}]   ;;  %s11472_s1 = inlined_call_operand.vmem [shape: f32[2048,32], index: 1, kind: input, shape index: {}]   ;;  %s11473_s2 = inlined_call_operand.vmem [shape: bf16[128,32], index: 2, kind: input, shape index: {}]   ;;  %s11474_s3 = inlined_call_operand.vmem [shape: f32[1,32], index: 3, kind: input, shape index: {}]   ;;  %s11475_s4 = inlined_call_operand.vmem [shape: bf16[32,32], index: 4, kind: input, shape index: {}]   ;;  %s11476_s5 = inlined_call_operand.vmem [shape: f32[1,32], index: 5, kind: input, shape index: {}]   ;;  %s11477_s6 = inlined_call_operand.vmem [shape: bf16[32,16], index: 6, kind: input, shape index: {}]   ;;  %s11478_s7 = inlined_call_operand.vmem [shape: f32[1,16], index: 7, kind: input, shape index: {}]   ;;  %s11479_s8 = inlined_call_operand.vmem [shape: bf16[16,40], index: 8, kind: input, shape index: {}]   ;;  %s11480_s9 = inlined_call_operand.vmem [shape: f32[1,40], index: 9, kind: input, shape index: {}]   ;;  %s11481_s10 = inlined_call_operand.vmem [shape: f32[40,4], index: 10, kind: input, shape index: {}]   ;;  %s11482_s11 = inlined_call_operand.vmem [shape: f32[4,32], index: 11, kind: input, shape index: {}]   ;;  %s11483_s12 = inlined_call_operand.vmem [shape: bf16[40,32], index: 12, kind: input, shape index: {}]   ;;  %s11484_s13 = inlined_call_operand.vmem [shape: f32[1,32], index: 13, kind: input, shape index: {}]   ;;  %s11485_s14 = inlined_call_operand.vmem [shape: bf16[32,32], index: 14, kind: input, shape index: {}]   ;;  %s11486_s15 = inlined_call_operand.vmem [shape: f32[1,32], index: 15, kind: input, shape index: {}]   ;;  %s11487_s16 = inlined_call_operand.vmem [shape: bf16[32,32], index: 16, kind: input, shape index: {}]   ;;  %s11488_s17 = inlined_call_operand.vmem [shape: f32[1,32], index: 17, kind: input, shape index: {}]   ;;  %s11489_s18 = inlined_call_operand.<no memory space> [shape: f32[1], index: 18, kind: input, shape index: {}]   ;;  %s11490_s19 = inlined_call_operand.vmem [shape: f32[2048,32], index: 19, kind: output, shape index: {}]  }
   0x1   :  { %11574 = sst [smem:[#allocation80_spill]] %s11471_s0 }
   0x2   :  { %11575 = sst [smem:[#allocation81_spill]] %s11472_s1 }
   0x3   :  { %11576 = sst [smem:[#allocation82_spill]] %s11473_s2 }
   0x4   :  { %11577 = sst [smem:[#allocation83_spill]] %s11474_s3 }
   0x5   :  { %24 = sst [smem:[#allocation2]] %s11489_s18 }
   0x6 LB: > { %s6979_s21 = sadd.s32 4294967295, %s9032_s20   ;;  %p6983_p0 = scmp.ge.s32.totalorder %s9032_s20, 1  ;;  %s9032_s20 = sphi %s9137_s20, %s30_s20  }
   0x7   : > { %p550_p1 = scmp.lt.s32.totalorder %s9032_s20, 5 }
   0x9   : > { %p551_p2 = pnand %p6983_p0, %p550_p1 }
   0xb   : > { %554 = sbr.rel (%p551_p2) target bundleno = 2037 (0x7f5), region = 96 }
  0x10   : > { %s11578_s2 = sld [smem:[#allocation82_spill]]  ;;  %s6984_s18 = sshll.u32 %s6979_s21, 6  ;;  %v8501_v29 = vld [vmem:[%s11475_s4 + $0x8] sm:$0xff]   ;;  %v8502_v30 = vld [vmem:[%s11475_s4] sm:$0xff]   ;;  %vm1429_vm0 = vcmask 261120   ;;  %vm2558_vm1 = vcmask 130048  }
  0x11   : > { %p612_p3 = scmp.lt.s32.totalorder %s6984_s18, 255  ;;  %s11579_s29 = sld [smem:[#allocation80_spill]]  ;;  %7830 = vmatprep.subr.bf16.mxu1 %v8501_v29  ;;  %v8503_v42 = vld [vmem:[%s11477_s6 + $0x8] sm:$0xff]   ;;  %vm2944_vm2 = vcmask 326656   ;;  %vm4169_vm3 = vcmask 1043456   ;;  %vm3976_vm4 = vcmask 31744  }
  0x12   : > { %7831 = vmatpush3.bf16.msra.mxu1 %v8501_v29  ;;  %s11580_s25 = sld [smem:[#allocation83_spill]] }
  0x13   : > { %s11778_s18 = smov (!%p612_p3, %s6984_s18), 255  ;;  %7832 = vmatprep.subr.bf16.mxu1 %v8502_v30  ;;  %s6653_s27 = sld [smem:[#allocation2]] }
  0x14   : > { %s6985_s26 = sshll.u32 %s11778_s18, 2  ;;  %s6987_s30 = sshll.u32 %s11778_s18, 3 }
  0x15   : > { %s11776_s22 = sld [smem:[#allocation81_spill]] }
  0x16   : > { %v8461_v0 = vld [vmem:[%s11578_s2 + $0x38] sm:$0xff]   ;;  %v8462_v1 = vld [vmem:[%s11578_s2 + $0x30] sm:$0xff]   ;;  %v8463_v2 = vld [vmem:[%s11578_s2 + $0x28] sm:$0xff]   ;;  %7833 = vmatpush3.bf16.msra.mxu1 %v8502_v30 }
  0x17   : > { %7750 = vmatprep.subr.bf16.mxu0 %v8461_v0  ;;  %s9160_s0 = scalar_lea.vmem %s11579_s29, %s6985_s26  ;;  %v8464_v3 = vld [vmem:[%s11578_s2 + $0x20] sm:$0xff]   ;;  %v8465_v5 = vld [vmem:[%s11578_s2 + $0x18] sm:$0xff]   ;;  %v8466_v6 = vld [vmem:[%s11578_s2 + $0x10] sm:$0xff]   ;;  %7898 = vmatprep.subr.bf16.mxu1 %v8503_v42 }
  0x18   : > { %7751 = vmatpush3.bf16.msra.mxu0 %v8461_v0  ;;  %v8469_v4 = vld [vmem:[%s9160_s0] sm:$0xff]   ;;  %v8467_v7 = vld [vmem:[%s11578_s2 + $0x8] sm:$0xff]   ;;  %v8471_v10 = vld [vmem:[%s9160_s0 + $0x10] sm:$0xff]  }
  0x19   : > { %7752 = vmatprep.subr.bf16.mxu0 %v8462_v1  ;;  %7766 = vmatprep.mubr.bf16.mxu0 %v8469_v4  ;;  %v8468_v8 = vld [vmem:[%s11578_s2] sm:$0xff]   ;;  %v8470_v9 = vld [vmem:[%s9160_s0 + $0x8] sm:$0xff]   ;;  %v8472_v11 = vld [vmem:[%s9160_s0 + $0x18] sm:$0xff]  }
  0x1a   : > { %v8473_v12 = vld [vmem:[%s9160_s0 + $0x20] sm:$0xff]   ;;  %v8474_v13 = vld [vmem:[%s9160_s0 + $0x28] sm:$0xff]   ;;  %v8475_v14 = vld [vmem:[%s9160_s0 + $0x30] sm:$0xff]  }
  0x1b   : > { %v8476_v15 = vld [vmem:[%s9160_s0 + $0x38] sm:$0xff]   ;;  %v8477_v16 = vld [vmem:[%s9160_s0 + $0x40] sm:$0xff]   ;;  %v8478_v17 = vld [vmem:[%s9160_s0 + $0x48] sm:$0xff]   ;;  %s11140_s23 = scalar_lea.vmem %s11776_s22, %s6987_s30 }
  0x1c   : > { %7753 = vmatpush3.bf16.msra.mxu0 %v8462_v1  ;;  %v8479_v18 = vld [vmem:[%s9160_s0 + $0x50] sm:$0xff]   ;;  %v8480_v19 = vld [vmem:[%s9160_s0 + $0x58] sm:$0xff]   ;;  %v8481_v20 = vld [vmem:[%s9160_s0 + $0x60] sm:$0xff]  }
  0x1d   : > { %7754 = vmatprep.subr.bf16.mxu0 %v8463_v2  ;;  %v8482_v21 = vld [vmem:[%s9160_s0 + $0x68] sm:$0xff]   ;;  %v8483_v22 = vld [vmem:[%s9160_s0 + $0x70] sm:$0xff]   ;;  %v8484_v23 = vld [vmem:[%s9160_s0 + $0x78] sm:$0xff]  }
  0x1e   : > { %v8485_v24 = vld [vmem:[%s9160_s0 + $0x80] sm:$0xff]   ;;  %v8486_v25 = vld [vmem:[%s9160_s0 + $0x88] sm:$0xff]   ;;  %v8487_v26 = vld [vmem:[%s9160_s0 + $0x90] sm:$0xff]  }
  0x1f   : > { %v8488_v27 = vld [vmem:[%s9160_s0 + $0x98] sm:$0xff]   ;;  %v8489_v28 = vld [vmem:[%s9160_s0 + $0xa0] sm:$0xff]   ;;  %v8490_v31 = vld [vmem:[%s9160_s0 + $0xa8] sm:$0xff]  }
  0x20   : > { %7755 = vmatpush3.bf16.msra.mxu0 %v8463_v2  ;;  %v8491_v32 = vld [vmem:[%s9160_s0 + $0xb0] sm:$0xff]   ;;  %v8492_v33 = vld [vmem:[%s9160_s0 + $0xb8] sm:$0xff]   ;;  %v8493_v34 = vld [vmem:[%s9160_s0 + $0xc0] sm:$0xff]  }
  0x21   : > { %7756 = vmatprep.subr.bf16.mxu0 %v8464_v3  ;;  %v8494_v35 = vld [vmem:[%s9160_s0 + $0xc8] sm:$0xff]   ;;  %v8495_v36 = vld [vmem:[%s9160_s0 + $0xd0] sm:$0xff]   ;;  %v8496_v37 = vld [vmem:[%s9160_s0 + $0xd8] sm:$0xff]  }
  0x22   : > { %v8497_v38 = vld [vmem:[%s9160_s0 + $0xe0] sm:$0xff]   ;;  %v8498_v39 = vld [vmem:[%s9160_s0 + $0xe8] sm:$0xff]   ;;  %v8499_v40 = vld [vmem:[%s9160_s0 + $0xf0] sm:$0xff]  }
  0x23   : > { %v8500_v41 = vld [vmem:[%s9160_s0 + $0xf8] sm:$0xff]   ;;  %v9221_v44 = vld [vmem:[%s11580_s25] ss:$0 sm:$0xff]  ;;  %s11152_s25 = scalar_lea.vmem %s11490_s19, %s6987_s30 }
  0x24   : > { %7757 = vmatpush3.bf16.msra.mxu0 %v8464_v3 }
  0x25   : > { %7758 = vmatprep.subr.bf16.mxu0 %v8465_v5 }
  0x28   : > { %7759 = vmatpush3.bf16.msra.mxu0 %v8465_v5  ;;  %v8504_v5 = vld [vmem:[%s11477_s6] sm:$0xff]  }
  0x29   : > { %7760 = vmatprep.subr.bf16.mxu0 %v8466_v6 }
  0x2c   : > { %7761 = vmatpush3.bf16.msra.mxu0 %v8466_v6 }
  0x2d   : > { %7762 = vmatprep.subr.bf16.mxu0 %v8467_v7 }
  0x30   : > { %7763 = vmatpush3.bf16.msra.mxu0 %v8467_v7 }
  0x31   : > { %7764 = vmatprep.subr.bf16.mxu0 %v8468_v8 }
  0x34   : > { %7765 = vmatpush3.bf16.msra.mxu0 %v8468_v8 }
  0x37   : > { %7767 = vmatmul.mubr.bf16.vlgmr.msra.gmra.mxu0 %v8470_v9 }
  0x38   : > { %7770 = vmatprep.mubr.bf16.mxu0 %v8471_v10 }
  0x3f   : > { %7771 = vmatmul.mubr.bf16.gmra.mxu0 %v8472_v11 }
  0x40   : > { %7774 = vmatprep.mubr.bf16.mxu0 %v8473_v12 }
  0x47   : > { %7775 = vmatmul.mubr.bf16.gmra.mxu0 %v8474_v13 }
  0x48   : > { %7778 = vmatprep.mubr.bf16.mxu0 %v8475_v14 }
  0x4f   : > { %7779 = vmatmul.mubr.bf16.gmra.mxu0 %v8476_v15 }
  0x50   : > { %7782 = vmatprep.mubr.bf16.mxu0 %v8477_v16 }
  0x57   : > { %7783 = vmatmul.mubr.bf16.gmra.mxu0 %v8478_v17 }
  0x58   : > { %7786 = vmatprep.mubr.bf16.mxu0 %v8479_v18 }
  0x5f   : > { %7787 = vmatmul.mubr.bf16.gmra.mxu0 %v8480_v19 }
  0x60   : > { %7790 = vmatprep.mubr.bf16.mxu0 %v8481_v20 }
  0x67   : > { %7791 = vmatmul.mubr.bf16.gmra.mxu0 %v8482_v21 }
  0x68   : > { %7794 = vmatprep.mubr.bf16.mxu0 %v8483_v22 }
  0x6f   : > { %7795 = vmatmul.mubr.bf16.gmra.mxu0 %v8484_v23 }
  0x70   : > { %7798 = vmatprep.mubr.bf16.mxu0 %v8485_v24 }
  0x77   : > { %7799 = vmatmul.mubr.bf16.gmra.mxu0 %v8486_v25 }
  0x78   : > { %7802 = vmatprep.mubr.bf16.mxu0 %v8487_v26 }
  0x7f   : > { %7803 = vmatmul.mubr.bf16.gmra.mxu0 %v8488_v27 }
  0x80   : > { %7806 = vmatprep.mubr.bf16.mxu0 %v8489_v28 }
  0x87   : > { %7807 = vmatmul.mubr.bf16.gmra.mxu0 %v8490_v31 }
  0x88   : > { %7810 = vmatprep.mubr.bf16.mxu0 %v8491_v32 }
  0x8f   : > { %7811 = vmatmul.mubr.bf16.gmra.mxu0 %v8492_v33 }
  0x90   : > { %7814 = vmatprep.mubr.bf16.mxu0 %v8493_v34 }
  0x97   : > { %7815 = vmatmul.mubr.bf16.gmra.mxu0 %v8494_v35 }
  0x98   : > { %7818 = vmatprep.mubr.bf16.mxu0 %v8495_v36 }
  0x9f   : > { %7819 = vmatmul.mubr.bf16.gmra.mxu0 %v8496_v37 }
  0xa0   : > { %7822 = vmatprep.mubr.bf16.mxu0 %v8497_v38 }
  0xa7   : > { %7823 = vmatmul.mubr.bf16.gmra.mxu0 %v8498_v39 }
  0xa8   : > { %7826 = vmatprep.mubr.bf16.mxu0 %v8499_v40 }
  0xaf   : > { %7827 = vmatmul.mubr.bf16.gmra.mxu0 %v8500_v41 }
  0xf7   : > { %v7768_v43 = vpop.f32.mrf.mxu0 }
  0xf8   : > { %v1000_v47 = vadd.f32 %v7768_v43, %v9221_v44 }
  0xf9   : > { %v991_v45 = vpop.f32.mrf.mxu0 }
  0xfa   : > { %v992_v46 = vadd.f32 %v9221_v44, %v991_v45  ;;  %v1248_v54 = vmul.f32 0.01, %v1000_v47 }
  0xfb   : > { %v7769_v48 = vpop.f32.mrf.mxu0 }
  0xfc   : > { %v1003_v49 = vadd.f32 %v7769_v48, %v9221_v44  ;;  %v1246_v51 = vmul.f32 0.01, %v992_v46  ;;  %v9234_v62 = vmax.f32 %v1000_v47, %v1248_v54 }
  0xfd   : > { %v994_v50 = vpop.f32.mrf.mxu0 }
  0xfe   : > { %v1249_v52 = vmul.f32 0.01, %v1003_v49  ;;  %v995_v53 = vadd.f32 %v9221_v44, %v994_v50  ;;  %v9229_v59 = vmax.f32 %v992_v46, %v1246_v51  ;;  %11584 = vst [vmem:[#allocation6_spill] sm:$0xff] %v9234_v62 }
  0xff   : > { %v7772_v55 = vpop.f32.mrf.mxu0 }
 0x100   : > { %v1247_v56 = vmul.f32 0.01, %v995_v53  ;;  %v9227_v57 = vmax.f32 %v1003_v49, %v1249_v52  ;;  %11582 = vst [vmem:[#allocation4_spill] sm:$0xff] %v9229_v59  ;;  %v1016_v63 = vadd.f32 %v7772_v55, %v9221_v44 }
 0x101   : > { %v1007_v58 = vpop.f32.mrf.mxu0 }
 0x102   : > { %11581 = vst [vmem:[#allocation3_spill] sm:$0xff] %v9227_v57  ;;  %v1008_v60 = vadd.f32 %v9221_v44, %v1007_v58  ;;  %v9232_v61 = vmax.f32 %v995_v53, %v1247_v56  ;;  %v1375_v3 = vpack.c.bf16 %v9227_v57, %v9234_v62  ;;  %v1252_v9 = vmul.f32 0.01, %v1016_v63 }
 0x103   : > { %v7773_v0 = vpop.f32.mrf.mxu0 }
 0x104   : > { %11583 = vst [vmem:[#allocation5_spill] sm:$0xff] %v9232_v61  ;;  %v1019_v1 = vadd.f32 %v7773_v0, %v9221_v44  ;;  %v1374_v2 = vpack.c.bf16 %v9232_v61, %v9229_v59  ;;  %v1250_v6 = vmul.f32 0.01, %v1008_v60  ;;  %v9255_v17 = vmax.f32 %v1016_v63, %v1252_v9 }
 0x105   : > { %v1010_v4 = vpop.f32.mrf.mxu0 }
 0x106   : > { %v1253_v7 = vmul.f32 0.01, %v1019_v1  ;;  %v1011_v8 = vadd.f32 %v9221_v44, %v1010_v4  ;;  %7834 = vmatprep.mubr.msk.bf16.mxu1 %vm1429_vm0, %v1374_v2  ;;  %v9250_v14 = vmax.f32 %v1008_v60, %v1250_v6  ;;  %11588 = vst [vmem:[#allocation10_spill] sm:$0xff] %v9255_v17 }
 0x107   : > { %v7776_v10 = vpop.f32.mrf.mxu0  ;;  %7835 = vmatmul.mubr.msk.bf16.vlgmr.msra.gmra.mxu1 %vm1429_vm0, %v1375_v3 }
 0x108   : > { %v1251_v11 = vmul.f32 0.01, %v1011_v8  ;;  %7899 = vmatpush3.bf16.msra.mxu1 %v8503_v42  ;;  %v9248_v12 = vmax.f32 %v1019_v1, %v1253_v7  ;;  %11586 = vst [vmem:[#allocation8_spill] sm:$0xff] %v9250_v14  ;;  %v1032_v18 = vadd.f32 %v7776_v10, %v9221_v44 }
 0x109   : > { %v1023_v13 = vpop.f32.mrf.mxu0  ;;  %7900 = vmatprep.subr.bf16.mxu1 %v8504_v5 }
 0x10a   : > { %11585 = vst [vmem:[#allocation7_spill] sm:$0xff] %v9248_v12  ;;  %v9252_v15 = vmax.f32 %v1011_v8, %v1251_v11  ;;  %v1024_v16 = vadd.f32 %v9221_v44, %v1023_v13  ;;  %v1377_v22 = vpack.c.bf16 %v9248_v12, %v9255_v17  ;;  %v1256_v27 = vmul.f32 0.01, %v1032_v18 }
 0x10b   : > { %v7777_v19 = vpop.f32.mrf.mxu0 }
 0x10c   : > { %11587 = vst [vmem:[#allocation9_spill] sm:$0xff] %v9252_v15  ;;  %v1376_v20 = vpack.c.bf16 %v9252_v15, %v9250_v14  ;;  %v1035_v21 = vadd.f32 %v7777_v19, %v9221_v44  ;;  %7901 = vmatpush3.bf16.msra.mxu1 %v8504_v5  ;;  %v1254_v24 = vmul.f32 0.01, %v1024_v16  ;;  %v9273_v35 = vmax.f32 %v1032_v18, %v1256_v27 }
 0x10d   : > { %v1026_v23 = vpop.f32.mrf.mxu0 }
 0x10e   : > { %v1257_v25 = vmul.f32 0.01, %v1035_v21  ;;  %v1027_v26 = vadd.f32 %v9221_v44, %v1026_v23  ;;  %7838 = vmatprep.mubr.msk.bf16.mxu1 %vm1429_vm0, %v1376_v20  ;;  %v9268_v32 = vmax.f32 %v1024_v16, %v1254_v24  ;;  %11592 = vst [vmem:[#allocation14_spill] sm:$0xff] %v9273_v35 }
 0x10f   : > { %v7780_v28 = vpop.f32.mrf.mxu0  ;;  %7839 = vmatmul.mubr.msk.bf16.gmra.mxu1 %vm1429_vm0, %v1377_v22 }
 0x110   : > { %v1255_v29 = vmul.f32 0.01, %v1027_v26  ;;  %v9266_v30 = vmax.f32 %v1035_v21, %v1257_v25  ;;  %11590 = vst [vmem:[#allocation12_spill] sm:$0xff] %v9268_v32  ;;  %v1048_v36 = vadd.f32 %v7780_v28, %v9221_v44 }
 0x111   : > { %v1039_v31 = vpop.f32.mrf.mxu0 }
 0x112   : > { %11589 = vst [vmem:[#allocation11_spill] sm:$0xff] %v9266_v30  ;;  %v9270_v33 = vmax.f32 %v1027_v26, %v1255_v29  ;;  %v1040_v34 = vadd.f32 %v9221_v44, %v1039_v31  ;;  %v1379_v40 = vpack.c.bf16 %v9266_v30, %v9273_v35  ;;  %v1260_v46 = vmul.f32 0.01, %v1048_v36 }
 0x113   : > { %v7781_v37 = vpop.f32.mrf.mxu0 }
 0x114   : > { %11591 = vst [vmem:[#allocation13_spill] sm:$0xff] %v9270_v33  ;;  %v1378_v38 = vpack.c.bf16 %v9270_v33, %v9268_v32  ;;  %v1051_v39 = vadd.f32 %v7781_v37, %v9221_v44  ;;  %v1258_v42 = vmul.f32 0.01, %v1040_v34  ;;  %v9291_v54 = vmax.f32 %v1048_v36, %v1260_v46 }
 0x115   : > { %v1042_v41 = vpop.f32.mrf.mxu0 }
 0x116   : > { %v1261_v43 = vmul.f32 0.01, %v1051_v39  ;;  %v1043_v45 = vadd.f32 %v9221_v44, %v1042_v41  ;;  %7842 = vmatprep.mubr.msk.bf16.mxu1 %vm1429_vm0, %v1378_v38  ;;  %v9286_v51 = vmax.f32 %v1040_v34, %v1258_v42  ;;  %11596 = vst [vmem:[#allocation18_spill] sm:$0xff] %v9291_v54 }
 0x117   : > { %v7784_v47 = vpop.f32.mrf.mxu0  ;;  %7843 = vmatmul.mubr.msk.bf16.gmra.mxu1 %vm1429_vm0, %v1379_v40 }
 0x118   : > { %v1259_v48 = vmul.f32 0.01, %v1043_v45  ;;  %v9284_v49 = vmax.f32 %v1051_v39, %v1261_v43  ;;  %11594 = vst [vmem:[#allocation16_spill] sm:$0xff] %v9286_v51  ;;  %v1064_v55 = vadd.f32 %v7784_v47, %v9221_v44 }
 0x119   : > { %v1055_v50 = vpop.f32.mrf.mxu0 }
 0x11a   : > { %11593 = vst [vmem:[#allocation15_spill] sm:$0xff] %v9284_v49  ;;  %v9288_v52 = vmax.f32 %v1043_v45, %v1259_v48  ;;  %v1056_v53 = vadd.f32 %v9221_v44, %v1055_v50  ;;  %v1381_v63 = vpack.c.bf16 %v9284_v49, %v9291_v54  ;;  %v1264_v4 = vmul.f32 0.01, %v1064_v55 }
 0x11b   : > { %v7785_v56 = vpop.f32.mrf.mxu0 }
 0x11c   : > { %11595 = vst [vmem:[#allocation17_spill] sm:$0xff] %v9288_v52  ;;  %v1380_v58 = vpack.c.bf16 %v9288_v52, %v9286_v51  ;;  %v1067_v60 = vadd.f32 %v7785_v56, %v9221_v44  ;;  %v1262_v1 = vmul.f32 0.01, %v1056_v53  ;;  %v9309_v13 = vmax.f32 %v1064_v55, %v1264_v4 }
 0x11d   : > { %v1058_v0 = vpop.f32.mrf.mxu0 }
 0x11e   : > { %v1265_v2 = vmul.f32 0.01, %v1067_v60  ;;  %v1059_v3 = vadd.f32 %v9221_v44, %v1058_v0  ;;  %7846 = vmatprep.mubr.msk.bf16.mxu1 %vm1429_vm0, %v1380_v58  ;;  %v9304_v9 = vmax.f32 %v1056_v53, %v1262_v1  ;;  %11600 = vst [vmem:[#allocation22_spill] sm:$0xff] %v9309_v13 }
 0x11f   : > { %v7788_v5 = vpop.f32.mrf.mxu0  ;;  %7847 = vmatmul.mubr.msk.bf16.gmra.mxu1 %vm1429_vm0, %v1381_v63 }
 0x120   : > { %v1263_v6 = vmul.f32 0.01, %v1059_v3  ;;  %v9302_v7 = vmax.f32 %v1067_v60, %v1265_v2  ;;  %11598 = vst [vmem:[#allocation20_spill] sm:$0xff] %v9304_v9  ;;  %v1080_v16 = vadd.f32 %v7788_v5, %v9221_v44 }
 0x121   : > { %v1071_v8 = vpop.f32.mrf.mxu0 }
 0x122   : > { %11597 = vst [vmem:[#allocation19_spill] sm:$0xff] %v9302_v7  ;;  %v9306_v10 = vmax.f32 %v1059_v3, %v1263_v6  ;;  %v1072_v11 = vadd.f32 %v9221_v44, %v1071_v8  ;;  %v1383_v21 = vpack.c.bf16 %v9302_v7, %v9309_v13  ;;  %v1268_v26 = vmul.f32 0.01, %v1080_v16 }
 0x123   : > { %v7789_v18 = vpop.f32.mrf.mxu0 }
 0x124   : > { %11599 = vst [vmem:[#allocation21_spill] sm:$0xff] %v9306_v10  ;;  %v1382_v19 = vpack.c.bf16 %v9306_v10, %v9304_v9  ;;  %v1083_v20 = vadd.f32 %v7789_v18, %v9221_v44  ;;  %v1266_v23 = vmul.f32 0.01, %v1072_v11  ;;  %v9327_v38 = vmax.f32 %v1080_v16, %v1268_v26 }
 0x125   : > { %v1074_v22 = vpop.f32.mrf.mxu0 }
 0x126   : > { %v1269_v24 = vmul.f32 0.01, %v1083_v20  ;;  %v1075_v25 = vadd.f32 %v9221_v44, %v1074_v22  ;;  %7850 = vmatprep.mubr.msk.bf16.mxu1 %vm1429_vm0, %v1382_v19  ;;  %v9322_v34 = vmax.f32 %v1072_v11, %v1266_v23  ;;  %11604 = vst [vmem:[#allocation26_spill] sm:$0xff] %v9327_v38 }
 0x127   : > { %v7792_v27 = vpop.f32.mrf.mxu0  ;;  %7851 = vmatmul.mubr.msk.bf16.gmra.mxu1 %vm1429_vm0, %v1383_v21 }
 0x128   : > { %v1267_v28 = vmul.f32 0.01, %v1075_v25  ;;  %v9320_v29 = vmax.f32 %v1083_v20, %v1269_v24  ;;  %11602 = vst [vmem:[#allocation24_spill] sm:$0xff] %v9322_v34  ;;  %v1096_v39 = vadd.f32 %v7792_v27, %v9221_v44 }
 0x129   : > { %v1087_v31 = vpop.f32.mrf.mxu0 }
 0x12a   : > { %11601 = vst [vmem:[#allocation23_spill] sm:$0xff] %v9320_v29  ;;  %v9324_v36 = vmax.f32 %v1075_v25, %v1267_v28  ;;  %v1088_v37 = vadd.f32 %v9221_v44, %v1087_v31  ;;  %v1385_v43 = vpack.c.bf16 %v9320_v29, %v9327_v38  ;;  %v1272_v50 = vmul.f32 0.01, %v1096_v39 }
 0x12b   : > { %v7793_v40 = vpop.f32.mrf.mxu0 }
 0x12c   : > { %11603 = vst [vmem:[#allocation25_spill] sm:$0xff] %v9324_v36  ;;  %v1384_v41 = vpack.c.bf16 %v9324_v36, %v9322_v34  ;;  %v1099_v42 = vadd.f32 %v7793_v40, %v9221_v44  ;;  %v1270_v46 = vmul.f32 0.01, %v1088_v37  ;;  %v9345_v1 = vmax.f32 %v1096_v39, %v1272_v50 }
 0x12d   : > { %v1090_v45 = vpop.f32.mrf.mxu0 }
 0x12e   : > { %v1273_v47 = vmul.f32 0.01, %v1099_v42  ;;  %v1091_v48 = vadd.f32 %v9221_v44, %v1090_v45  ;;  %7854 = vmatprep.mubr.msk.bf16.mxu1 %vm1429_vm0, %v1384_v41  ;;  %v9340_v60 = vmax.f32 %v1088_v37, %v1270_v46  ;;  %11608 = vst [vmem:[#allocation30_spill] sm:$0xff] %v9345_v1 }
 0x12f   : > { %v7796_v53 = vpop.f32.mrf.mxu0  ;;  %7855 = vmatmul.mubr.msk.bf16.gmra.mxu1 %vm1429_vm0, %v1385_v43 }
 0x130   : > { %v1271_v55 = vmul.f32 0.01, %v1091_v48  ;;  %v9338_v56 = vmax.f32 %v1099_v42, %v1273_v47  ;;  %11606 = vst [vmem:[#allocation28_spill] sm:$0xff] %v9340_v60  ;;  %v1112_v2 = vadd.f32 %v7796_v53, %v9221_v44 }
 0x131   : > { %v1103_v58 = vpop.f32.mrf.mxu0 }
 0x132   : > { %11605 = vst [vmem:[#allocation27_spill] sm:$0xff] %v9338_v56  ;;  %v9342_v63 = vmax.f32 %v1091_v48, %v1271_v55  ;;  %v1104_v0 = vadd.f32 %v9221_v44, %v1103_v58  ;;  %v1387_v6 = vpack.c.bf16 %v9338_v56, %v9345_v1  ;;  %v1276_v19 = vmul.f32 0.01, %v1112_v2 }
 0x133   : > { %v7797_v3 = vpop.f32.mrf.mxu0 }
 0x134   : > { %11607 = vst [vmem:[#allocation29_spill] sm:$0xff] %v9342_v63  ;;  %v1386_v4 = vpack.c.bf16 %v9342_v63, %v9340_v60  ;;  %v1115_v5 = vadd.f32 %v7797_v3, %v9221_v44  ;;  %v1274_v11 = vmul.f32 0.01, %v1104_v0  ;;  %v9363_v27 = vmax.f32 %v1112_v2, %v1276_v19 }
 0x135   : > { %v1106_v8 = vpop.f32.mrf.mxu0 }
 0x136   : > { %v1277_v16 = vmul.f32 0.01, %v1115_v5  ;;  %v1107_v18 = vadd.f32 %v9221_v44, %v1106_v8  ;;  %7858 = vmatprep.mubr.msk.bf16.mxu1 %vm1429_vm0, %v1386_v4  ;;  %v9358_v24 = vmax.f32 %v1104_v0, %v1274_v11  ;;  %11612 = vst [vmem:[#allocation34_spill] sm:$0xff] %v9363_v27 }
 0x137   : > { %v7800_v20 = vpop.f32.mrf.mxu0  ;;  %7859 = vmatmul.mubr.msk.bf16.gmra.mxu1 %vm1429_vm0, %v1387_v6 }
 0x138   : > { %v1275_v21 = vmul.f32 0.01, %v1107_v18  ;;  %v9356_v22 = vmax.f32 %v1115_v5, %v1277_v16  ;;  %11610 = vst [vmem:[#allocation32_spill] sm:$0xff] %v9358_v24  ;;  %v1128_v28 = vadd.f32 %v7800_v20, %v9221_v44 }
 0x139   : > { %v1119_v23 = vpop.f32.mrf.mxu0 }
 0x13a   : > { %11609 = vst [vmem:[#allocation31_spill] sm:$0xff] %v9356_v22  ;;  %v9360_v25 = vmax.f32 %v1107_v18, %v1275_v21  ;;  %v1120_v26 = vadd.f32 %v9221_v44, %v1119_v23  ;;  %v1389_v40 = vpack.c.bf16 %v9356_v22, %v9363_v27  ;;  %v1280_v46 = vmul.f32 0.01, %v1128_v28 }
 0x13b   : > { %v7801_v31 = vpop.f32.mrf.mxu0 }
 0x13c   : > { %11611 = vst [vmem:[#allocation33_spill] sm:$0xff] %v9360_v25  ;;  %v1388_v37 = vpack.c.bf16 %v9360_v25, %v9358_v24  ;;  %v1131_v39 = vadd.f32 %v7801_v31, %v9221_v44  ;;  %v1278_v42 = vmul.f32 0.01, %v1120_v26  ;;  %v9381_v2 = vmax.f32 %v1128_v28, %v1280_v46 }
 0x13d   : > { %v1122_v41 = vpop.f32.mrf.mxu0 }
 0x13e   : > { %v1281_v43 = vmul.f32 0.01, %v1131_v39  ;;  %v1123_v45 = vadd.f32 %v9221_v44, %v1122_v41  ;;  %7862 = vmatprep.mubr.msk.bf16.mxu1 %vm1429_vm0, %v1388_v37  ;;  %v9376_v55 = vmax.f32 %v1120_v26, %v1278_v42  ;;  %11616 = vst [vmem:[#allocation38_spill] sm:$0xff] %v9381_v2 }
 0x13f   : > { %v7804_v47 = vpop.f32.mrf.mxu0  ;;  %7863 = vmatmul.mubr.msk.bf16.gmra.mxu1 %vm1429_vm0, %v1389_v40 }
 0x140   : > { %v1279_v48 = vmul.f32 0.01, %v1123_v45  ;;  %v9374_v50 = vmax.f32 %v1131_v39, %v1281_v43  ;;  %11614 = vst [vmem:[#allocation36_spill] sm:$0xff] %v9376_v55  ;;  %v1144_v3 = vadd.f32 %v7804_v47, %v9221_v44 }
 0x141   : > { %v1135_v53 = vpop.f32.mrf.mxu0 }
 0x142   : > { %11613 = vst [vmem:[#allocation35_spill] sm:$0xff] %v9374_v50  ;;  %v9378_v58 = vmax.f32 %v1123_v45, %v1279_v48  ;;  %v1136_v0 = vadd.f32 %v9221_v44, %v1135_v53  ;;  %v1391_v8 = vpack.c.bf16 %v9374_v50, %v9381_v2  ;;  %v1284_v20 = vmul.f32 0.01, %v1144_v3 }
 0x143   : > { %v7805_v4 = vpop.f32.mrf.mxu0 }
 0x144   : > { %11615 = vst [vmem:[#allocation37_spill] sm:$0xff] %v9378_v58  ;;  %v1390_v5 = vpack.c.bf16 %v9378_v58, %v9376_v55  ;;  %v1147_v6 = vadd.f32 %v7805_v4, %v9221_v44  ;;  %v1282_v16 = vmul.f32 0.01, %v1136_v0  ;;  %v9399_v40 = vmax.f32 %v1144_v3, %v1284_v20 }
 0x145   : > { %v1138_v11 = vpop.f32.mrf.mxu0 }
 0x146   : > { %v1285_v18 = vmul.f32 0.01, %v1147_v6  ;;  %v1139_v19 = vadd.f32 %v9221_v44, %v1138_v11  ;;  %7866 = vmatprep.mubr.msk.bf16.mxu1 %vm1429_vm0, %v1390_v5  ;;  %v9394_v31 = vmax.f32 %v1136_v0, %v1282_v16  ;;  %11620 = vst [vmem:[#allocation42_spill] sm:$0xff] %v9399_v40 }
 0x147   : > { %v7808_v21 = vpop.f32.mrf.mxu0  ;;  %7867 = vmatmul.mubr.msk.bf16.gmra.mxu1 %vm1429_vm0, %v1391_v8 }
 0x148   : > { %v1283_v23 = vmul.f32 0.01, %v1139_v19  ;;  %v9392_v26 = vmax.f32 %v1147_v6, %v1285_v18  ;;  %11618 = vst [vmem:[#allocation40_spill] sm:$0xff] %v9394_v31  ;;  %v1160_v41 = vadd.f32 %v7808_v21, %v9221_v44 }
 0x149   : > { %v1151_v28 = vpop.f32.mrf.mxu0 }
 0x14a   : > { %11617 = vst [vmem:[#allocation39_spill] sm:$0xff] %v9392_v26  ;;  %v9396_v37 = vmax.f32 %v1139_v19, %v1283_v23  ;;  %v1152_v39 = vadd.f32 %v9221_v44, %v1151_v28  ;;  %v1393_v46 = vpack.c.bf16 %v9392_v26, %v9399_v40  ;;  %v1288_v3 = vmul.f32 0.01, %v1160_v41 }
 0x14b   : > { %v7809_v42 = vpop.f32.mrf.mxu0 }
 0x14c   : > { %11619 = vst [vmem:[#allocation41_spill] sm:$0xff] %v9396_v37  ;;  %v1392_v43 = vpack.c.bf16 %v9396_v37, %v9394_v31  ;;  %v1163_v45 = vadd.f32 %v7809_v42, %v9221_v44  ;;  %v1286_v48 = vmul.f32 0.01, %v1152_v39  ;;  %v9417_v19 = vmax.f32 %v1160_v41, %v1288_v3 }
 0x14d   : > { %v1154_v47 = vpop.f32.mrf.mxu0 }
 0x14e   : > { %v1289_v53 = vmul.f32 0.01, %v1163_v45  ;;  %v1155_v0 = vadd.f32 %v9221_v44, %v1154_v47  ;;  %7870 = vmatprep.mubr.msk.bf16.mxu1 %vm1429_vm0, %v1392_v43  ;;  %v9412_v11 = vmax.f32 %v1152_v39, %v1286_v48  ;;  %11624 = vst [vmem:[#allocation46_spill] sm:$0xff] %v9417_v19 }
 0x14f   : > { %v7812_v4 = vpop.f32.mrf.mxu0  ;;  %7871 = vmatmul.mubr.msk.bf16.gmra.mxu1 %vm1429_vm0, %v1393_v46 }
 0x150   : > { %v1287_v5 = vmul.f32 0.01, %v1155_v0  ;;  %v9410_v6 = vmax.f32 %v1163_v45, %v1289_v53  ;;  %11622 = vst [vmem:[#allocation44_spill] sm:$0xff] %v9412_v11  ;;  %v1176_v20 = vadd.f32 %v7812_v4, %v9221_v44 }
 0x151   : > { %v1167_v8 = vpop.f32.mrf.mxu0 }
 0x152   : > { %11621 = vst [vmem:[#allocation43_spill] sm:$0xff] %v9410_v6  ;;  %v9414_v16 = vmax.f32 %v1155_v0, %v1287_v5  ;;  %v1168_v18 = vadd.f32 %v9221_v44, %v1167_v8  ;;  %v1395_v42 = vpack.c.bf16 %v9410_v6, %v9417_v19  ;;  %v1292_v41 = vmul.f32 0.01, %v1176_v20 }
 0x153   : > { %v7813_v21 = vpop.f32.mrf.mxu0 }
 0x154   : > { %11623 = vst [vmem:[#allocation45_spill] sm:$0xff] %v9414_v16  ;;  %v1394_v23 = vpack.c.bf16 %v9414_v16, %v9412_v11  ;;  %v1179_v28 = vadd.f32 %v7813_v21, %v9221_v44  ;;  %v1290_v39 = vmul.f32 0.01, %v1168_v18  ;;  %v9435_v8 = vmax.f32 %v1176_v20, %v1292_v41 }
 0x155   : > { %v1170_v43 = vpop.f32.mrf.mxu0 }
 0x156   : > { %v1293_v45 = vmul.f32 0.01, %v1179_v28  ;;  %v1171_v46 = vadd.f32 %v9221_v44, %v1170_v43  ;;  %7874 = vmatprep.mubr.msk.bf16.mxu1 %vm1429_vm0, %v1394_v23  ;;  %v9430_v3 = vmax.f32 %v1168_v18, %v1290_v39  ;;  %11628 = vst [vmem:[#allocation50_spill] sm:$0xff] %v9435_v8 }
 0x157   : > { %v7816_v47 = vpop.f32.mrf.mxu0  ;;  %7875 = vmatmul.mubr.msk.bf16.gmra.mxu1 %vm1429_vm0, %v1395_v42 }
 0x158   : > { %v1291_v48 = vmul.f32 0.01, %v1171_v46  ;;  %v9428_v53 = vmax.f32 %v1179_v28, %v1293_v45  ;;  %11626 = vst [vmem:[#allocation48_spill] sm:$0xff] %v9430_v3  ;;  %v1192_v21 = vadd.f32 %v7816_v47, %v9221_v44 }
 0x159   : > { %v1183_v0 = vpop.f32.mrf.mxu0 }
 0x15a   : > { %11625 = vst [vmem:[#allocation47_spill] sm:$0xff] %v9428_v53  ;;  %v9432_v4 = vmax.f32 %v1171_v46, %v1291_v48  ;;  %v1184_v5 = vadd.f32 %v9221_v44, %v1183_v0  ;;  %v1397_v28 = vpack.c.bf16 %v9428_v53, %v9435_v8  ;;  %v1296_v20 = vmul.f32 0.01, %v1192_v21 }
 0x15b   : > { %v7817_v43 = vpop.f32.mrf.mxu0 }
 0x15c   : > { %11627 = vst [vmem:[#allocation49_spill] sm:$0xff] %v9432_v4  ;;  %v1396_v23 = vpack.c.bf16 %v9432_v4, %v9430_v3  ;;  %v1195_v42 = vadd.f32 %v7817_v43, %v9221_v44  ;;  %v1294_v18 = vmul.f32 0.01, %v1184_v5  ;;  %v9453_v8 = vmax.f32 %v1192_v21, %v1296_v20 }
 0x15d   : > { %v1186_v45 = vpop.f32.mrf.mxu0 }
 0x15e   : > { %v1297_v39 = vmul.f32 0.01, %v1195_v42  ;;  %v1187_v46 = vadd.f32 %v9221_v44, %v1186_v45  ;;  %7878 = vmatprep.mubr.msk.bf16.mxu1 %vm1429_vm0, %v1396_v23  ;;  %v9448_v4 = vmax.f32 %v1184_v5, %v1294_v18  ;;  %11632 = vst [vmem:[#allocation54_spill] sm:$0xff] %v9453_v8 }
 0x15f   : > { %v7820_v41 = vpop.f32.mrf.mxu0  ;;  %7879 = vmatmul.mubr.msk.bf16.gmra.mxu1 %vm1429_vm0, %v1397_v28 }
 0x160   : > { %v1295_v47 = vmul.f32 0.01, %v1187_v46  ;;  %v9446_v48 = vmax.f32 %v1195_v42, %v1297_v39  ;;  %11630 = vst [vmem:[#allocation52_spill] sm:$0xff] %v9448_v4  ;;  %v1208_v45 = vadd.f32 %v7820_v41, %v9221_v44 }
 0x161   : > { %v1199_v0 = vpop.f32.mrf.mxu0 }
 0x162   : > { %11629 = vst [vmem:[#allocation51_spill] sm:$0xff] %v9446_v48  ;;  %v9450_v43 = vmax.f32 %v1187_v46, %v1295_v47  ;;  %v1200_v53 = vadd.f32 %v9221_v44, %v1199_v0  ;;  %v1399_v42 = vpack.c.bf16 %v9446_v48, %v9453_v8  ;;  %v1300_v21 = vmul.f32 0.01, %v1208_v45 }
 0x163   : > { %v7821_v3 = vpop.f32.mrf.mxu0 }
 0x164   : > { %11631 = vst [vmem:[#allocation53_spill] sm:$0xff] %v9450_v43  ;;  %v1398_v23 = vpack.c.bf16 %v9450_v43, %v9448_v4  ;;  %v1211_v28 = vadd.f32 %v7821_v3, %v9221_v44  ;;  %v1298_v5 = vmul.f32 0.01, %v1200_v53  ;;  %v9471_v8 = vmax.f32 %v1208_v45, %v1300_v21 }
 0x165   : > { %v1202_v39 = vpop.f32.mrf.mxu0 }
 0x166   : > { %v1301_v18 = vmul.f32 0.01, %v1211_v28  ;;  %v1203_v46 = vadd.f32 %v9221_v44, %v1202_v39  ;;  %7882 = vmatprep.mubr.msk.bf16.mxu1 %vm1429_vm0, %v1398_v23  ;;  %v9466_v43 = vmax.f32 %v1200_v53, %v1298_v5  ;;  %11636 = vst [vmem:[#allocation58_spill] sm:$0xff] %v9471_v8 }
 0x167   : > { %v7824_v20 = vpop.f32.mrf.mxu0  ;;  %7883 = vmatmul.mubr.msk.bf16.gmra.mxu1 %vm1429_vm0, %v1399_v42 }
 0x168   : > { %v1299_v41 = vmul.f32 0.01, %v1203_v46  ;;  %v9464_v47 = vmax.f32 %v1211_v28, %v1301_v18  ;;  %11634 = vst [vmem:[#allocation56_spill] sm:$0xff] %v9466_v43  ;;  %v1224_v39 = vadd.f32 %v7824_v20, %v9221_v44 }
 0x169   : > { %v1215_v0 = vpop.f32.mrf.mxu0 }
 0x16a   : > { %11633 = vst [vmem:[#allocation55_spill] sm:$0xff] %v9464_v47  ;;  %v9468_v3 = vmax.f32 %v1203_v46, %v1299_v41  ;;  %v1216_v48 = vadd.f32 %v9221_v44, %v1215_v0  ;;  %v1401_v28 = vpack.c.bf16 %v9464_v47, %v9471_v8  ;;  %v1304_v45 = vmul.f32 0.01, %v1224_v39 }
 0x16b   : > { %v7825_v4 = vpop.f32.mrf.mxu0 }
 0x16c   : > { %11635 = vst [vmem:[#allocation57_spill] sm:$0xff] %v9468_v3  ;;  %v1400_v23 = vpack.c.bf16 %v9468_v3, %v9466_v43  ;;  %v1227_v42 = vadd.f32 %v7825_v4, %v9221_v44  ;;  %v1302_v53 = vmul.f32 0.01, %v1216_v48  ;;  %v9489_v8 = vmax.f32 %v1224_v39, %v1304_v45 }
 0x16d   : > { %v1218_v18 = vpop.f32.mrf.mxu0 }
 0x16e   : > { %v1305_v5 = vmul.f32 0.01, %v1227_v42  ;;  %v1219_v46 = vadd.f32 %v9221_v44, %v1218_v18  ;;  %7886 = vmatprep.mubr.msk.bf16.mxu1 %vm1429_vm0, %v1400_v23  ;;  %v9484_v3 = vmax.f32 %v1216_v48, %v1302_v53  ;;  %11640 = vst [vmem:[#allocation62_spill] sm:$0xff] %v9489_v8 }
 0x16f   : > { %v7828_v21 = vpop.f32.mrf.mxu0  ;;  %7887 = vmatmul.mubr.msk.bf16.gmra.mxu1 %vm1429_vm0, %v1401_v28 }
 0x170   : > { %v1303_v20 = vmul.f32 0.01, %v1219_v46  ;;  %v9482_v41 = vmax.f32 %v1227_v42, %v1305_v5  ;;  %11638 = vst [vmem:[#allocation60_spill] sm:$0xff] %v9484_v3  ;;  %v1240_v18 = vadd.f32 %v7828_v21, %v9221_v44 }
 0x171   : > { %v1231_v0 = vpop.f32.mrf.mxu0 }
 0x172   : > { %11637 = vst [vmem:[#allocation59_spill] sm:$0xff] %v9482_v41  ;;  %v9486_v4 = vmax.f32 %v1219_v46, %v1303_v20  ;;  %v1232_v47 = vadd.f32 %v9221_v44, %v1231_v0  ;;  %v1403_v42 = vpack.c.bf16 %v9482_v41, %v9489_v8  ;;  %v1308_v39 = vmul.f32 0.01, %v1240_v18 }
 0x173   : > { %v7829_v43 = vpop.f32.mrf.mxu0 }
 0x174   : > { %11639 = vst [vmem:[#allocation61_spill] sm:$0xff] %v9486_v4  ;;  %v1402_v23 = vpack.c.bf16 %v9486_v4, %v9484_v3  ;;  %v1243_v28 = vadd.f32 %v7829_v43, %v9221_v44  ;;  %v1306_v48 = vmul.f32 0.01, %v1232_v47  ;;  %v9506_v43 = vmax.f32 %v1240_v18, %v1308_v39  ;;  %v9520_v18 = vld [vmem:[%s11476_s5] ss:$0 sm:$0xff] }
 0x175   : > { %v1234_v5 = vpop.f32.mrf.mxu0 }
 0x176   : > { %v1309_v53 = vmul.f32 0.01, %v1243_v28  ;;  %v1235_v46 = vadd.f32 %v9221_v44, %v1234_v5  ;;  %7890 = vmatprep.mubr.msk.bf16.mxu1 %vm1429_vm0, %v1402_v23  ;;  %v9502_v20 = vmax.f32 %v1232_v47, %v1306_v48  ;;  %11644 = vst [vmem:[#allocation66_spill] sm:$0xff] %v9506_v43  ;;  %v8505_v23 = vld [vmem:[%s11479_s8] sm:$0xff]  }
 0x177   : > { %7891 = vmatmul.mubr.msk.bf16.gmra.mxu1 %vm1429_vm0, %v1403_v42  ;;  %7966 = vmatprep.subr.bf16.mxu0 %v8505_v23 }
 0x178   : > { %v1307_v45 = vmul.f32 0.01, %v1235_v46  ;;  %v9500_v21 = vmax.f32 %v1243_v28, %v1309_v53  ;;  %11642 = vst [vmem:[#allocation64_spill] sm:$0xff] %v9502_v20  ;;  %7967 = vmatpush3.bf16.msra.mxu0 %v8505_v23 }
 0x17a   : > { %11641 = vst [vmem:[#allocation63_spill] sm:$0xff] %v9500_v21  ;;  %v9504_v0 = vmax.f32 %v1235_v46, %v1307_v45  ;;  %v1405_v44 = vpack.c.bf16 %v9500_v21, %v9506_v43 }
 0x17c   : > { %11643 = vst [vmem:[#allocation65_spill] sm:$0xff] %v9504_v0  ;;  %v1404_v41 = vpack.c.bf16 %v9504_v0, %v9502_v20 }
 0x17e   : > { %7894 = vmatprep.mubr.msk.bf16.mxu1 %vm1429_vm0, %v1404_v41 }
 0x17f   : > { %7895 = vmatmul.mubr.msk.bf16.gmra.mxu1 %vm1429_vm0, %v1405_v44 }
 0x1c7   : > { %v7836_v47 = vpop.f32.mrf.mxu1 }
 0x1c8   : > { %v1569_v5 = vadd.f32 %v7836_v47, %v9520_v18 }
 0x1c9   : > { %v1560_v28 = vpop.f32.mrf.mxu1 }
 0x1ca   : > { %v1561_v42 = vadd.f32 %v9520_v18, %v1560_v28  ;;  %v1817_v44 = vmul.f32 0.01, %v1569_v5 }
 0x1cb   : > { %v7837_v41 = vpop.f32.mrf.mxu1 }
 0x1cc   : > { %v1572_v48 = vadd.f32 %v7837_v41, %v9520_v18  ;;  %v1815_v46 = vmul.f32 0.01, %v1561_v42  ;;  %v1881_v28 = vmax.f32 %v1569_v5, %v1817_v44 }
 0x1cd   : > { %v1563_v53 = vpop.f32.mrf.mxu1 }
 0x1ce   : > { %v1818_v39 = vmul.f32 0.01, %v1572_v48  ;;  %v1564_v45 = vadd.f32 %v9520_v18, %v1563_v53  ;;  %v1879_v20 = vmax.f32 %v1561_v42, %v1815_v46 }
 0x1cf   : > { %v7840_v23 = vpop.f32.mrf.mxu1 }
 0x1d0   : > { %v1816_v21 = vmul.f32 0.01, %v1564_v45  ;;  %v1882_v43 = vmax.f32 %v1572_v48, %v1818_v39  ;;  %v1585_v47 = vadd.f32 %v7840_v23, %v9520_v18 }
 0x1d1   : > { %v1576_v0 = vpop.f32.mrf.mxu1 }
 0x1d2   : > { %v1880_v8 = vmax.f32 %v1564_v45, %v1816_v21  ;;  %v1577_v4 = vadd.f32 %v9520_v18, %v1576_v0  ;;  %v1944_v19 = vpack.c.bf16 %v1882_v43, %v1881_v28  ;;  %v1821_v48 = vmul.f32 0.01, %v1585_v47 }
 0x1d3   : > { %v7841_v3 = vpop.f32.mrf.mxu1 }
 0x1d4   : > { %v1943_v6 = vpack.c.bf16 %v1880_v8, %v1879_v20  ;;  %v1588_v41 = vadd.f32 %v7841_v3, %v9520_v18  ;;  %v1819_v11 = vmul.f32 0.01, %v1577_v4  ;;  %v1885_v3 = vmax.f32 %v1585_v47, %v1821_v48 }
 0x1d5   : > { %v1579_v16 = vpop.f32.mrf.mxu1 }
 0x1d6   : > { %v1822_v53 = vmul.f32 0.01, %v1588_v41  ;;  %v1580_v26 = vadd.f32 %v9520_v18, %v1579_v16  ;;  %7902 = vmatprep.mubr.msk.bf16.mxu1 %vm1429_vm0, %v1943_v6  ;;  %v1883_v46 = vmax.f32 %v1577_v4, %v1819_v11 }
 0x1d7   : > { %v7844_v42 = vpop.f32.mrf.mxu1  ;;  %7903 = vmatmul.mubr.msk.bf16.vlgmr.msra.gmra.mxu1 %vm1429_vm0, %v1944_v19 }
 0x1d8   : > { %v1820_v21 = vmul.f32 0.01, %v1580_v26  ;;  %v1886_v0 = vmax.f32 %v1588_v41, %v1822_v53  ;;  %v1601_v20 = vadd.f32 %v7844_v42, %v9520_v18 }
 0x1d9   : > { %v1592_v5 = vpop.f32.mrf.mxu1 }
 0x1da   : > { %v1884_v39 = vmax.f32 %v1580_v26, %v1820_v21  ;;  %v1593_v8 = vadd.f32 %v9520_v18, %v1592_v5  ;;  %v1946_v44 = vpack.c.bf16 %v1886_v0, %v1885_v3  ;;  %v1825_v41 = vmul.f32 0.01, %v1601_v20 }
 0x1db   : > { %v7845_v43 = vpop.f32.mrf.mxu1 }
 0x1dc   : > { %v1945_v45 = vpack.c.bf16 %v1884_v39, %v1883_v46  ;;  %v1604_v16 = vadd.f32 %v7845_v43, %v9520_v18  ;;  %v1823_v23 = vmul.f32 0.01, %v1593_v8  ;;  %v1889_v21 = vmax.f32 %v1601_v20, %v1825_v41 }
 0x1dd   : > { %v1595_v6 = vpop.f32.mrf.mxu1 }
 0x1de   : > { %v1826_v28 = vmul.f32 0.01, %v1604_v16  ;;  %v1596_v19 = vadd.f32 %v9520_v18, %v1595_v6  ;;  %7906 = vmatprep.mubr.msk.bf16.mxu1 %vm1429_vm0, %v1945_v45  ;;  %v1887_v53 = vmax.f32 %v1593_v8, %v1823_v23 }
 0x1df   : > { %v7848_v11 = vpop.f32.mrf.mxu1  ;;  %7907 = vmatmul.mubr.msk.bf16.gmra.mxu1 %vm1429_vm0, %v1946_v44 }
 0x1e0   : > { %v1824_v26 = vmul.f32 0.01, %v1596_v19  ;;  %v1890_v4 = vmax.f32 %v1604_v16, %v1826_v28  ;;  %v1617_v0 = vadd.f32 %v7848_v11, %v9520_v18 }
 0x1e1   : > { %v1608_v47 = vpop.f32.mrf.mxu1 }
 0x1e2   : > { %v1888_v48 = vmax.f32 %v1596_v19, %v1824_v26  ;;  %v1609_v42 = vadd.f32 %v9520_v18, %v1608_v47  ;;  %v1948_v3 = vpack.c.bf16 %v1890_v4, %v1889_v21  ;;  %v1829_v16 = vmul.f32 0.01, %v1617_v0 }
 0x1e3   : > { %v7849_v5 = vpop.f32.mrf.mxu1 }
 0x1e4   : > { %v1947_v46 = vpack.c.bf16 %v1888_v48, %v1887_v53  ;;  %v1620_v39 = vadd.f32 %v7849_v5, %v9520_v18  ;;  %v1827_v45 = vmul.f32 0.01, %v1609_v42  ;;  %v1893_v26 = vmax.f32 %v1617_v0, %v1829_v16 }
 0x1e5   : > { %v1611_v43 = vpop.f32.mrf.mxu1 }
 0x1e6   : > { %v1830_v6 = vmul.f32 0.01, %v1620_v39  ;;  %v1612_v44 = vadd.f32 %v9520_v18, %v1611_v43  ;;  %7910 = vmatprep.mubr.msk.bf16.mxu1 %vm1429_vm0, %v1947_v46  ;;  %v1891_v19 = vmax.f32 %v1609_v42, %v1827_v45 }
 0x1e7   : > { %v7852_v8 = vpop.f32.mrf.mxu1  ;;  %7911 = vmatmul.mubr.msk.bf16.gmra.mxu1 %vm1429_vm0, %v1948_v3 }
 0x1e8   : > { %v1828_v23 = vmul.f32 0.01, %v1612_v44  ;;  %v1894_v20 = vmax.f32 %v1620_v39, %v1830_v6  ;;  %v1633_v4 = vadd.f32 %v7852_v8, %v9520_v18 }
 0x1e9   : > { %v1624_v28 = vpop.f32.mrf.mxu1 }
 0x1ea   : > { %v1892_v41 = vmax.f32 %v1612_v44, %v1828_v23  ;;  %v1625_v11 = vadd.f32 %v9520_v18, %v1624_v28  ;;  %v1950_v21 = vpack.c.bf16 %v1894_v20, %v1893_v26  ;;  %v1833_v39 = vmul.f32 0.01, %v1633_v4 }
 0x1eb   : > { %v7853_v47 = vpop.f32.mrf.mxu1 }
 0x1ec   : > { %v1949_v53 = vpack.c.bf16 %v1892_v41, %v1891_v19  ;;  %v1636_v48 = vadd.f32 %v7853_v47, %v9520_v18  ;;  %v1831_v46 = vmul.f32 0.01, %v1625_v11  ;;  %v1897_v23 = vmax.f32 %v1633_v4, %v1833_v39 }
 0x1ed   : > { %v1627_v5 = vpop.f32.mrf.mxu1 }
 0x1ee   : > { %v1834_v43 = vmul.f32 0.01, %v1636_v48  ;;  %v1628_v3 = vadd.f32 %v9520_v18, %v1627_v5  ;;  %7914 = vmatprep.mubr.msk.bf16.mxu1 %vm1429_vm0, %v1949_v53  ;;  %v1895_v44 = vmax.f32 %v1625_v11, %v1831_v46 }
 0x1ef   : > { %v7856_v42 = vpop.f32.mrf.mxu1  ;;  %7915 = vmatmul.mubr.msk.bf16.gmra.mxu1 %vm1429_vm0, %v1950_v21 }
 0x1f0   : > { %v1832_v45 = vmul.f32 0.01, %v1628_v3  ;;  %v1898_v0 = vmax.f32 %v1636_v48, %v1834_v43  ;;  %v1649_v20 = vadd.f32 %v7856_v42, %v9520_v18 }
 0x1f1   : > { %v1640_v6 = vpop.f32.mrf.mxu1 }
 0x1f2   : > { %v1896_v16 = vmax.f32 %v1628_v3, %v1832_v45  ;;  %v1641_v8 = vadd.f32 %v9520_v18, %v1640_v6  ;;  %v1952_v26 = vpack.c.bf16 %v1898_v0, %v1897_v23  ;;  %v1837_v48 = vmul.f32 0.01, %v1649_v20 }
 0x1f3   : > { %v7857_v28 = vpop.f32.mrf.mxu1 }
 0x1f4   : > { %v1951_v19 = vpack.c.bf16 %v1896_v16, %v1895_v44  ;;  %v1652_v41 = vadd.f32 %v7857_v28, %v9520_v18  ;;  %v1835_v53 = vmul.f32 0.01, %v1641_v8  ;;  %v1901_v45 = vmax.f32 %v1649_v20, %v1837_v48 }
 0x1f5   : > { %v1643_v47 = vpop.f32.mrf.mxu1 }
 0x1f6   : > { %v1838_v5 = vmul.f32 0.01, %v1652_v41  ;;  %v1644_v21 = vadd.f32 %v9520_v18, %v1643_v47  ;;  %7918 = vmatprep.mubr.msk.bf16.mxu1 %vm1429_vm0, %v1951_v19  ;;  %v1899_v3 = vmax.f32 %v1641_v8, %v1835_v53 }
 0x1f7   : > { %v7860_v11 = vpop.f32.mrf.mxu1  ;;  %7919 = vmatmul.mubr.msk.bf16.gmra.mxu1 %vm1429_vm0, %v1952_v26 }
 0x1f8   : > { %v1836_v46 = vmul.f32 0.01, %v1644_v21  ;;  %v1902_v4 = vmax.f32 %v1652_v41, %v1838_v5  ;;  %v1665_v0 = vadd.f32 %v7860_v11, %v9520_v18 }
 0x1f9   : > { %v1656_v43 = vpop.f32.mrf.mxu1 }
 0x1fa   : > { %v1900_v39 = vmax.f32 %v1644_v21, %v1836_v46  ;;  %v1657_v42 = vadd.f32 %v9520_v18, %v1656_v43  ;;  %v1954_v23 = vpack.c.bf16 %v1902_v4, %v1901_v45  ;;  %v1841_v41 = vmul.f32 0.01, %v1665_v0 }
 0x1fb   : > { %v7861_v6 = vpop.f32.mrf.mxu1 }
 0x1fc   : > { %v1953_v44 = vpack.c.bf16 %v1900_v39, %v1899_v3  ;;  %v1668_v16 = vadd.f32 %v7861_v6, %v9520_v18  ;;  %v1839_v19 = vmul.f32 0.01, %v1657_v42  ;;  %v1905_v46 = vmax.f32 %v1665_v0, %v1841_v41 }
 0x1fd   : > { %v1659_v28 = vpop.f32.mrf.mxu1 }
 0x1fe   : > { %v1842_v47 = vmul.f32 0.01, %v1668_v16  ;;  %v1660_v26 = vadd.f32 %v9520_v18, %v1659_v28  ;;  %7922 = vmatprep.mubr.msk.bf16.mxu1 %vm1429_vm0, %v1953_v44  ;;  %v1903_v21 = vmax.f32 %v1657_v42, %v1839_v19 }
 0x1ff   : > { %v7864_v8 = vpop.f32.mrf.mxu1  ;;  %7923 = vmatmul.mubr.msk.bf16.gmra.mxu1 %vm1429_vm0, %v1954_v23 }
 0x200   : > { %v1840_v53 = vmul.f32 0.01, %v1660_v26  ;;  %v1906_v20 = vmax.f32 %v1668_v16, %v1842_v47  ;;  %v1681_v4 = vadd.f32 %v7864_v8, %v9520_v18 }
 0x201   : > { %v1672_v5 = vpop.f32.mrf.mxu1 }
 0x202   : > { %v1904_v48 = vmax.f32 %v1660_v26, %v1840_v53  ;;  %v1673_v11 = vadd.f32 %v9520_v18, %v1672_v5  ;;  %v1956_v45 = vpack.c.bf16 %v1906_v20, %v1905_v46  ;;  %v1845_v16 = vmul.f32 0.01, %v1681_v4 }
 0x203   : > { %v7865_v43 = vpop.f32.mrf.mxu1 }
 0x204   : > { %v1955_v3 = vpack.c.bf16 %v1904_v48, %v1903_v21  ;;  %v1684_v39 = vadd.f32 %v7865_v43, %v9520_v18  ;;  %v1843_v44 = vmul.f32 0.01, %v1673_v11  ;;  %v1909_v53 = vmax.f32 %v1681_v4, %v1845_v16 }
 0x205   : > { %v1675_v6 = vpop.f32.mrf.mxu1 }
 0x206   : > { %v1846_v28 = vmul.f32 0.01, %v1684_v39  ;;  %v1676_v23 = vadd.f32 %v9520_v18, %v1675_v6  ;;  %7926 = vmatprep.mubr.msk.bf16.mxu1 %vm1429_vm0, %v1955_v3  ;;  %v1907_v26 = vmax.f32 %v1673_v11, %v1843_v44 }
 0x207   : > { %v7868_v42 = vpop.f32.mrf.mxu1  ;;  %7927 = vmatmul.mubr.msk.bf16.gmra.mxu1 %vm1429_vm0, %v1956_v45 }
 0x208   : > { %v1844_v19 = vmul.f32 0.01, %v1676_v23  ;;  %v1910_v0 = vmax.f32 %v1684_v39, %v1846_v28  ;;  %v1697_v20 = vadd.f32 %v7868_v42, %v9520_v18 }
 0x209   : > { %v1688_v47 = vpop.f32.mrf.mxu1 }
 0x20a   : > { %v1908_v41 = vmax.f32 %v1676_v23, %v1844_v19  ;;  %v1689_v8 = vadd.f32 %v9520_v18, %v1688_v47  ;;  %v1958_v46 = vpack.c.bf16 %v1910_v0, %v1909_v53  ;;  %v1849_v39 = vmul.f32 0.01, %v1697_v20 }
 0x20b   : > { %v7869_v5 = vpop.f32.mrf.mxu1 }
 0x20c   : > { %v1957_v21 = vpack.c.bf16 %v1908_v41, %v1907_v26  ;;  %v1700_v48 = vadd.f32 %v7869_v5, %v9520_v18  ;;  %v1847_v3 = vmul.f32 0.01, %v1689_v8  ;;  %v1913_v19 = vmax.f32 %v1697_v20, %v1849_v39 }
 0x20d   : > { %v1691_v43 = vpop.f32.mrf.mxu1 }
 0x20e   : > { %v1850_v6 = vmul.f32 0.01, %v1700_v48  ;;  %v1692_v45 = vadd.f32 %v9520_v18, %v1691_v43  ;;  %7930 = vmatprep.mubr.msk.bf16.mxu1 %vm1429_vm0, %v1957_v21  ;;  %v1911_v23 = vmax.f32 %v1689_v8, %v1847_v3 }
 0x20f   : > { %v7872_v11 = vpop.f32.mrf.mxu1  ;;  %7931 = vmatmul.mubr.msk.bf16.gmra.mxu1 %vm1429_vm0, %v1958_v46 }
 0x210   : > { %v1848_v44 = vmul.f32 0.01, %v1692_v45  ;;  %v1914_v4 = vmax.f32 %v1700_v48, %v1850_v6  ;;  %v1713_v0 = vadd.f32 %v7872_v11, %v9520_v18 }
 0x211   : > { %v1704_v28 = vpop.f32.mrf.mxu1 }
 0x212   : > { %v1912_v16 = vmax.f32 %v1692_v45, %v1848_v44  ;;  %v1705_v42 = vadd.f32 %v9520_v18, %v1704_v28  ;;  %v1960_v53 = vpack.c.bf16 %v1914_v4, %v1913_v19  ;;  %v1853_v48 = vmul.f32 0.01, %v1713_v0 }
 0x213   : > { %v7873_v47 = vpop.f32.mrf.mxu1 }
 0x214   : > { %v1959_v26 = vpack.c.bf16 %v1912_v16, %v1911_v23  ;;  %v1716_v41 = vadd.f32 %v7873_v47, %v9520_v18  ;;  %v1851_v21 = vmul.f32 0.01, %v1705_v42  ;;  %v1917_v44 = vmax.f32 %v1713_v0, %v1853_v48 }
 0x215   : > { %v1707_v5 = vpop.f32.mrf.mxu1 }
 0x216   : > { %v1854_v43 = vmul.f32 0.01, %v1716_v41  ;;  %v1708_v46 = vadd.f32 %v9520_v18, %v1707_v5  ;;  %7934 = vmatprep.mubr.msk.bf16.mxu1 %vm1429_vm0, %v1959_v26  ;;  %v1915_v45 = vmax.f32 %v1705_v42, %v1851_v21 }
 0x217   : > { %v7876_v8 = vpop.f32.mrf.mxu1  ;;  %7935 = vmatmul.mubr.msk.bf16.gmra.mxu1 %vm1429_vm0, %v1960_v53 }
 0x218   : > { %v1852_v3 = vmul.f32 0.01, %v1708_v46  ;;  %v1918_v20 = vmax.f32 %v1716_v41, %v1854_v43  ;;  %v1729_v4 = vadd.f32 %v7876_v8, %v9520_v18 }
 0x219   : > { %v1720_v6 = vpop.f32.mrf.mxu1 }
 0x21a   : > { %v1916_v39 = vmax.f32 %v1708_v46, %v1852_v3  ;;  %v1721_v11 = vadd.f32 %v9520_v18, %v1720_v6  ;;  %v1962_v19 = vpack.c.bf16 %v1918_v20, %v1917_v44  ;;  %v1857_v41 = vmul.f32 0.01, %v1729_v4 }
 0x21b   : > { %v7877_v28 = vpop.f32.mrf.mxu1 }
 0x21c   : > { %v1961_v23 = vpack.c.bf16 %v1916_v39, %v1915_v45  ;;  %v1732_v16 = vadd.f32 %v7877_v28, %v9520_v18  ;;  %v1855_v26 = vmul.f32 0.01, %v1721_v11  ;;  %v1921_v3 = vmax.f32 %v1729_v4, %v1857_v41 }
 0x21d   : > { %v1723_v47 = vpop.f32.mrf.mxu1 }
 0x21e   : > { %v1858_v5 = vmul.f32 0.01, %v1732_v16  ;;  %v1724_v53 = vadd.f32 %v9520_v18, %v1723_v47  ;;  %7938 = vmatprep.mubr.msk.bf16.mxu1 %vm1429_vm0, %v1961_v23  ;;  %v1919_v46 = vmax.f32 %v1721_v11, %v1855_v26 }
 0x21f   : > { %v7880_v42 = vpop.f32.mrf.mxu1  ;;  %7939 = vmatmul.mubr.msk.bf16.gmra.mxu1 %vm1429_vm0, %v1962_v19 }
 0x220   : > { %v1856_v21 = vmul.f32 0.01, %v1724_v53  ;;  %v1922_v0 = vmax.f32 %v1732_v16, %v1858_v5  ;;  %v1745_v20 = vadd.f32 %v7880_v42, %v9520_v18 }
 0x221   : > { %v1736_v43 = vpop.f32.mrf.mxu1 }
 0x222   : > { %v1920_v48 = vmax.f32 %v1724_v53, %v1856_v21  ;;  %v1737_v8 = vadd.f32 %v9520_v18, %v1736_v43  ;;  %v1964_v44 = vpack.c.bf16 %v1922_v0, %v1921_v3  ;;  %v1861_v16 = vmul.f32 0.01, %v1745_v20 }
 0x223   : > { %v7881_v6 = vpop.f32.mrf.mxu1 }
 0x224   : > { %v1963_v45 = vpack.c.bf16 %v1920_v48, %v1919_v46  ;;  %v1748_v39 = vadd.f32 %v7881_v6, %v9520_v18  ;;  %v1859_v23 = vmul.f32 0.01, %v1737_v8  ;;  %v1925_v21 = vmax.f32 %v1745_v20, %v1861_v16 }
 0x225   : > { %v1739_v28 = vpop.f32.mrf.mxu1 }
 0x226   : > { %v1862_v47 = vmul.f32 0.01, %v1748_v39  ;;  %v1740_v19 = vadd.f32 %v9520_v18, %v1739_v28  ;;  %7942 = vmatprep.mubr.msk.bf16.mxu1 %vm1429_vm0, %v1963_v45  ;;  %v1923_v53 = vmax.f32 %v1737_v8, %v1859_v23 }
 0x227   : > { %v7884_v11 = vpop.f32.mrf.mxu1  ;;  %7943 = vmatmul.mubr.msk.bf16.gmra.mxu1 %vm1429_vm0, %v1964_v44 }
 0x228   : > { %v1860_v26 = vmul.f32 0.01, %v1740_v19  ;;  %v1926_v4 = vmax.f32 %v1748_v39, %v1862_v47  ;;  %v1761_v0 = vadd.f32 %v7884_v11, %v9520_v18 }
 0x229   : > { %v1752_v5 = vpop.f32.mrf.mxu1 }
 0x22a   : > { %v1924_v41 = vmax.f32 %v1740_v19, %v1860_v26  ;;  %v1753_v42 = vadd.f32 %v9520_v18, %v1752_v5  ;;  %v1966_v3 = vpack.c.bf16 %v1926_v4, %v1925_v21  ;;  %v1865_v39 = vmul.f32 0.01, %v1761_v0 }
 0x22b   : > { %v7885_v43 = vpop.f32.mrf.mxu1 }
 0x22c   : > { %v1965_v46 = vpack.c.bf16 %v1924_v41, %v1923_v53  ;;  %v1764_v48 = vadd.f32 %v7885_v43, %v9520_v18  ;;  %v1863_v45 = vmul.f32 0.01, %v1753_v42  ;;  %v1929_v26 = vmax.f32 %v1761_v0, %v1865_v39 }
 0x22d   : > { %v1755_v6 = vpop.f32.mrf.mxu1 }
 0x22e   : > { %v1866_v28 = vmul.f32 0.01, %v1764_v48  ;;  %v1756_v44 = vadd.f32 %v9520_v18, %v1755_v6  ;;  %7946 = vmatprep.mubr.msk.bf16.mxu1 %vm1429_vm0, %v1965_v46  ;;  %v1927_v19 = vmax.f32 %v1753_v42, %v1863_v45 }
 0x22f   : > { %v7888_v8 = vpop.f32.mrf.mxu1  ;;  %7947 = vmatmul.mubr.msk.bf16.gmra.mxu1 %vm1429_vm0, %v1966_v3 }
 0x230   : > { %v1864_v23 = vmul.f32 0.01, %v1756_v44  ;;  %v1930_v20 = vmax.f32 %v1764_v48, %v1866_v28  ;;  %v1777_v4 = vadd.f32 %v7888_v8, %v9520_v18 }
 0x231   : > { %v1768_v47 = vpop.f32.mrf.mxu1 }
 0x232   : > { %v1928_v16 = vmax.f32 %v1756_v44, %v1864_v23  ;;  %v1769_v11 = vadd.f32 %v9520_v18, %v1768_v47  ;;  %v1968_v21 = vpack.c.bf16 %v1930_v20, %v1929_v26  ;;  %v1869_v48 = vmul.f32 0.01, %v1777_v4 }
 0x233   : > { %v7889_v5 = vpop.f32.mrf.mxu1 }
 0x234   : > { %v1967_v53 = vpack.c.bf16 %v1928_v16, %v1927_v19  ;;  %v1780_v41 = vadd.f32 %v7889_v5, %v9520_v18  ;;  %v1867_v46 = vmul.f32 0.01, %v1769_v11  ;;  %v1933_v23 = vmax.f32 %v1777_v4, %v1869_v48 }
 0x235   : > { %v1771_v43 = vpop.f32.mrf.mxu1 }
 0x236   : > { %v1870_v6 = vmul.f32 0.01, %v1780_v41  ;;  %v1772_v3 = vadd.f32 %v9520_v18, %v1771_v43  ;;  %7950 = vmatprep.mubr.msk.bf16.mxu1 %vm1429_vm0, %v1967_v53  ;;  %v1931_v44 = vmax.f32 %v1769_v11, %v1867_v46 }
 0x237   : > { %v7892_v42 = vpop.f32.mrf.mxu1  ;;  %7951 = vmatmul.mubr.msk.bf16.gmra.mxu1 %vm1429_vm0, %v1968_v21 }
 0x238   : > { %v1868_v45 = vmul.f32 0.01, %v1772_v3  ;;  %v1934_v0 = vmax.f32 %v1780_v41, %v1870_v6  ;;  %v1793_v20 = vadd.f32 %v7892_v42, %v9520_v18 }
 0x239   : > { %v1784_v28 = vpop.f32.mrf.mxu1 }
 0x23a   : > { %v1932_v39 = vmax.f32 %v1772_v3, %v1868_v45  ;;  %v1785_v8 = vadd.f32 %v9520_v18, %v1784_v28  ;;  %v1970_v26 = vpack.c.bf16 %v1934_v0, %v1933_v23  ;;  %v1873_v41 = vmul.f32 0.01, %v1793_v20 }
 0x23b   : > { %v7893_v47 = vpop.f32.mrf.mxu1 }
 0x23c   : > { %v1969_v19 = vpack.c.bf16 %v1932_v39, %v1931_v44  ;;  %v1796_v16 = vadd.f32 %v7893_v47, %v9520_v18  ;;  %v1871_v53 = vmul.f32 0.01, %v1785_v8  ;;  %v1937_v45 = vmax.f32 %v1793_v20, %v1873_v41 }
 0x23d   : > { %v1787_v5 = vpop.f32.mrf.mxu1 }
 0x23e   : > { %v1874_v43 = vmul.f32 0.01, %v1796_v16  ;;  %v1788_v21 = vadd.f32 %v9520_v18, %v1787_v5  ;;  %7954 = vmatprep.mubr.msk.bf16.mxu1 %vm1429_vm0, %v1969_v19  ;;  %v1935_v3 = vmax.f32 %v1785_v8, %v1871_v53 }
 0x23f   : > { %v7896_v11 = vpop.f32.mrf.mxu1  ;;  %7955 = vmatmul.mubr.msk.bf16.gmra.mxu1 %vm1429_vm0, %v1970_v26 }
 0x240   : > { %v1872_v46 = vmul.f32 0.01, %v1788_v21  ;;  %v1938_v4 = vmax.f32 %v1796_v16, %v1874_v43  ;;  %v1809_v0 = vadd.f32 %v7896_v11, %v9520_v18 }
 0x241   : > { %v1800_v6 = vpop.f32.mrf.mxu1 }
 0x242   : > { %v1936_v48 = vmax.f32 %v1788_v21, %v1872_v46  ;;  %v1801_v42 = vadd.f32 %v9520_v18, %v1800_v6  ;;  %v1972_v23 = vpack.c.bf16 %v1938_v4, %v1937_v45  ;;  %v1877_v16 = vmul.f32 0.01, %v1809_v0 }
 0x243   : > { %v7897_v28 = vpop.f32.mrf.mxu1 }
 0x244   : > { %v1971_v44 = vpack.c.bf16 %v1936_v48, %v1935_v3  ;;  %v1812_v39 = vadd.f32 %v7897_v28, %v9520_v18  ;;  %v1875_v19 = vmul.f32 0.01, %v1801_v42  ;;  %v1941_v21 = vmax.f32 %v1809_v0, %v1877_v16 }
 0x245   : > { %v1803_v47 = vpop.f32.mrf.mxu1 }
 0x246   : > { %v1878_v5 = vmul.f32 0.01, %v1812_v39  ;;  %v1804_v26 = vadd.f32 %v9520_v18, %v1803_v47  ;;  %7958 = vmatprep.mubr.msk.bf16.mxu1 %vm1429_vm0, %v1971_v44  ;;  %v1939_v20 = vmax.f32 %v1801_v42, %v1875_v19  ;;  %v9621_v18 = vld [vmem:[%s11478_s7] ss:$0 sm:$0xff] }
 0x247   : > { %7959 = vmatmul.mubr.msk.bf16.gmra.mxu1 %vm1429_vm0, %v1972_v23 }
 0x248   : > { %v1876_v8 = vmul.f32 0.01, %v1804_v26  ;;  %v1942_v53 = vmax.f32 %v1812_v39, %v1878_v5 }
 0x24a   : > { %v1940_v43 = vmax.f32 %v1804_v26, %v1876_v8  ;;  %v1974_v11 = vpack.c.bf16 %v1942_v53, %v1941_v21 }
 0x24c   : > { %v1973_v41 = vpack.c.bf16 %v1940_v43, %v1939_v20 }
 0x24e   : > { %7962 = vmatprep.mubr.msk.bf16.mxu1 %vm1429_vm0, %v1973_v41 }
 0x24f   : > { %7963 = vmatmul.mubr.msk.bf16.gmra.mxu1 %vm1429_vm0, %v1974_v11 }
 0x297   : > { %v7904_v46 = vpop.f32.mrf.mxu1 }
 0x298   : > { %v2137_v3 = vadd.f32 %v7904_v46, %v9621_v18 }
 0x299   : > { %v2128_v4 = vpop.f32.mrf.mxu1 }
 0x29a   : > { %v2129_v6 = vadd.f32 %v9621_v18, %v2128_v4  ;;  %v2385_v39 = vmul.f32 0.01, %v2137_v3 }
 0x29b   : > { %v7905_v48 = vpop.f32.mrf.mxu1 }
 0x29c   : > { %v2140_v42 = vadd.f32 %v7905_v48, %v9621_v18  ;;  %v2383_v0 = vmul.f32 0.01, %v2129_v6  ;;  %v2449_v53 = vmax.f32 %v2137_v3, %v2385_v39 }
 0x29d   : > { %v2131_v45 = vpop.f32.mrf.mxu1 }
 0x29e   : > { %v2386_v28 = vmul.f32 0.01, %v2140_v42  ;;  %v2132_v44 = vadd.f32 %v9621_v18, %v2131_v45  ;;  %v2447_v26 = vmax.f32 %v2129_v6, %v2383_v0 }
 0x29f   : > { %v7908_v23 = vpop.f32.mrf.mxu1 }
 0x2a0   : > { %v2384_v47 = vmul.f32 0.01, %v2132_v44  ;;  %v2450_v19 = vmax.f32 %v2140_v42, %v2386_v28  ;;  %v2153_v20 = vadd.f32 %v7908_v23, %v9621_v18 }
 0x2a1   : > { %v2144_v5 = vpop.f32.mrf.mxu1 }
 0x2a2   : > { %v2448_v16 = vmax.f32 %v2132_v44, %v2384_v47  ;;  %v2145_v8 = vadd.f32 %v9621_v18, %v2144_v5  ;;  %v2512_v11 = vpack.c.bf16 %v2450_v19, %v2449_v53  ;;  %v2389_v6 = vmul.f32 0.01, %v2153_v20 }
 0x2a3   : > { %v7909_v43 = vpop.f32.mrf.mxu1 }
 0x2a4   : > { %v2511_v21 = vpack.c.bf16 %v2448_v16, %v2447_v26  ;;  %v2156_v41 = vadd.f32 %v7909_v43, %v9621_v18  ;;  %v2387_v4 = vmul.f32 0.01, %v2145_v8  ;;  %v2453_v47 = vmax.f32 %v2153_v20, %v2389_v6 }
 0x2a5   : > { %v2147_v46 = vpop.f32.mrf.mxu1 }
 0x2a6   : > { %v2390_v48 = vmul.f32 0.01, %v2156_v41  ;;  %v2148_v45 = vadd.f32 %v9621_v18, %v2147_v46  ;;  %7968 = vmatprep.mubr.msk.bf16.mxu0 %vm2558_vm1, %v2511_v21  ;;  %v2451_v44 = vmax.f32 %v2145_v8, %v2387_v4 }
 0x2a7   : > { %v7912_v42 = vpop.f32.mrf.mxu1  ;;  %7969 = vmatmul.mubr.msk.bf16.vlgmr.msra.gmra.mxu0 %vm2558_vm1, %v2512_v11 }
 0x2a8   : > { %v2388_v3 = vmul.f32 0.01, %v2148_v45  ;;  %v2454_v0 = vmax.f32 %v2156_v41, %v2390_v48  ;;  %v2169_v19 = vadd.f32 %v7912_v42, %v9621_v18 }
 0x2a9   : > { %v2160_v28 = vpop.f32.mrf.mxu1 }
 0x2aa   : > { %v2452_v39 = vmax.f32 %v2148_v45, %v2388_v3  ;;  %v2161_v23 = vadd.f32 %v9621_v18, %v2160_v28  ;;  %v2514_v53 = vpack.c.bf16 %v2454_v0, %v2453_v47  ;;  %v2393_v41 = vmul.f32 0.01, %v2169_v19 }
 0x2ab   : > { %v7913_v5 = vpop.f32.mrf.mxu1 }
 0x2ac   : > { %v2513_v26 = vpack.c.bf16 %v2452_v39, %v2451_v44  ;;  %v2172_v16 = vadd.f32 %v7913_v5, %v9621_v18  ;;  %v2391_v21 = vmul.f32 0.01, %v2161_v23  ;;  %v2457_v3 = vmax.f32 %v2169_v19, %v2393_v41 }
 0x2ad   : > { %v2163_v43 = vpop.f32.mrf.mxu1 }
 0x2ae   : > { %v2394_v46 = vmul.f32 0.01, %v2172_v16  ;;  %v2164_v11 = vadd.f32 %v9621_v18, %v2163_v43  ;;  %7972 = vmatprep.mubr.msk.bf16.mxu0 %vm2558_vm1, %v2513_v26  ;;  %v2455_v45 = vmax.f32 %v2161_v23, %v2391_v21 }
 0x2af   : > { %v7916_v8 = vpop.f32.mrf.mxu1  ;;  %7973 = vmatmul.mubr.msk.bf16.gmra.mxu0 %vm2558_vm1, %v2514_v53 }
 0x2b0   : > { %v2392_v4 = vmul.f32 0.01, %v2164_v11  ;;  %v2458_v20 = vmax.f32 %v2172_v16, %v2394_v46  ;;  %v2185_v0 = vadd.f32 %v7916_v8, %v9621_v18 }
 0x2b1   : > { %v2176_v48 = vpop.f32.mrf.mxu1 }
 0x2b2   : > { %v2456_v6 = vmax.f32 %v2164_v11, %v2392_v4  ;;  %v2177_v42 = vadd.f32 %v9621_v18, %v2176_v48  ;;  %v2516_v47 = vpack.c.bf16 %v2458_v20, %v2457_v3  ;;  %v2397_v16 = vmul.f32 0.01, %v2185_v0 }
 0x2b3   : > { %v7917_v28 = vpop.f32.mrf.mxu1 }
 0x2b4   : > { %v2515_v44 = vpack.c.bf16 %v2456_v6, %v2455_v45  ;;  %v2188_v39 = vadd.f32 %v7917_v28, %v9621_v18  ;;  %v2395_v26 = vmul.f32 0.01, %v2177_v42  ;;  %v2461_v4 = vmax.f32 %v2185_v0, %v2397_v16 }
 0x2b5   : > { %v2179_v5 = vpop.f32.mrf.mxu1 }
 0x2b6   : > { %v2398_v43 = vmul.f32 0.01, %v2188_v39  ;;  %v2180_v53 = vadd.f32 %v9621_v18, %v2179_v5  ;;  %7976 = vmatprep.mubr.msk.bf16.mxu0 %vm2558_vm1, %v2515_v44  ;;  %v2459_v11 = vmax.f32 %v2177_v42, %v2395_v26 }
 0x2b7   : > { %v7920_v23 = vpop.f32.mrf.mxu1  ;;  %7977 = vmatmul.mubr.msk.bf16.gmra.mxu0 %vm2558_vm1, %v2516_v47 }
 0x2b8   : > { %v2396_v21 = vmul.f32 0.01, %v2180_v53  ;;  %v2462_v19 = vmax.f32 %v2188_v39, %v2398_v43  ;;  %v2201_v20 = vadd.f32 %v7920_v23, %v9621_v18 }
 0x2b9   : > { %v2192_v46 = vpop.f32.mrf.mxu1 }
 0x2ba   : > { %v2460_v41 = vmax.f32 %v2180_v53, %v2396_v21  ;;  %v2193_v8 = vadd.f32 %v9621_v18, %v2192_v46  ;;  %v2518_v3 = vpack.c.bf16 %v2462_v19, %v2461_v4  ;;  %v2401_v39 = vmul.f32 0.01, %v2201_v20 }
 0x2bb   : > { %v7921_v48 = vpop.f32.mrf.mxu1 }
 0x2bc   : > { %v2517_v45 = vpack.c.bf16 %v2460_v41, %v2459_v11  ;;  %v2204_v6 = vadd.f32 %v7921_v48, %v9621_v18  ;;  %v2399_v44 = vmul.f32 0.01, %v2193_v8  ;;  %v2465_v21 = vmax.f32 %v2201_v20, %v2401_v39 }
 0x2bd   : > { %v2195_v28 = vpop.f32.mrf.mxu1 }
 0x2be   : > { %v2402_v5 = vmul.f32 0.01, %v2204_v6  ;;  %v2196_v47 = vadd.f32 %v9621_v18, %v2195_v28  ;;  %7980 = vmatprep.mubr.msk.bf16.mxu0 %vm2558_vm1, %v2517_v45  ;;  %v2463_v53 = vmax.f32 %v2193_v8, %v2399_v44 }
 0x2bf   : > { %v7924_v42 = vpop.f32.mrf.mxu1  ;;  %7981 = vmatmul.mubr.msk.bf16.gmra.mxu0 %vm2558_vm1, %v2518_v3 }
 0x2c0   : > { %v2400_v26 = vmul.f32 0.01, %v2196_v47  ;;  %v2466_v0 = vmax.f32 %v2204_v6, %v2402_v5  ;;  %v2217_v19 = vadd.f32 %v7924_v42, %v9621_v18 }
 0x2c1   : > { %v2208_v43 = vpop.f32.mrf.mxu1 }
 0x2c2   : > { %v2464_v16 = vmax.f32 %v2196_v47, %v2400_v26  ;;  %v2209_v23 = vadd.f32 %v9621_v18, %v2208_v43  ;;  %v2520_v4 = vpack.c.bf16 %v2466_v0, %v2465_v21  ;;  %v2405_v6 = vmul.f32 0.01, %v2217_v19 }
 0x2c3   : > { %v7925_v46 = vpop.f32.mrf.mxu1 }
 0x2c4   : > { %v2519_v11 = vpack.c.bf16 %v2464_v16, %v2463_v53  ;;  %v2220_v41 = vadd.f32 %v7925_v46, %v9621_v18  ;;  %v2403_v45 = vmul.f32 0.01, %v2209_v23  ;;  %v2469_v26 = vmax.f32 %v2217_v19, %v2405_v6 }
 0x2c5   : > { %v2211_v48 = vpop.f32.mrf.mxu1 }
 0x2c6   : > { %v2406_v28 = vmul.f32 0.01, %v2220_v41  ;;  %v2212_v3 = vadd.f32 %v9621_v18, %v2211_v48  ;;  %7984 = vmatprep.mubr.msk.bf16.mxu0 %vm2558_vm1, %v2519_v11  ;;  %v2467_v47 = vmax.f32 %v2209_v23, %v2403_v45 }
 0x2c7   : > { %v7928_v8 = vpop.f32.mrf.mxu1  ;;  %7985 = vmatmul.mubr.msk.bf16.gmra.mxu0 %vm2558_vm1, %v2520_v4 }
 0x2c8   : > { %v2404_v44 = vmul.f32 0.01, %v2212_v3  ;;  %v2470_v20 = vmax.f32 %v2220_v41, %v2406_v28  ;;  %v2233_v0 = vadd.f32 %v7928_v8, %v9621_v18 }
 0x2c9   : > { %v2224_v5 = vpop.f32.mrf.mxu1 }
 0x2ca   : > { %v2468_v39 = vmax.f32 %v2212_v3, %v2404_v44  ;;  %v2225_v42 = vadd.f32 %v9621_v18, %v2224_v5  ;;  %v2522_v21 = vpack.c.bf16 %v2470_v20, %v2469_v26  ;;  %v2409_v41 = vmul.f32 0.01, %v2233_v0 }
 0x2cb   : > { %v7929_v43 = vpop.f32.mrf.mxu1 }
 0x2cc   : > { %v2521_v53 = vpack.c.bf16 %v2468_v39, %v2467_v47  ;;  %v2236_v16 = vadd.f32 %v7929_v43, %v9621_v18  ;;  %v2407_v11 = vmul.f32 0.01, %v2225_v42  ;;  %v2473_v44 = vmax.f32 %v2233_v0, %v2409_v41 }
 0x2cd   : > { %v2227_v46 = vpop.f32.mrf.mxu1 }
 0x2ce   : > { %v2410_v48 = vmul.f32 0.01, %v2236_v16  ;;  %v2228_v4 = vadd.f32 %v9621_v18, %v2227_v46  ;;  %7988 = vmatprep.mubr.msk.bf16.mxu0 %vm2558_vm1, %v2521_v53  ;;  %v2471_v3 = vmax.f32 %v2225_v42, %v2407_v11 }
 0x2cf   : > { %v7932_v23 = vpop.f32.mrf.mxu1  ;;  %7989 = vmatmul.mubr.msk.bf16.gmra.mxu0 %vm2558_vm1, %v2522_v21 }
 0x2d0   : > { %v2408_v45 = vmul.f32 0.01, %v2228_v4  ;;  %v2474_v19 = vmax.f32 %v2236_v16, %v2410_v48  ;;  %v2249_v20 = vadd.f32 %v7932_v23, %v9621_v18 }
 0x2d1   : > { %v2240_v28 = vpop.f32.mrf.mxu1 }
 0x2d2   : > { %v2472_v6 = vmax.f32 %v2228_v4, %v2408_v45  ;;  %v2241_v8 = vadd.f32 %v9621_v18, %v2240_v28  ;;  %v2524_v26 = vpack.c.bf16 %v2474_v19, %v2473_v44  ;;  %v2413_v16 = vmul.f32 0.01, %v2249_v20 }
 0x2d3   : > { %v7933_v5 = vpop.f32.mrf.mxu1 }
 0x2d4   : > { %v2523_v47 = vpack.c.bf16 %v2472_v6, %v2471_v3  ;;  %v2252_v39 = vadd.f32 %v7933_v5, %v9621_v18  ;;  %v2411_v53 = vmul.f32 0.01, %v2241_v8  ;;  %v2477_v45 = vmax.f32 %v2249_v20, %v2413_v16 }
 0x2d5   : > { %v2243_v43 = vpop.f32.mrf.mxu1 }
 0x2d6   : > { %v2414_v46 = vmul.f32 0.01, %v2252_v39  ;;  %v2244_v21 = vadd.f32 %v9621_v18, %v2243_v43  ;;  %7992 = vmatprep.mubr.msk.bf16.mxu0 %vm2558_vm1, %v2523_v47  ;;  %v2475_v4 = vmax.f32 %v2241_v8, %v2411_v53 }
 0x2d7   : > { %v7936_v42 = vpop.f32.mrf.mxu1  ;;  %7993 = vmatmul.mubr.msk.bf16.gmra.mxu0 %vm2558_vm1, %v2524_v26 }
 0x2d8   : > { %v2412_v11 = vmul.f32 0.01, %v2244_v21  ;;  %v2478_v0 = vmax.f32 %v2252_v39, %v2414_v46  ;;  %v2265_v19 = vadd.f32 %v7936_v42, %v9621_v18 }
 0x2d9   : > { %v2256_v48 = vpop.f32.mrf.mxu1 }
 0x2da   : > { %v2476_v41 = vmax.f32 %v2244_v21, %v2412_v11  ;;  %v2257_v23 = vadd.f32 %v9621_v18, %v2256_v48  ;;  %v2526_v44 = vpack.c.bf16 %v2478_v0, %v2477_v45  ;;  %v2417_v39 = vmul.f32 0.01, %v2265_v19 }
 0x2db   : > { %v7937_v28 = vpop.f32.mrf.mxu1 }
 0x2dc   : > { %v2525_v3 = vpack.c.bf16 %v2476_v41, %v2475_v4  ;;  %v2268_v6 = vadd.f32 %v7937_v28, %v9621_v18  ;;  %v2415_v47 = vmul.f32 0.01, %v2257_v23  ;;  %v2481_v11 = vmax.f32 %v2265_v19, %v2417_v39 }
 0x2dd   : > { %v2259_v5 = vpop.f32.mrf.mxu1 }
 0x2de   : > { %v2418_v43 = vmul.f32 0.01, %v2268_v6  ;;  %v2260_v26 = vadd.f32 %v9621_v18, %v2259_v5  ;;  %7996 = vmatprep.mubr.msk.bf16.mxu0 %vm2558_vm1, %v2525_v3  ;;  %v2479_v21 = vmax.f32 %v2257_v23, %v2415_v47 }
 0x2df   : > { %v7940_v8 = vpop.f32.mrf.mxu1  ;;  %7997 = vmatmul.mubr.msk.bf16.gmra.mxu0 %vm2558_vm1, %v2526_v44 }
 0x2e0   : > { %v2416_v53 = vmul.f32 0.01, %v2260_v26  ;;  %v2482_v20 = vmax.f32 %v2268_v6, %v2418_v43  ;;  %v2281_v0 = vadd.f32 %v7940_v8, %v9621_v18 }
 0x2e1   : > { %v2272_v46 = vpop.f32.mrf.mxu1 }
 0x2e2   : > { %v2480_v16 = vmax.f32 %v2260_v26, %v2416_v53  ;;  %v2273_v42 = vadd.f32 %v9621_v18, %v2272_v46  ;;  %v2528_v45 = vpack.c.bf16 %v2482_v20, %v2481_v11  ;;  %v2421_v6 = vmul.f32 0.01, %v2281_v0 }
 0x2e3   : > { %v7941_v48 = vpop.f32.mrf.mxu1 }
 0x2e4   : > { %v2527_v4 = vpack.c.bf16 %v2480_v16, %v2479_v21  ;;  %v2284_v41 = vadd.f32 %v7941_v48, %v9621_v18  ;;  %v2419_v3 = vmul.f32 0.01, %v2273_v42  ;;  %v2485_v53 = vmax.f32 %v2281_v0, %v2421_v6 }
 0x2e5   : > { %v2275_v28 = vpop.f32.mrf.mxu1 }
 0x2e6   : > { %v2422_v5 = vmul.f32 0.01, %v2284_v41  ;;  %v2276_v44 = vadd.f32 %v9621_v18, %v2275_v28  ;;  %8000 = vmatprep.mubr.msk.bf16.mxu0 %vm2558_vm1, %v2527_v4  ;;  %v2483_v26 = vmax.f32 %v2273_v42, %v2419_v3 }
 0x2e7   : > { %v7944_v23 = vpop.f32.mrf.mxu1  ;;  %8001 = vmatmul.mubr.msk.bf16.gmra.mxu0 %vm2558_vm1, %v2528_v45 }
 0x2e8   : > { %v2420_v47 = vmul.f32 0.01, %v2276_v44  ;;  %v2486_v19 = vmax.f32 %v2284_v41, %v2422_v5  ;;  %v2297_v20 = vadd.f32 %v7944_v23, %v9621_v18 }
 0x2e9   : > { %v2288_v43 = vpop.f32.mrf.mxu1 }
 0x2ea   : > { %v2484_v39 = vmax.f32 %v2276_v44, %v2420_v47  ;;  %v2289_v8 = vadd.f32 %v9621_v18, %v2288_v43  ;;  %v2530_v11 = vpack.c.bf16 %v2486_v19, %v2485_v53  ;;  %v2425_v41 = vmul.f32 0.01, %v2297_v20 }
 0x2eb   : > { %v7945_v46 = vpop.f32.mrf.mxu1 }
 0x2ec   : > { %v2529_v21 = vpack.c.bf16 %v2484_v39, %v2483_v26  ;;  %v2300_v16 = vadd.f32 %v7945_v46, %v9621_v18  ;;  %v2423_v4 = vmul.f32 0.01, %v2289_v8  ;;  %v2489_v47 = vmax.f32 %v2297_v20, %v2425_v41 }
 0x2ed   : > { %v2291_v48 = vpop.f32.mrf.mxu1 }
 0x2ee   : > { %v2426_v28 = vmul.f32 0.01, %v2300_v16  ;;  %v2292_v45 = vadd.f32 %v9621_v18, %v2291_v48  ;;  %8004 = vmatprep.mubr.msk.bf16.mxu0 %vm2558_vm1, %v2529_v21  ;;  %v2487_v44 = vmax.f32 %v2289_v8, %v2423_v4 }
 0x2ef   : > { %v7948_v42 = vpop.f32.mrf.mxu1  ;;  %8005 = vmatmul.mubr.msk.bf16.gmra.mxu0 %vm2558_vm1, %v2530_v11 }
 0x2f0   : > { %v2424_v3 = vmul.f32 0.01, %v2292_v45  ;;  %v2490_v0 = vmax.f32 %v2300_v16, %v2426_v28  ;;  %v2313_v19 = vadd.f32 %v7948_v42, %v9621_v18 }
 0x2f1   : > { %v2304_v5 = vpop.f32.mrf.mxu1 }
 0x2f2   : > { %v2488_v6 = vmax.f32 %v2292_v45, %v2424_v3  ;;  %v2305_v23 = vadd.f32 %v9621_v18, %v2304_v5  ;;  %v2532_v53 = vpack.c.bf16 %v2490_v0, %v2489_v47  ;;  %v2429_v16 = vmul.f32 0.01, %v2313_v19 }
 0x2f3   : > { %v7949_v43 = vpop.f32.mrf.mxu1 }
 0x2f4   : > { %v2531_v26 = vpack.c.bf16 %v2488_v6, %v2487_v44  ;;  %v2316_v39 = vadd.f32 %v7949_v43, %v9621_v18  ;;  %v2427_v21 = vmul.f32 0.01, %v2305_v23  ;;  %v2493_v3 = vmax.f32 %v2313_v19, %v2429_v16 }
 0x2f5   : > { %v2307_v46 = vpop.f32.mrf.mxu1 }
 0x2f6   : > { %v2430_v48 = vmul.f32 0.01, %v2316_v39  ;;  %v2308_v11 = vadd.f32 %v9621_v18, %v2307_v46  ;;  %8008 = vmatprep.mubr.msk.bf16.mxu0 %vm2558_vm1, %v2531_v26  ;;  %v2491_v45 = vmax.f32 %v2305_v23, %v2427_v21 }
 0x2f7   : > { %v7952_v8 = vpop.f32.mrf.mxu1  ;;  %8009 = vmatmul.mubr.msk.bf16.gmra.mxu0 %vm2558_vm1, %v2532_v53 }
 0x2f8   : > { %v2428_v4 = vmul.f32 0.01, %v2308_v11  ;;  %v2494_v20 = vmax.f32 %v2316_v39, %v2430_v48  ;;  %v2329_v0 = vadd.f32 %v7952_v8, %v9621_v18 }
 0x2f9   : > { %v2320_v28 = vpop.f32.mrf.mxu1 }
 0x2fa   : > { %v2492_v41 = vmax.f32 %v2308_v11, %v2428_v4  ;;  %v2321_v42 = vadd.f32 %v9621_v18, %v2320_v28  ;;  %v2534_v47 = vpack.c.bf16 %v2494_v20, %v2493_v3  ;;  %v2433_v39 = vmul.f32 0.01, %v2329_v0 }
 0x2fb   : > { %v7953_v5 = vpop.f32.mrf.mxu1 }
 0x2fc   : > { %v2533_v44 = vpack.c.bf16 %v2492_v41, %v2491_v45  ;;  %v2332_v6 = vadd.f32 %v7953_v5, %v9621_v18  ;;  %v2431_v26 = vmul.f32 0.01, %v2321_v42  ;;  %v2497_v4 = vmax.f32 %v2329_v0, %v2433_v39 }
 0x2fd   : > { %v2323_v43 = vpop.f32.mrf.mxu1 }
 0x2fe   : > { %v2434_v46 = vmul.f32 0.01, %v2332_v6  ;;  %v2324_v53 = vadd.f32 %v9621_v18, %v2323_v43  ;;  %8012 = vmatprep.mubr.msk.bf16.mxu0 %vm2558_vm1, %v2533_v44  ;;  %v2495_v11 = vmax.f32 %v2321_v42, %v2431_v26 }
 0x2ff   : > { %v7956_v23 = vpop.f32.mrf.mxu1  ;;  %8013 = vmatmul.mubr.msk.bf16.gmra.mxu0 %vm2558_vm1, %v2534_v47 }
 0x300   : > { %v2432_v21 = vmul.f32 0.01, %v2324_v53  ;;  %v2498_v19 = vmax.f32 %v2332_v6, %v2434_v46  ;;  %v2345_v20 = vadd.f32 %v7956_v23, %v9621_v18 }
 0x301   : > { %v2336_v48 = vpop.f32.mrf.mxu1 }
 0x302   : > { %v2496_v16 = vmax.f32 %v2324_v53, %v2432_v21  ;;  %v2337_v8 = vadd.f32 %v9621_v18, %v2336_v48  ;;  %v2536_v3 = vpack.c.bf16 %v2498_v19, %v2497_v4  ;;  %v2437_v6 = vmul.f32 0.01, %v2345_v20  ;;  %v3333_v4 = vld [vmem:[%s11481_s10 + $0x20] sm:$0xff] }
 0x303   : > { %v7957_v28 = vpop.f32.mrf.mxu1  ;;  %8032 = vmatprep.subr.mxu0 %v3333_v4  ;;  %8442 = vmatprep.subr.mxu1 %v3333_v4 }
 0x304   : > { %v2535_v45 = vpack.c.bf16 %v2496_v16, %v2495_v11  ;;  %v2348_v41 = vadd.f32 %v7957_v28, %v9621_v18  ;;  %v2435_v44 = vmul.f32 0.01, %v2337_v8  ;;  %v2501_v21 = vmax.f32 %v2345_v20, %v2437_v6  ;;  %8033 = vmatpush3.msra.mxu0 %v3333_v4  ;;  %8447 = vmatpush3.msra.mxu1 %v3333_v4 }
 0x305   : > { %v2339_v5 = vpop.f32.mrf.mxu1 }
 0x306   : > { %v2438_v43 = vmul.f32 0.01, %v2348_v41  ;;  %v2340_v47 = vadd.f32 %v9621_v18, %v2339_v5  ;;  %8016 = vmatprep.mubr.msk.bf16.mxu0 %vm2558_vm1, %v2535_v45  ;;  %v2499_v53 = vmax.f32 %v2337_v8, %v2435_v44 }
 0x307   : > { %v7960_v42 = vpop.f32.mrf.mxu1  ;;  %8017 = vmatmul.mubr.msk.bf16.gmra.mxu0 %vm2558_vm1, %v2536_v3 }
 0x308   : > { %v2436_v26 = vmul.f32 0.01, %v2340_v47  ;;  %v2502_v0 = vmax.f32 %v2348_v41, %v2438_v43  ;;  %v2361_v19 = vadd.f32 %v7960_v42, %v9621_v18 }
 0x309   : > { %v2352_v46 = vpop.f32.mrf.mxu1 }
 0x30a   : > { %v2500_v39 = vmax.f32 %v2340_v47, %v2436_v26  ;;  %v2353_v23 = vadd.f32 %v9621_v18, %v2352_v46  ;;  %v2538_v28 = vpack.c.bf16 %v2502_v0, %v2501_v21  ;;  %v2441_v20 = vmul.f32 0.01, %v2361_v19 }
 0x30b   : > { %v7961_v48 = vpop.f32.mrf.mxu1 }
 0x30c   : > { %v2537_v11 = vpack.c.bf16 %v2500_v39, %v2499_v53  ;;  %v2364_v16 = vadd.f32 %v7961_v48, %v9621_v18  ;;  %v2439_v41 = vmul.f32 0.01, %v2353_v23  ;;  %v2505_v0 = vmax.f32 %v2361_v19, %v2441_v20 }
 0x30d   : > { %v2355_v45 = vpop.f32.mrf.mxu1 }
 0x30e   : > { %v2442_v8 = vmul.f32 0.01, %v2364_v16  ;;  %v2356_v3 = vadd.f32 %v9621_v18, %v2355_v45  ;;  %8020 = vmatprep.mubr.msk.bf16.mxu0 %vm2558_vm1, %v2537_v11  ;;  %v2503_v6 = vmax.f32 %v2353_v23, %v2439_v41 }
 0x30f   : > { %v7964_v5 = vpop.f32.mrf.mxu1  ;;  %8021 = vmatmul.mubr.msk.bf16.gmra.mxu0 %vm2558_vm1, %v2538_v28 }
 0x310   : > { %v2440_v44 = vmul.f32 0.01, %v2356_v3  ;;  %v2506_v43 = vmax.f32 %v2364_v16, %v2442_v8  ;;  %v2377_v46 = vadd.f32 %v7964_v5, %v9621_v18  ;;  %v3330_v5 = vld [vmem:[%s11481_s10 + $0x8] sm:$0xff] }
 0x311   : > { %v2368_v47 = vpop.f32.mrf.mxu1 }
 0x312   : > { %v2504_v42 = vmax.f32 %v2356_v3, %v2440_v44  ;;  %v2369_v26 = vadd.f32 %v9621_v18, %v2368_v47  ;;  %v2540_v48 = vpack.c.bf16 %v2506_v43, %v2505_v0  ;;  %v2445_v16 = vmul.f32 0.01, %v2377_v46  ;;  %v9734_v44 = vld [vmem:[%s11480_s9] ss:$0 sm:$0xff] }
 0x313   : > { %v7965_v53 = vpop.f32.mrf.mxu1 }
 0x314   : > { %v2539_v39 = vpack.c.bf16 %v2504_v42, %v2503_v6  ;;  %v2380_v21 = vadd.f32 %v7965_v53, %v9621_v18  ;;  %v2443_v45 = vmul.f32 0.01, %v2369_v26  ;;  %v2509_v8 = vmax.f32 %v2377_v46, %v2445_v16 }
 0x315   : > { %v2371_v11 = vpop.f32.mrf.mxu1 }
 0x316   : > { %v2446_v40 = vmul.f32 0.01, %v2380_v21  ;;  %v2372_v4 = vadd.f32 %v9621_v18, %v2371_v11  ;;  %8024 = vmatprep.mubr.msk.bf16.mxu0 %vm2558_vm1, %v2539_v39  ;;  %v2507_v19 = vmax.f32 %v2369_v26, %v2443_v45  ;;  %v3332_v18 = vld [vmem:[%s11481_s10 + $0x18] sm:$0xff] }
 0x317   : > { %8025 = vmatmul.mubr.msk.bf16.gmra.mxu0 %vm2558_vm1, %v2540_v48  ;;  %8034 = vmatprep.subr.mxu0 %v3332_v18 }
 0x318   : > { %v2444_v23 = vmul.f32 0.01, %v2372_v4  ;;  %v2510_v28 = vmax.f32 %v2380_v21, %v2446_v40  ;;  %8443 = vmatprep.subr.mxu1 %v3332_v18  ;;  %8035 = vmatpush3.msra.mxu0 %v3332_v18  ;;  %v3331_v40 = vld [vmem:[%s11481_s10 + $0x10] sm:$0xff]  ;;  %v3329_v21 = vld [vmem:[%s11481_s10] sm:$0xff] }
 0x319   : > { %8448 = vmatpush3.msra.mxu1 %v3332_v18  ;;  %8036 = vmatprep.subr.mxu0 %v3331_v40 }
 0x31a   : > { %v2508_v41 = vmax.f32 %v2372_v4, %v2444_v23  ;;  %v2542_v20 = vpack.c.bf16 %v2510_v28, %v2509_v8  ;;  %8444 = vmatprep.subr.mxu1 %v3331_v40  ;;  %8037 = vmatpush3.msra.mxu0 %v3331_v40 }
 0x31b   : > { %8449 = vmatpush3.msra.mxu1 %v3331_v40  ;;  %8038 = vmatprep.subr.mxu0 %v3330_v5 }
 0x31c   : > { %v2541_v3 = vpack.c.bf16 %v2508_v41, %v2507_v19  ;;  %8445 = vmatprep.subr.mxu1 %v3330_v5  ;;  %8039 = vmatpush3.msra.mxu0 %v3330_v5 }
 0x31d   : > { %8450 = vmatpush3.msra.mxu1 %v3330_v5  ;;  %8040 = vmatprep.subr.mxu0 %v3329_v21 }
 0x31e   : > { %8028 = vmatprep.mubr.msk.bf16.mxu0 %vm2558_vm1, %v2541_v3  ;;  %8446 = vmatprep.subr.mxu1 %v3329_v21 }
 0x31f   : > { %8029 = vmatmul.mubr.msk.bf16.gmra.mxu0 %vm2558_vm1, %v2542_v20  ;;  %8451 = vmatpush3.msra.mxu1 %v3329_v21 }
 0x320   : > { %8041 = vmatpush3.msra.mxu0 %v3329_v21 }
 0x367   : > { %v7970_v43 = vpop.f32.mrf.mxu0 }
 0x368   : > { %v9737_v47 = vadd.f32 %v7970_v43, %v9734_v44 }
 0x369   : > { %v2689_v6 = vpop.f32.mrf.mxu0 }
 0x36a   : > { %v2951_v42 = vsel %vm2944_vm2, %v9737_v47, -inf  ;;  %v9742_v26 = vadd.f32 %v9734_v44, %v2689_v6 }
 0x36b   : > { %2952 = vmax.xlane.f32.xlu1 %v2951_v42  ;;  %v7971_v0 = vpop.f32.mrf.mxu0 }
 0x36c   : > { %v9745_v46 = vadd.f32 %v7971_v0, %v9734_v44  ;;  %v2945_v53 = vsel %vm2944_vm2, %v9742_v26, -inf }
 0x36d   : > { %v2692_v39 = vpop.f32.mrf.mxu0  ;;  %2946 = vmax.xlane.f32.xlu0 %v2945_v53 }
 0x36e   : > { %v9753_v48 = vadd.f32 %v9734_v44, %v2692_v39  ;;  %v2954_v11 = vsel %vm2944_vm2, %v9745_v46, -inf }
 0x36f   : > { %2955 = vmax.xlane.f32.xlu1 %v2954_v11  ;;  %v7974_v45 = vpop.f32.mrf.mxu0 }
 0x370   : > { %v2948_v4 = vsel %vm2944_vm2, %v9753_v48, -inf  ;;  %v9763_v19 = vadd.f32 %v7974_v45, %v9734_v44 }
 0x371   : > { %v2705_v16 = vpop.f32.mrf.mxu0  ;;  %2949 = vmax.xlane.f32.xlu0 %v2948_v4 }
 0x372   : > { %v9760_v23 = vadd.f32 %v9734_v44, %v2705_v16  ;;  %v2963_v5 = vsel %vm2944_vm2, %v9763_v19, -inf }
 0x373   : > { %v7975_v28 = vpop.f32.mrf.mxu0 }
 0x374   : > { %v2957_v41 = vsel %vm2944_vm2, %v9760_v23, -inf  ;;  %v9771_v18 = vadd.f32 %v7975_v28, %v9734_v44 }
 0x375   : > { %v2708_v8 = vpop.f32.mrf.mxu0  ;;  %2958 = vmax.xlane.f32.xlu0 %v2957_v41 }
 0x376   : > { %v9768_v3 = vadd.f32 %v9734_v44, %v2708_v8  ;;  %v2966_v53 = vsel %vm2944_vm2, %v9771_v18, -inf }
 0x377   : > { %v7978_v20 = vpop.f32.mrf.mxu0 }
 0x378   : > { %v2960_v40 = vsel %vm2944_vm2, %v9768_v3, -inf  ;;  %v9781_v0 = vadd.f32 %v7978_v20, %v9734_v44 }
 0x379   : > { %v2721_v43 = vpop.f32.mrf.mxu0  ;;  %2961 = vmax.xlane.f32.xlu1 %v2960_v40  ;;  %2964 = vmax.xlane.f32.xlu0 %v2963_v5 }
 0x37a   : > { %v9778_v6 = vadd.f32 %v9734_v44, %v2721_v43  ;;  %v2975_v28 = vsel %vm2944_vm2, %v9781_v0, -inf }
 0x37b   : > { %v7979_v42 = vpop.f32.mrf.mxu0 }
 0x37c   : > { %v2969_v39 = vsel %vm2944_vm2, %v9778_v6, -inf  ;;  %v9791_v4 = vadd.f32 %v7979_v42, %v9734_v44 }
 0x37d   : > { %v2724_v21 = vpop.f32.mrf.mxu0  ;;  %2967 = vmax.xlane.f32.xlu1 %v2966_v53  ;;  %2970 = vmax.xlane.f32.xlu0 %v2969_v39 }
 0x37e   : > { %v9788_v11 = vadd.f32 %v9734_v44, %v2724_v21  ;;  %v2978_v5 = vsel %vm2944_vm2, %v9791_v4, -inf }
 0x37f   : > { %v7982_v45 = vpop.f32.mrf.mxu0 }
 0x380   : > { %v2972_v16 = vsel %vm2944_vm2, %v9788_v11, -inf  ;;  %v9801_v40 = vadd.f32 %v7982_v45, %v9734_v44 }
 0x381   : > { %v2737_v41 = vpop.f32.mrf.mxu0  ;;  %2973 = vmax.xlane.f32.xlu1 %v2972_v16  ;;  %2976 = vmax.xlane.f32.xlu0 %v2975_v28 }
 0x382   : > { %v9798_v8 = vadd.f32 %v9734_v44, %v2737_v41  ;;  %v2987_v16 = vsel %vm2944_vm2, %v9801_v40, -inf }
 0x383   : > { %v7983_v20 = vpop.f32.mrf.mxu0 }
 0x384   : > { %v2981_v43 = vsel %vm2944_vm2, %v9798_v8, -inf  ;;  %v9811_v21 = vadd.f32 %v7983_v20, %v9734_v44 }
 0x385   : > { %v2740_v42 = vpop.f32.mrf.mxu0  ;;  %2979 = vmax.xlane.f32.xlu1 %v2978_v5  ;;  %2982 = vmax.xlane.f32.xlu0 %v2981_v43 }
 0x386   : > { %v9808_v53 = vadd.f32 %v9734_v44, %v2740_v42  ;;  %v2990_v20 = vsel %vm2944_vm2, %v9811_v21, -inf }
 0x387   : > { %v7986_v39 = vpop.f32.mrf.mxu0 }
 0x388   : > { %v2984_v45 = vsel %vm2944_vm2, %v9808_v53, -inf  ;;  %v9821_v43 = vadd.f32 %v7986_v39, %v9734_v44 }
 0x389   : > { %v2753_v28 = vpop.f32.mrf.mxu0  ;;  %2985 = vmax.xlane.f32.xlu1 %v2984_v45  ;;  %2988 = vmax.xlane.f32.xlu0 %v2987_v16 }
 0x38a   : > { %v9818_v41 = vadd.f32 %v9734_v44, %v2753_v28  ;;  %v2999_v28 = vsel %vm2944_vm2, %v9821_v43, -inf }
 0x38b   : > { %v7987_v5 = vpop.f32.mrf.mxu0 }
 0x38c   : > { %v2993_v42 = vsel %vm2944_vm2, %v9818_v41, -inf  ;;  %v9831_v16 = vadd.f32 %v7987_v5, %v9734_v44 }
 0x38d   : > { %v2756_v37 = vpop.f32.mrf.mxu0  ;;  %2991 = vmax.xlane.f32.xlu1 %v2990_v20  ;;  %2994 = vmax.xlane.f32.xlu0 %v2993_v42 }
 0x38e   : > { %v9828_v31 = vadd.f32 %v9734_v44, %v2756_v37  ;;  %v3002_v5 = vsel %vm2944_vm2, %v9831_v16, -inf }
 0x38f   : > { %v7990_v45 = vpop.f32.mrf.mxu0 }
 0x390   : > { %v2996_v39 = vsel %vm2944_vm2, %v9828_v31, -inf  ;;  %v9841_v37 = vadd.f32 %v7990_v45, %v9734_v44 }
 0x391   : > { %v2769_v50 = vpop.f32.mrf.mxu0  ;;  %2997 = vmax.xlane.f32.xlu1 %v2996_v39  ;;  %3000 = vmax.xlane.f32.xlu0 %v2999_v28 }
 0x392   : > { %v9838_v2 = vadd.f32 %v9734_v44, %v2769_v50  ;;  %v3011_v28 = vsel %vm2944_vm2, %v9841_v37, -inf }
 0x393   : > { %v7991_v20 = vpop.f32.mrf.mxu0 }
 0x394   : > { %v3005_v42 = vsel %vm2944_vm2, %v9838_v2, -inf  ;;  %v9851_v50 = vadd.f32 %v7991_v20, %v9734_v44 }
 0x395   : > { %v2772_v58 = vpop.f32.mrf.mxu0  ;;  %3003 = vmax.xlane.f32.xlu1 %v3002_v5  ;;  %3006 = vmax.xlane.f32.xlu0 %v3005_v42 }
 0x396   : > { %v9848_v55 = vadd.f32 %v9734_v44, %v2772_v58  ;;  %v3014_v20 = vsel %vm2944_vm2, %v9851_v50, -inf }
 0x397   : > { %v7994_v39 = vpop.f32.mrf.mxu0 }
 0x398   : > { %v3008_v45 = vsel %vm2944_vm2, %v9848_v55, -inf  ;;  %v9861_v58 = vadd.f32 %v7994_v39, %v9734_v44 }
 0x399   : > { %v2785_v22 = vpop.f32.mrf.mxu0  ;;  %3009 = vmax.xlane.f32.xlu1 %v3008_v45  ;;  %3012 = vmax.xlane.f32.xlu0 %v3011_v28 }
 0x39a   : > { %v9858_v27 = vadd.f32 %v9734_v44, %v2785_v22  ;;  %v3023_v28 = vsel %vm2944_vm2, %v9861_v58, -inf }
 0x39b   : > { %v7995_v5 = vpop.f32.mrf.mxu0 }
 0x39c   : > { %v3017_v42 = vsel %vm2944_vm2, %v9858_v27, -inf  ;;  %v9871_v22 = vadd.f32 %v7995_v5, %v9734_v44 }
 0x39d   : > { %v2788_v25 = vpop.f32.mrf.mxu0  ;;  %3015 = vmax.xlane.f32.xlu1 %v3014_v20  ;;  %3018 = vmax.xlane.f32.xlu0 %v3017_v42 }
 0x39e   : > { %v9868_v24 = vadd.f32 %v9734_v44, %v2788_v25  ;;  %v3026_v5 = vsel %vm2944_vm2, %v9871_v22, -inf }
 0x39f   : > { %v7998_v45 = vpop.f32.mrf.mxu0 }
 0x3a0   : > { %v3020_v39 = vsel %vm2944_vm2, %v9868_v24, -inf  ;;  %v9881_v25 = vadd.f32 %v7998_v45, %v9734_v44 }
 0x3a1   : > { %v2801_v56 = vpop.f32.mrf.mxu0  ;;  %3021 = vmax.xlane.f32.xlu1 %v3020_v39  ;;  %3024 = vmax.xlane.f32.xlu0 %v3023_v28 }
 0x3a2   : > { %v9878_v1 = vadd.f32 %v9734_v44, %v2801_v56  ;;  %v3035_v28 = vsel %vm2944_vm2, %v9881_v25, -inf }
 0x3a3   : > { %v7999_v20 = vpop.f32.mrf.mxu0 }
 0x3a4   : > { %v3029_v42 = vsel %vm2944_vm2, %v9878_v1, -inf  ;;  %v9891_v56 = vadd.f32 %v7999_v20, %v9734_v44 }
 0x3a5   : > { %v2804_v63 = vpop.f32.mrf.mxu0  ;;  %3027 = vmax.xlane.f32.xlu1 %v3026_v5  ;;  %3030 = vmax.xlane.f32.xlu0 %v3029_v42 }
 0x3a6   : > { %v9888_v60 = vadd.f32 %v9734_v44, %v2804_v63  ;;  %v3038_v20 = vsel %vm2944_vm2, %v9891_v56, -inf }
 0x3a7   : > { %v8002_v39 = vpop.f32.mrf.mxu0 }
 0x3a8   : > { %v3032_v45 = vsel %vm2944_vm2, %v9888_v60, -inf  ;;  %v9901_v63 = vadd.f32 %v8002_v39, %v9734_v44 }
 0x3a9   : > { %v2817_v29 = vpop.f32.mrf.mxu0  ;;  %3033 = vmax.xlane.f32.xlu1 %v3032_v45  ;;  %3036 = vmax.xlane.f32.xlu0 %v3035_v28 }
 0x3aa   : > { %v9898_v38 = vadd.f32 %v9734_v44, %v2817_v29  ;;  %v3047_v28 = vsel %vm2944_vm2, %v9901_v63, -inf }
 0x3ab   : > { %v8003_v5 = vpop.f32.mrf.mxu0 }
 0x3ac   : > { %v3041_v42 = vsel %vm2944_vm2, %v9898_v38, -inf  ;;  %v9911_v29 = vadd.f32 %v8003_v5, %v9734_v44 }
 0x3ad   : > { %v2820_v36 = vpop.f32.mrf.mxu0  ;;  %3039 = vmax.xlane.f32.xlu1 %v3038_v20  ;;  %3042 = vmax.xlane.f32.xlu0 %v3041_v42 }
 0x3ae   : > { %v9908_v34 = vadd.f32 %v9734_v44, %v2820_v36  ;;  %v3050_v5 = vsel %vm2944_vm2, %v9911_v29, -inf }
 0x3af   : > { %v8006_v45 = vpop.f32.mrf.mxu0 }
 0x3b0   : > { %v3044_v39 = vsel %vm2944_vm2, %v9908_v34, -inf  ;;  %v9921_v36 = vadd.f32 %v8006_v45, %v9734_v44 }
 0x3b1   : > { %v2833_v7 = vpop.f32.mrf.mxu0  ;;  %3045 = vmax.xlane.f32.xlu1 %v3044_v39  ;;  %3048 = vmax.xlane.f32.xlu0 %v3047_v28 }
 0x3b2   : > { %v9918_v13 = vadd.f32 %v9734_v44, %v2833_v7  ;;  %v3059_v28 = vsel %vm2944_vm2, %v9921_v36, -inf }
 0x3b3   : > { %v8007_v20 = vpop.f32.mrf.mxu0 }
 0x3b4   : > { %v3053_v42 = vsel %vm2944_vm2, %v9918_v13, -inf  ;;  %v9931_v7 = vadd.f32 %v8007_v20, %v9734_v44 }
 0x3b5   : > { %v2836_v10 = vpop.f32.mrf.mxu0  ;;  %3051 = vmax.xlane.f32.xlu1 %v3050_v5  ;;  %3054 = vmax.xlane.f32.xlu0 %v3053_v42 }
 0x3b6   : > { %v9928_v9 = vadd.f32 %v9734_v44, %v2836_v10  ;;  %v3062_v20 = vsel %vm2944_vm2, %v9931_v7, -inf }
 0x3b7   : > { %v8010_v39 = vpop.f32.mrf.mxu0 }
 0x3b8   : > { %v3056_v45 = vsel %vm2944_vm2, %v9928_v9, -inf  ;;  %v9941_v10 = vadd.f32 %v8010_v39, %v9734_v44 }
 0x3b9   : > { %v2849_v49 = vpop.f32.mrf.mxu0  ;;  %3057 = vmax.xlane.f32.xlu1 %v3056_v45  ;;  %3060 = vmax.xlane.f32.xlu0 %v3059_v28 }
 0x3ba   : > { %v9938_v54 = vadd.f32 %v9734_v44, %v2849_v49  ;;  %v3071_v28 = vsel %vm2944_vm2, %v9941_v10, -inf }
 0x3bb   : > { %v8011_v5 = vpop.f32.mrf.mxu0 }
 0x3bc   : > { %v3065_v42 = vsel %vm2944_vm2, %v9938_v54, -inf  ;;  %v9951_v49 = vadd.f32 %v8011_v5, %v9734_v44 }
 0x3bd   : > { %v2852_v52 = vpop.f32.mrf.mxu0  ;;  %3063 = vmax.xlane.f32.xlu1 %v3062_v20  ;;  %3066 = vmax.xlane.f32.xlu0 %v3065_v42 }
 0x3be   : > { %v9948_v51 = vadd.f32 %v9734_v44, %v2852_v52  ;;  %v3074_v5 = vsel %vm2944_vm2, %v9951_v49, -inf }
 0x3bf   : > { %v8014_v45 = vpop.f32.mrf.mxu0 }
 0x3c0   : > { %v3068_v39 = vsel %vm2944_vm2, %v9948_v51, -inf  ;;  %v9961_v52 = vadd.f32 %v8014_v45, %v9734_v44 }
 0x3c1   : > { %v2865_v30 = vpop.f32.mrf.mxu0  ;;  %3069 = vmax.xlane.f32.xlu1 %v3068_v39  ;;  %3072 = vmax.xlane.f32.xlu0 %v3071_v28 }
 0x3c2   : > { %v9958_v35 = vadd.f32 %v9734_v44, %v2865_v30  ;;  %v3083_v28 = vsel %vm2944_vm2, %v9961_v52, -inf }
 0x3c3   : > { %v8015_v20 = vpop.f32.mrf.mxu0 }
 0x3c4   : > { %v3077_v42 = vsel %vm2944_vm2, %v9958_v35, -inf  ;;  %v9971_v30 = vadd.f32 %v8015_v20, %v9734_v44 }
 0x3c5   : > { %v2868_v33 = vpop.f32.mrf.mxu0  ;;  %3075 = vmax.xlane.f32.xlu1 %v3074_v5  ;;  %3078 = vmax.xlane.f32.xlu0 %v3077_v42 }
 0x3c6   : > { %v9968_v32 = vadd.f32 %v9734_v44, %v2868_v33  ;;  %v3086_v20 = vsel %vm2944_vm2, %v9971_v30, -inf }
 0x3c7   : > { %v8018_v39 = vpop.f32.mrf.mxu0 }
 0x3c8   : > { %v3080_v45 = vsel %vm2944_vm2, %v9968_v32, -inf  ;;  %v9981_v33 = vadd.f32 %v8018_v39, %v9734_v44 }
 0x3c9   : > { %v2881_v12 = vpop.f32.mrf.mxu0  ;;  %3081 = vmax.xlane.f32.xlu1 %v3080_v45  ;;  %3084 = vmax.xlane.f32.xlu0 %v3083_v28 }
 0x3ca   : > { %v9978_v17 = vadd.f32 %v9734_v44, %v2881_v12  ;;  %11645 = vst [vmem:[#allocation67_spill] sm:$0xff] %v9981_v33  ;;  %v3095_v28 = vsel %vm2944_vm2, %v9981_v33, -inf }
 0x3cb   : > { %v8019_v5 = vpop.f32.mrf.mxu0 }
 0x3cc   : > { %v3089_v42 = vsel %vm2944_vm2, %v9978_v17, -inf  ;;  %v9991_v12 = vadd.f32 %v8019_v5, %v9734_v44 }
 0x3cd   : > { %v2884_v15 = vpop.f32.mrf.mxu0  ;;  %3087 = vmax.xlane.f32.xlu1 %v3086_v20  ;;  %3090 = vmax.xlane.f32.xlu0 %v3089_v42 }
 0x3ce   : > { %v9988_v14 = vadd.f32 %v9734_v44, %v2884_v15  ;;  %11646 = vst [vmem:[#allocation68_spill] sm:$0xff] %v9991_v12  ;;  %v3098_v5 = vsel %vm2944_vm2, %v9991_v12, -inf }
 0x3cf   : > { %v8022_v45 = vpop.f32.mrf.mxu0 }
 0x3d0   : > { %v3092_v39 = vsel %vm2944_vm2, %v9988_v14, -inf  ;;  %v10001_v15 = vadd.f32 %v8022_v45, %v9734_v44 }
 0x3d1   : > { %v2897_v62 = vpop.f32.mrf.mxu0  ;;  %3093 = vmax.xlane.f32.xlu1 %v3092_v39  ;;  %3096 = vmax.xlane.f32.xlu0 %v3095_v28 }
 0x3d2   : > { %v9998_v57 = vadd.f32 %v9734_v44, %v2897_v62  ;;  %11648 = vst [vmem:[#allocation70_spill] sm:$0xff] %v10001_v15  ;;  %v3107_v28 = vsel %vm2944_vm2, %v10001_v15, -inf }
 0x3d3   : > { %v8023_v20 = vpop.f32.mrf.mxu0 }
 0x3d4   : > { %11647 = vst [vmem:[#allocation69_spill] sm:$0xff] %v9998_v57  ;;  %v3101_v42 = vsel %vm2944_vm2, %v9998_v57, -inf  ;;  %v10011_v62 = vadd.f32 %v8023_v20, %v9734_v44 }
 0x3d5   : > { %v2900_v59 = vpop.f32.mrf.mxu0  ;;  %3099 = vmax.xlane.f32.xlu1 %v3098_v5  ;;  %3102 = vmax.xlane.f32.xlu0 %v3101_v42 }
 0x3d6   : > { %v10008_v61 = vadd.f32 %v9734_v44, %v2900_v59  ;;  %11650 = vst [vmem:[#allocation72_spill] sm:$0xff] %v10011_v62  ;;  %v3110_v20 = vsel %vm2944_vm2, %v10011_v62, -inf }
 0x3d7   : > { %v8026_v39 = vpop.f32.mrf.mxu0 }
 0x3d8   : > { %11649 = vst [vmem:[#allocation71_spill] sm:$0xff] %v10008_v61  ;;  %v3104_v45 = vsel %vm2944_vm2, %v10008_v61, -inf  ;;  %v10021_v59 = vadd.f32 %v8026_v39, %v9734_v44 }
 0x3d9   : > { %v2913_v12 = vpop.f32.mrf.mxu0  ;;  %3105 = vmax.xlane.f32.xlu1 %v3104_v45  ;;  %3108 = vmax.xlane.f32.xlu0 %v3107_v28 }
 0x3da   : > { %v10018_v57 = vadd.f32 %v9734_v44, %v2913_v12  ;;  %11652 = vst [vmem:[#allocation74_spill] sm:$0xff] %v10021_v59  ;;  %v3119_v28 = vsel %vm2944_vm2, %v10021_v59, -inf }
 0x3db   : > { %v8027_v5 = vpop.f32.mrf.mxu0 }
 0x3dc   : > { %11651 = vst [vmem:[#allocation73_spill] sm:$0xff] %v10018_v57  ;;  %v3113_v42 = vsel %vm2944_vm2, %v10018_v57, -inf  ;;  %v10031_v12 = vadd.f32 %v8027_v5, %v9734_v44 }
 0x3dd   : > { %v2916_v61 = vpop.f32.mrf.mxu0  ;;  %3111 = vmax.xlane.f32.xlu1 %v3110_v20  ;;  %3114 = vmax.xlane.f32.xlu0 %v3113_v42 }
 0x3de   : > { %v10028_v15 = vadd.f32 %v9734_v44, %v2916_v61  ;;  %11654 = vst [vmem:[#allocation76_spill] sm:$0xff] %v10031_v12  ;;  %v3122_v5 = vsel %vm2944_vm2, %v10031_v12, -inf }
 0x3df   : > { %v8030_v45 = vpop.f32.mrf.mxu0 }
 0x3e0   : > { %11653 = vst [vmem:[#allocation75_spill] sm:$0xff] %v10028_v15  ;;  %v3116_v39 = vsel %vm2944_vm2, %v10028_v15, -inf  ;;  %v10041_v61 = vadd.f32 %v8030_v45, %v9734_v44 }
 0x3e1   : > { %v2929_v62 = vpop.f32.mrf.mxu0  ;;  %3117 = vmax.xlane.f32.xlu1 %v3116_v39  ;;  %3120 = vmax.xlane.f32.xlu0 %v3119_v28 }
 0x3e2   : > { %v10038_v57 = vadd.f32 %v9734_v44, %v2929_v62  ;;  %11656 = vst [vmem:[#allocation78_spill] sm:$0xff] %v10041_v61  ;;  %v3131_v45 = vsel %vm2944_vm2, %v10041_v61, -inf }
 0x3e3   : > { %v8031_v20 = vpop.f32.mrf.mxu0 }
 0x3e4   : > { %11655 = vst [vmem:[#allocation77_spill] sm:$0xff] %v10038_v57  ;;  %v3125_v42 = vsel %vm2944_vm2, %v10038_v57, -inf  ;;  %v10051_v39 = vadd.f32 %v8031_v20, %v9734_v44 }
 0x3e5   : > { %v2932_v15 = vpop.f32.mrf.mxu0  ;;  %3123 = vmax.xlane.f32.xlu1 %v3122_v5  ;;  %3126 = vmax.xlane.f32.xlu0 %v3125_v42 }
 0x3e6   : > { %v10048_v59 = vadd.f32 %v9734_v44, %v2932_v15  ;;  %v3134_v28 = vsel %vm2944_vm2, %v10051_v39, -inf }
 0x3e8   : > { %11657 = vst [vmem:[#allocation79_spill] sm:$0xff] %v10048_v59  ;;  %v3128_v62 = vsel %vm2944_vm2, %v10048_v59, -inf }
 0x3e9   : > { %3129 = vmax.xlane.f32.xlu1 %v3128_v62  ;;  %3132 = vmax.xlane.f32.xlu0 %v3131_v45 }
 0x3ed   : > { %3135 = vmax.xlane.f32.xlu1 %v3134_v28 }
 0x3f4   : > { %v2953_v5 = vpop.xlane.xlu1 %2952 }
 0x3f5   : > { %v3139_v42 = vsub.f32 %v9737_v47, %v2953_v5 }
 0x3f6   : > { %v2947_v15 = vpop.xlane.xlu0 %2946 }
 0x3f7   : > { %v3137_v57 = vsub.f32 %v9742_v26, %v2947_v15  ;;  %v3205_v44 = vmul.f32 1.442695, %v3139_v42  ;;  %v10067_v26 = vld [vmem:[%s11483_s12 + $0x10] ss:$0 sps:$4 sm:$0xff]  }
 0x3f8   : > { %v2956_v20 = vpop.xlane.xlu1 %2955  ;;  %8452 = vmatprep.subr.msk.bf16.mxu1 %vm4169_vm3, %v10067_v26 }
 0x3f9   : > { %v3201_v12 = vmul.f32 1.442695, %v3137_v57  ;;  %v3140_v59 = vsub.f32 %v9745_v46, %v2956_v20 }
 0x3fa   : > { %v2950_v33 = vpop.xlane.xlu0 %2949 }
 0x3fb   : > { %8513 = vpow2.f32 %v3201_v12  ;;  %v3207_v61 = vmul.f32 1.442695, %v3140_v59  ;;  %v3138_v62 = vsub.f32 %v9753_v48, %v2950_v33 }
 0x3fc   : > { %8515 = vpow2.f32 %v3205_v44 }
 0x3fd   : > { %8517 = vpow2.f32 %v3207_v61  ;;  %v3203_v45 = vmul.f32 1.442695, %v3138_v62 }
 0x3fe   : > { %v2959_v28 = vpop.xlane.xlu0 %2958 }
 0x3ff   : > { %8519 = vpow2.f32 %v3203_v45  ;;  %v3141_v47 = vsub.f32 %v9760_v23, %v2959_v28 }
 0x401   : > { %v3209_v57 = vmul.f32 1.442695, %v3141_v47 }
 0x402   : > { %v2962_v46 = vpop.xlane.xlu1 %2961  ;;  %v2965_v5 = vpop.xlane.xlu0 %2964 }
 0x403   : > { %8521 = vpow2.f32 %v3209_v57  ;;  %v3142_v48 = vsub.f32 %v9768_v3, %v2962_v46  ;;  %v3143_v33 = vsub.f32 %v9763_v19, %v2965_v5 }
 0x405   : > { %v3211_v59 = vmul.f32 1.442695, %v3142_v48  ;;  %v3213_v12 = vmul.f32 1.442695, %v3143_v33 }
 0x406   : > { %v2968_v23 = vpop.xlane.xlu1 %2967  ;;  %v2971_v61 = vpop.xlane.xlu0 %2970 }
 0x407   : > { %8523 = vpow2.f32 %v3211_v59  ;;  %v3144_v42 = vsub.f32 %v9771_v18, %v2968_v23  ;;  %v3145_v15 = vsub.f32 %v9778_v6, %v2971_v61 }
 0x408   : > { %v10075_v44 = vpop.eup %8513  ;;  %8525 = vpow2.f32 %v3213_v12 }
 0x409   : > { %v10077_v20 = vpop.eup %8515  ;;  %v3215_v62 = vmul.f32 1.442695, %v3144_v42  ;;  %v3217_v45 = vmul.f32 1.442695, %v3145_v15  ;;  %8042 = vmatprep.mubr.msk.f32.mxu0 %vm2944_vm2, %v10075_v44 }
 0x40a   : > { %v10081_v19 = vpop.eup %8517  ;;  %v2974_v3 = vpop.xlane.xlu1 %2973 }
 0x40b   : > { %v2977_v28 = vpop.xlane.xlu0 %2976  ;;  %8527 = vpow2.f32 %v3215_v62  ;;  %v3146_v18 = vsub.f32 %v9788_v11, %v2974_v3 }
 0x40c   : > { %v3147_v6 = vsub.f32 %v9781_v0, %v2977_v28  ;;  %v10087_v57 = vpop.eup %8519  ;;  %8529 = vpow2.f32 %v3217_v45 }
 0x40d   : > { %v3219_v46 = vmul.f32 1.442695, %v3146_v18  ;;  %8043 = vmatmul.mubr.msk.f32.vlgmr.msra.gmra.mxu0 %vm2944_vm2, %v10087_v57 }
 0x40e   : > { %v3221_v5 = vmul.f32 1.442695, %v3147_v6  ;;  %v2980_v33 = vpop.xlane.xlu1 %2979  ;;  %8045 = vmatprep.mubr.msk.f32.mxu0 %vm2944_vm2, %v10077_v20 }
 0x40f   : > { %v2983_v59 = vpop.xlane.xlu0 %2982  ;;  %8531 = vpow2.f32 %v3219_v46  ;;  %v3148_v11 = vsub.f32 %v9791_v4, %v2980_v33 }
 0x410   : > { %v3149_v0 = vsub.f32 %v9798_v8, %v2983_v59  ;;  %v10097_v12 = vpop.eup %8521  ;;  %8533 = vpow2.f32 %v3221_v5 }
 0x411   : > { %v3223_v23 = vmul.f32 1.442695, %v3148_v11  ;;  %8046 = vmatmul.mubr.msk.f32.gmra.mxu0 %vm2944_vm2, %v10081_v19 }
 0x412   : > { %v3225_v61 = vmul.f32 1.442695, %v3149_v0  ;;  %v2986_v42 = vpop.xlane.xlu1 %2985  ;;  %8048 = vmatprep.mubr.msk.f32.mxu0 %vm2944_vm2, %v10097_v12 }
 0x413   : > { %v2989_v15 = vpop.xlane.xlu0 %2988  ;;  %8535 = vpow2.f32 %v3223_v23  ;;  %v3150_v62 = vsub.f32 %v9808_v53, %v2986_v42 }
 0x414   : > { %v3151_v4 = vsub.f32 %v9801_v40, %v2989_v15  ;;  %v10105_v45 = vpop.eup %8523  ;;  %8537 = vpow2.f32 %v3225_v61 }
 0x415   : > { %v10107_v8 = vpop.eup %8525  ;;  %v3227_v3 = vmul.f32 1.442695, %v3150_v62  ;;  %8049 = vmatmul.mubr.msk.f32.gmra.mxu0 %vm2944_vm2, %v10105_v45 }
 0x416   : > { %v3229_v28 = vmul.f32 1.442695, %v3151_v4  ;;  %v2992_v6 = vpop.xlane.xlu1 %2991  ;;  %8051 = vmatprep.mubr.msk.f32.mxu0 %vm2944_vm2, %v10107_v8 }
 0x417   : > { %v2995_v53 = vpop.xlane.xlu0 %2994  ;;  %8539 = vpow2.f32 %v3227_v3  ;;  %v3152_v40 = vsub.f32 %v9811_v21, %v2992_v6 }
 0x418   : > { %v3153_v46 = vsub.f32 %v9818_v41, %v2995_v53  ;;  %v10117_v5 = vpop.eup %8527  ;;  %8541 = vpow2.f32 %v3229_v28 }
 0x419   : > { %v10119_v33 = vpop.eup %8529  ;;  %v3231_v59 = vmul.f32 1.442695, %v3152_v40  ;;  %8052 = vmatmul.mubr.msk.f32.gmra.mxu0 %vm2944_vm2, %v10117_v5 }
 0x41a   : > { %v3233_v11 = vmul.f32 1.442695, %v3153_v46  ;;  %v2998_v23 = vpop.xlane.xlu1 %2997  ;;  %8054 = vmatprep.mubr.msk.f32.mxu0 %vm2944_vm2, %v10119_v33 }
 0x41b   : > { %v3001_v21 = vpop.xlane.xlu0 %3000  ;;  %8543 = vpow2.f32 %v3231_v59  ;;  %v3154_v41 = vsub.f32 %v9828_v31, %v2998_v23 }
 0x41c   : > { %v3155_v61 = vsub.f32 %v9821_v43, %v3001_v21  ;;  %v10129_v42 = vpop.eup %8531  ;;  %8545 = vpow2.f32 %v3233_v11 }
 0x41d   : > { %v10131_v15 = vpop.eup %8533  ;;  %v3235_v62 = vmul.f32 1.442695, %v3154_v41  ;;  %8055 = vmatmul.mubr.msk.f32.gmra.mxu0 %vm2944_vm2, %v10129_v42 }
 0x41e   : > { %v3237_v4 = vmul.f32 1.442695, %v3155_v61  ;;  %v3004_v28 = vpop.xlane.xlu1 %3003  ;;  %8057 = vmatprep.mubr.msk.f32.mxu0 %vm2944_vm2, %v10131_v15 }
 0x41f   : > { %v3007_v31 = vpop.xlane.xlu0 %3006  ;;  %8547 = vpow2.f32 %v3235_v62  ;;  %v3156_v43 = vsub.f32 %v9831_v16, %v3004_v28 }
 0x420   : > { %v3157_v6 = vsub.f32 %v9838_v2, %v3007_v31  ;;  %v10141_v53 = vpop.eup %8535  ;;  %8549 = vpow2.f32 %v3237_v4 }
 0x421   : > { %v10143_v40 = vpop.eup %8537  ;;  %v3239_v46 = vmul.f32 1.442695, %v3156_v43  ;;  %8058 = vmatmul.mubr.msk.f32.gmra.mxu0 %vm2944_vm2, %v10141_v53 }
 0x422   : > { %v3241_v59 = vmul.f32 1.442695, %v3157_v6  ;;  %v3010_v23 = vpop.xlane.xlu1 %3009  ;;  %8060 = vmatprep.mubr.msk.f32.mxu0 %vm2944_vm2, %v10143_v40 }
 0x423   : > { %v3013_v16 = vpop.xlane.xlu0 %3012  ;;  %8551 = vpow2.f32 %v3239_v46  ;;  %v3158_v2 = vsub.f32 %v9848_v55, %v3010_v23 }
 0x424   : > { %v3159_v21 = vsub.f32 %v9841_v37, %v3013_v16  ;;  %v10153_v41 = vpop.eup %8539  ;;  %8553 = vpow2.f32 %v3241_v59  ;;  %v3975_v37 = vld [vmem:[%s11482_s11] sm:$0xf] }
 0x425   : > { %v10155_v61 = vpop.eup %8541  ;;  %v3243_v62 = vmul.f32 1.442695, %v3158_v2  ;;  %8061 = vmatmul.mubr.msk.f32.gmra.mxu0 %vm2944_vm2, %v10153_v41  ;;  %8138 = vmatprep.subr.msk.mxu0 %vm4169_vm3, %v3975_v37 }
 0x426   : > { %v3245_v4 = vmul.f32 1.442695, %v3159_v21  ;;  %v3016_v31 = vpop.xlane.xlu1 %3015  ;;  %8063 = vmatprep.mubr.msk.f32.mxu0 %vm2944_vm2, %v10155_v61  ;;  %8139 = vmatpush3.msk.msra.mxu0 %vm4169_vm3, %v3975_v37 }
 0x427   : > { %v3019_v55 = vpop.xlane.xlu0 %3018  ;;  %8555 = vpow2.f32 %v3243_v62  ;;  %v3160_v43 = vsub.f32 %v9851_v50, %v3016_v31 }
 0x428   : > { %v3161_v6 = vsub.f32 %v9858_v27, %v3019_v55  ;;  %v10169_v46 = vpop.eup %8543  ;;  %8557 = vpow2.f32 %v3245_v4 }
 0x429   : > { %v10172_v59 = vpop.eup %8545  ;;  %v3247_v23 = vmul.f32 1.442695, %v3160_v43  ;;  %8064 = vmatmul.mubr.msk.f32.gmra.mxu0 %vm2944_vm2, %v10169_v46 }
 0x42a   : > { %v3249_v16 = vmul.f32 1.442695, %v3161_v6  ;;  %v3022_v50 = vpop.xlane.xlu1 %3021  ;;  %8066 = vmatprep.mubr.msk.f32.mxu0 %vm2944_vm2, %v10172_v59 }
 0x42b   : > { %v3025_v27 = vpop.xlane.xlu0 %3024  ;;  %8559 = vpow2.f32 %v3247_v23  ;;  %v3162_v21 = vsub.f32 %v9868_v24, %v3022_v50 }
 0x42c   : > { %v3163_v62 = vsub.f32 %v9861_v58, %v3025_v27  ;;  %v10182_v4 = vpop.eup %8547  ;;  %8561 = vpow2.f32 %v3249_v16 }
 0x42d   : > { %v10184_v31 = vpop.eup %8549  ;;  %v3251_v55 = vmul.f32 1.442695, %v3162_v21  ;;  %8067 = vmatmul.mubr.msk.f32.gmra.mxu0 %vm2944_vm2, %v10182_v4 }
 0x42e   : > { %v3253_v37 = vmul.f32 1.442695, %v3163_v62  ;;  %v3028_v6 = vpop.xlane.xlu1 %3027  ;;  %8069 = vmatprep.mubr.msk.f32.mxu0 %vm2944_vm2, %v10184_v31 }
 0x42f   : > { %v3031_v24 = vpop.xlane.xlu0 %3030  ;;  %8563 = vpow2.f32 %v3251_v55  ;;  %v3164_v58 = vsub.f32 %v9871_v22, %v3028_v6 }
 0x430   : > { %v3165_v23 = vsub.f32 %v9878_v1, %v3031_v24  ;;  %v10194_v16 = vpop.eup %8551  ;;  %8565 = vpow2.f32 %v3253_v37 }
 0x431   : > { %v10196_v50 = vpop.eup %8553  ;;  %v3255_v27 = vmul.f32 1.442695, %v3164_v58  ;;  %8070 = vmatmul.mubr.msk.f32.gmra.mxu0 %vm2944_vm2, %v10194_v16 }
 0x432   : > { %v3257_v21 = vmul.f32 1.442695, %v3165_v23  ;;  %v3034_v43 = vpop.xlane.xlu1 %3033  ;;  %8072 = vmatprep.mubr.msk.f32.mxu0 %vm2944_vm2, %v10196_v50 }
 0x433   : > { %v3037_v22 = vpop.xlane.xlu0 %3036  ;;  %8567 = vpow2.f32 %v3255_v27  ;;  %v3166_v1 = vsub.f32 %v9888_v60, %v3034_v43 }
 0x434   : > { %v3167_v55 = vsub.f32 %v9881_v25, %v3037_v22  ;;  %v10206_v37 = vpop.eup %8555  ;;  %8569 = vpow2.f32 %v3257_v21 }
 0x435   : > { %v10208_v6 = vpop.eup %8557  ;;  %v3259_v24 = vmul.f32 1.442695, %v3166_v1  ;;  %8073 = vmatmul.mubr.msk.f32.gmra.mxu0 %vm2944_vm2, %v10206_v37 }
 0x436   : > { %v3261_v58 = vmul.f32 1.442695, %v3167_v55  ;;  %v3040_v62 = vpop.xlane.xlu1 %3039  ;;  %8075 = vmatprep.mubr.msk.f32.mxu0 %vm2944_vm2, %v10208_v6 }
 0x437   : > { %v3043_v60 = vpop.xlane.xlu0 %3042  ;;  %8571 = vpow2.f32 %v3259_v24  ;;  %v3168_v25 = vsub.f32 %v9891_v56, %v3040_v62 }
 0x438   : > { %v3169_v43 = vsub.f32 %v9898_v38, %v3043_v60  ;;  %v10218_v27 = vpop.eup %8559  ;;  %8573 = vpow2.f32 %v3261_v58 }
 0x439   : > { %v10220_v21 = vpop.eup %8561  ;;  %v3263_v22 = vmul.f32 1.442695, %v3168_v25  ;;  %8076 = vmatmul.mubr.msk.f32.gmra.mxu0 %vm2944_vm2, %v10218_v27 }
 0x43a   : > { %v3265_v1 = vmul.f32 1.442695, %v3169_v43  ;;  %v3046_v23 = vpop.xlane.xlu1 %3045  ;;  %8078 = vmatprep.mubr.msk.f32.mxu0 %vm2944_vm2, %v10220_v21 }
 0x43b   : > { %v3049_v56 = vpop.xlane.xlu0 %3048  ;;  %8575 = vpow2.f32 %v3263_v22  ;;  %v3170_v38 = vsub.f32 %v9908_v34, %v3046_v23 }
 0x43c   : > { %v3171_v62 = vsub.f32 %v9901_v63, %v3049_v56  ;;  %v10230_v24 = vpop.eup %8563  ;;  %8577 = vpow2.f32 %v3265_v1  ;;  %v4707_v1 = vsel %vm4169_vm3, %v10067_v26, 0  ;;  %v8507_v56 = vld [vmem:[%s11483_s12 + $0x8] sm:$0xff]  }
 0x43d   : > { %v10232_v58 = vpop.eup %8565  ;;  %v3267_v60 = vmul.f32 1.442695, %v3170_v38  ;;  %8079 = vmatmul.mubr.msk.f32.gmra.mxu0 %vm2944_vm2, %v10230_v24 }
 0x43e   : > { %v3269_v25 = vmul.f32 1.442695, %v3171_v62  ;;  %8081 = vmatprep.mubr.msk.f32.mxu1 %vm2944_vm2, %v10232_v58  ;;  %v3052_v22 = vpop.xlane.xlu1 %3051 }
 0x43f   : > { %v3055_v34 = vpop.xlane.xlu0 %3054  ;;  %8579 = vpow2.f32 %v3267_v60  ;;  %v3172_v63 = vsub.f32 %v9911_v29, %v3052_v22  ;;  %v8508_v22 = vld [vmem:[%s11483_s12] sm:$0xff]  }
 0x440   : > { %v3173_v23 = vsub.f32 %v9918_v13, %v3055_v34  ;;  %v10247_v38 = vpop.eup %8567  ;;  %8581 = vpow2.f32 %v3269_v25 }
 0x441   : > { %v10249_v62 = vpop.eup %8569  ;;  %v3271_v43 = vmul.f32 1.442695, %v3172_v63  ;;  %8082 = vmatmul.mubr.msk.f32.vlgmr.msra.gmra.mxu1 %vm2944_vm2, %v10247_v38 }
 0x442   : > { %v3273_v55 = vmul.f32 1.442695, %v3173_v23  ;;  %v3058_v29 = vpop.xlane.xlu1 %3057  ;;  %8084 = vmatprep.mubr.msk.f32.mxu1 %vm2944_vm2, %v10249_v62  ;;  %8237 = vmatpush3.bf16.msra.mxu1 %v4707_v1 }
 0x443   : > { %v3061_v26 = vpop.xlane.xlu0 %3060  ;;  %8583 = vpow2.f32 %v3271_v43  ;;  %v3174_v60 = vsub.f32 %v9928_v9, %v3058_v29  ;;  %8238 = vmatprep.subr.bf16.mxu1 %v8507_v56 }
 0x444   : > { %v3175_v25 = vsub.f32 %v9921_v36, %v3061_v26  ;;  %v10262_v34 = vpop.eup %8571  ;;  %8585 = vpow2.f32 %v3273_v55 }
 0x445   : > { %v10264_v63 = vpop.eup %8573  ;;  %v3275_v23 = vmul.f32 1.442695, %v3174_v60  ;;  %8085 = vmatmul.mubr.msk.f32.gmra.mxu1 %vm2944_vm2, %v10262_v34 }
 0x446   : > { %v3277_v13 = vmul.f32 1.442695, %v3175_v25  ;;  %v3064_v43 = vpop.xlane.xlu1 %3063  ;;  %8087 = vmatprep.mubr.msk.f32.mxu1 %vm2944_vm2, %v10264_v63  ;;  %8239 = vmatpush3.bf16.msra.mxu1 %v8507_v56 }
 0x447   : > { %v3067_v36 = vpop.xlane.xlu0 %3066  ;;  %8587 = vpow2.f32 %v3275_v23  ;;  %v3176_v1 = vsub.f32 %v9931_v7, %v3064_v43  ;;  %8240 = vmatprep.subr.bf16.mxu1 %v8508_v22 }
 0x448   : > { %v3177_v55 = vsub.f32 %v9938_v54, %v3067_v36  ;;  %v10274_v29 = vpop.eup %8575  ;;  %8589 = vpow2.f32 %v3277_v13 }
 0x449   : > { %v10276_v26 = vpop.eup %8577  ;;  %v3279_v60 = vmul.f32 1.442695, %v3176_v1  ;;  %8088 = vmatmul.mubr.msk.f32.gmra.mxu1 %vm2944_vm2, %v10274_v29 }
 0x44a   : > { %v3281_v25 = vmul.f32 1.442695, %v3177_v55  ;;  %v3070_v56 = vpop.xlane.xlu1 %3069  ;;  %8090 = vmatprep.mubr.msk.f32.mxu1 %vm2944_vm2, %v10276_v26  ;;  %8241 = vmatpush3.bf16.msra.mxu1 %v8508_v22 }
 0x44b   : > { %v3073_v7 = vpop.xlane.xlu0 %3072  ;;  %8591 = vpow2.f32 %v3279_v60  ;;  %v3178_v54 = vsub.f32 %v9948_v51, %v3070_v56 }
 0x44c   : > { %v3179_v13 = vsub.f32 %v9941_v10, %v3073_v7  ;;  %v10286_v23 = vpop.eup %8579  ;;  %8593 = vpow2.f32 %v3281_v25 }
 0x44d   : > { %v10288_v43 = vpop.eup %8581  ;;  %v3283_v36 = vmul.f32 1.442695, %v3178_v54  ;;  %8091 = vmatmul.mubr.msk.f32.gmra.mxu1 %vm2944_vm2, %v10286_v23 }
 0x44e   : > { %v3285_v1 = vmul.f32 1.442695, %v3179_v13  ;;  %v3076_v9 = vpop.xlane.xlu1 %3075  ;;  %8093 = vmatprep.mubr.msk.f32.mxu1 %vm2944_vm2, %v10288_v43 }
 0x44f   : > { %v3079_v51 = vpop.xlane.xlu0 %3078  ;;  %8595 = vpow2.f32 %v3283_v36  ;;  %v3180_v10 = vsub.f32 %v9951_v49, %v3076_v9 }
 0x450   : > { %v3181_v22 = vsub.f32 %v9958_v35, %v3079_v51  ;;  %v10298_v60 = vpop.eup %8583  ;;  %8597 = vpow2.f32 %v3285_v1 }
 0x451   : > { %v10300_v25 = vpop.eup %8585  ;;  %v3287_v56 = vmul.f32 1.442695, %v3180_v10  ;;  %8094 = vmatmul.mubr.msk.f32.gmra.mxu1 %vm2944_vm2, %v10298_v60 }
 0x452   : > { %v3289_v7 = vmul.f32 1.442695, %v3181_v22  ;;  %v3082_v13 = vpop.xlane.xlu1 %3081  ;;  %8096 = vmatprep.mubr.msk.f32.mxu1 %vm2944_vm2, %v10300_v25 }
 0x453   : > { %v3085_v49 = vpop.xlane.xlu0 %3084  ;;  %8599 = vpow2.f32 %v3287_v56  ;;  %v3182_v35 = vsub.f32 %v9968_v32, %v3082_v13 }
 0x454   : > { %v3183_v9 = vsub.f32 %v9961_v52, %v3085_v49  ;;  %v10310_v36 = vpop.eup %8587  ;;  %8601 = vpow2.f32 %v3289_v7 }
 0x455   : > { %v10312_v1 = vpop.eup %8589  ;;  %v3291_v51 = vmul.f32 1.442695, %v3182_v35  ;;  %8097 = vmatmul.mubr.msk.f32.gmra.mxu1 %vm2944_vm2, %v10310_v36 }
 0x456   : > { %v3293_v10 = vmul.f32 1.442695, %v3183_v9  ;;  %v3088_v54 = vpop.xlane.xlu1 %3087  ;;  %8099 = vmatprep.mubr.msk.f32.mxu1 %vm2944_vm2, %v10312_v1  ;;  %v11677_v9 = vpack.c.bf16 %v10081_v19, %v10077_v20  ;;  %v11681_v20 = vpack.c.bf16 %v10141_v53, %v10131_v15  ;;  %v11682_v19 = vpack.c.bf16 %v10153_v41, %v10143_v40 }
 0x457   : > { %v3091_v32 = vpop.xlane.xlu0 %3090  ;;  %8603 = vpow2.f32 %v3291_v51  ;;  %v3184_v52 = vsub.f32 %v9971_v30, %v3088_v54  ;;  %v11658_v54 = vld [vmem:[#allocation67_spill] sm:$0xff]  ;;  %v11690_v15 = vpack.c.bf16 %v10262_v34, %v10249_v62  ;;  %v11691_v53 = vpack.c.bf16 %v10274_v29, %v10264_v63 }
 0x458   : > { %v3185_v56 = vsub.f32 %v9978_v17, %v3091_v32  ;;  %v10322_v7 = vpop.eup %8591  ;;  %8605 = vpow2.f32 %v3293_v10  ;;  %v11692_v40 = vpack.c.bf16 %v10286_v23, %v10276_v26 }
 0x459   : > { %v10324_v13 = vpop.eup %8593  ;;  %v3295_v49 = vmul.f32 1.442695, %v3184_v52  ;;  %8100 = vmatmul.mubr.msk.f32.gmra.mxu1 %vm2944_vm2, %v10322_v7 }
 0x45a   : > { %v3297_v35 = vmul.f32 1.442695, %v3185_v56  ;;  %v3094_v22 = vpop.xlane.xlu1 %3093  ;;  %8102 = vmatprep.mubr.msk.f32.mxu1 %vm2944_vm2, %v10324_v13 }
 0x45b   : > { %v3097_v30 = vpop.xlane.xlu0 %3096  ;;  %8607 = vpow2.f32 %v3295_v49  ;;  %v3186_v17 = vsub.f32 %v9988_v14, %v3094_v22  ;;  %v11659_v22 = vld [vmem:[#allocation68_spill] sm:$0xff] }
 0x45c   : > { %v3187_v51 = vsub.f32 %v11658_v54, %v3097_v30  ;;  %v10334_v10 = vpop.eup %8595  ;;  %8609 = vpow2.f32 %v3297_v35  ;;  %v11660_v30 = vld [vmem:[#allocation69_spill] sm:$0xff] }
 0x45d   : > { %v10336_v32 = vpop.eup %8597  ;;  %v3299_v52 = vmul.f32 1.442695, %v3186_v17  ;;  %8103 = vmatmul.mubr.msk.f32.gmra.mxu1 %vm2944_vm2, %v10334_v10 }
 0x45e   : > { %v3301_v56 = vmul.f32 1.442695, %v3187_v51  ;;  %v3100_v55 = vpop.xlane.xlu1 %3099  ;;  %8105 = vmatprep.mubr.msk.f32.mxu1 %vm2944_vm2, %v10336_v32 }
 0x45f   : > { %v3103_v14 = vpop.xlane.xlu0 %3102  ;;  %8611 = vpow2.f32 %v3299_v52  ;;  %v3188_v49 = vsub.f32 %v11659_v22, %v3100_v55  ;;  %v11661_v52 = vld [vmem:[#allocation71_spill] sm:$0xff]  ;;  %v11662_v22 = vld [vmem:[#allocation70_spill] sm:$0xff] }
 0x460   : > { %v3189_v35 = vsub.f32 %v11660_v30, %v3103_v14  ;;  %v10346_v54 = vpop.eup %8599  ;;  %8613 = vpow2.f32 %v3301_v56 }
 0x461   : > { %v10348_v17 = vpop.eup %8601  ;;  %v3303_v51 = vmul.f32 1.442695, %v3188_v49  ;;  %8106 = vmatmul.mubr.msk.f32.gmra.mxu1 %vm2944_vm2, %v10346_v54  ;;  %v11697_v62 = vpack.c.bf16 %v10346_v54, %v10336_v32 }
 0x462   : > { %v3305_v2 = vmul.f32 1.442695, %v3189_v35  ;;  %v3106_v28 = vpop.xlane.xlu1 %3105  ;;  %8108 = vmatprep.mubr.msk.f32.mxu1 %vm2944_vm2, %v10348_v17 }
 0x463   : > { %v3109_v55 = vpop.xlane.xlu0 %3108  ;;  %8615 = vpow2.f32 %v3303_v51  ;;  %v3190_v14 = vsub.f32 %v11661_v52, %v3106_v28  ;;  %v11664_v51 = vld [vmem:[#allocation72_spill] sm:$0xff]  ;;  %v11665_v52 = vld [vmem:[#allocation73_spill] sm:$0xff] }
 0x464   : > { %v3191_v56 = vsub.f32 %v11662_v22, %v3109_v55  ;;  %v10358_v30 = vpop.eup %8603  ;;  %8617 = vpow2.f32 %v3305_v2 }
 0x465   : > { %v10360_v49 = vpop.eup %8605  ;;  %v3307_v35 = vmul.f32 1.442695, %v3190_v14  ;;  %8109 = vmatmul.mubr.msk.f32.gmra.mxu1 %vm2944_vm2, %v10358_v30  ;;  %v11698_v63 = vpack.c.bf16 %v10358_v30, %v10348_v17 }
 0x466   : > { %11663 = vst [vmem:[#allocation67_spill] sm:$0xff] %v10360_v49  ;;  %v3309_v11 = vmul.f32 1.442695, %v3191_v56  ;;  %v3112_v3 = vpop.xlane.xlu1 %3111  ;;  %8111 = vmatprep.mubr.msk.f32.mxu1 %vm2944_vm2, %v10360_v49 }
 0x467   : > { %v3115_v28 = vpop.xlane.xlu0 %3114  ;;  %8619 = vpow2.f32 %v3307_v35  ;;  %v3192_v55 = vsub.f32 %v11664_v51, %v3112_v3  ;;  %v11667_v35 = vld [vmem:[#allocation75_spill] sm:$0xff]  ;;  %v11668_v51 = vld [vmem:[#allocation74_spill] sm:$0xff] }
 0x468   : > { %v3193_v2 = vsub.f32 %v11665_v52, %v3115_v28  ;;  %v10370_v22 = vpop.eup %8607  ;;  %8621 = vpow2.f32 %v3309_v11 }
 0x469   : > { %v10372_v14 = vpop.eup %8609  ;;  %v3311_v56 = vmul.f32 1.442695, %v3192_v55  ;;  %8112 = vmatmul.mubr.msk.f32.gmra.mxu1 %vm2944_vm2, %v10370_v22 }
 0x46a   : > { %11666 = vst [vmem:[#allocation68_spill] sm:$0xff] %v10372_v14  ;;  %v3313_v0 = vmul.f32 1.442695, %v3193_v2  ;;  %v3118_v18 = vpop.xlane.xlu1 %3117  ;;  %8114 = vmatprep.mubr.msk.f32.mxu1 %vm2944_vm2, %v10372_v14 }
 0x46b   : > { %v3121_v3 = vpop.xlane.xlu0 %3120  ;;  %8623 = vpow2.f32 %v3311_v56  ;;  %v3194_v28 = vsub.f32 %v11667_v35, %v3118_v18  ;;  %v11671_v56 = vld [vmem:[#allocation76_spill] sm:$0xff]  ;;  %v11672_v35 = vld [vmem:[#allocation77_spill] sm:$0xff] }
 0x46c   : > { %v3195_v11 = vsub.f32 %v11668_v51, %v3121_v3  ;;  %v10382_v52 = vpop.eup %8611  ;;  %8625 = vpow2.f32 %v3313_v0 }
 0x46d   : > { %11669 = vst [vmem:[#allocation69_spill] sm:$0xff] %v10382_v52  ;;  %v10384_v55 = vpop.eup %8613  ;;  %v3315_v2 = vmul.f32 1.442695, %v3194_v28  ;;  %8115 = vmatmul.mubr.msk.f32.gmra.mxu1 %vm2944_vm2, %v10382_v52 }
 0x46e   : > { %11670 = vst [vmem:[#allocation71_spill] sm:$0xff] %v10384_v55  ;;  %v3317_v47 = vmul.f32 1.442695, %v3195_v11  ;;  %v3124_v48 = vpop.xlane.xlu1 %3123  ;;  %8117 = vmatprep.mubr.msk.f32.mxu1 %vm2944_vm2, %v10384_v55 }
 0x46f   : > { %v3127_v18 = vpop.xlane.xlu0 %3126  ;;  %8627 = vpow2.f32 %v3315_v2  ;;  %v3196_v3 = vsub.f32 %v11671_v56, %v3124_v48  ;;  %v11673_v2 = vld [vmem:[#allocation79_spill] sm:$0xff]  ;;  %v11674_v56 = vld [vmem:[#allocation78_spill] sm:$0xff] }
 0x470   : > { %v3197_v0 = vsub.f32 %v11672_v35, %v3127_v18  ;;  %v10394_v51 = vpop.eup %8615  ;;  %8629 = vpow2.f32 %v3317_v47 }
 0x471   : > { %v10396_v28 = vpop.eup %8617  ;;  %v3319_v11 = vmul.f32 1.442695, %v3196_v3  ;;  %8118 = vmatmul.mubr.msk.f32.gmra.mxu1 %vm2944_vm2, %v10394_v51 }
 0x472   : > { %v3321_v49 = vmul.f32 1.442695, %v3197_v0  ;;  %v3130_v14 = vpop.xlane.xlu1 %3129  ;;  %8120 = vmatprep.mubr.msk.f32.mxu1 %vm2944_vm2, %v10396_v28 }
 0x473   : > { %v3133_v48 = vpop.xlane.xlu0 %3132  ;;  %8631 = vpow2.f32 %v3319_v11  ;;  %v3198_v18 = vsub.f32 %v11673_v2, %v3130_v14  ;;  %v11676_v2 = vpack.c.bf16 %v10087_v57, %v10075_v44  ;;  %v11680_v44 = vpack.c.bf16 %v10129_v42, %v10119_v33 }
 0x474   : > { %v3199_v47 = vsub.f32 %v11674_v56, %v3133_v48  ;;  %v10406_v35 = vpop.eup %8619  ;;  %8633 = vpow2.f32 %v3321_v49  ;;  %v11683_v57 = vpack.c.bf16 %v10169_v46, %v10155_v61  ;;  %v11688_v33 = vpack.c.bf16 %v10230_v24, %v10220_v21 }
 0x475   : > { %v10408_v3 = vpop.eup %8621  ;;  %v3323_v0 = vmul.f32 1.442695, %v3198_v18  ;;  %8121 = vmatmul.mubr.msk.f32.gmra.mxu1 %vm2944_vm2, %v10406_v35  ;;  %v11689_v42 = vpack.c.bf16 %v10247_v38, %v10232_v58  ;;  %v11693_v61 = vpack.c.bf16 %v10298_v60, %v10288_v43  ;;  %v11694_v46 = vpack.c.bf16 %v10310_v36, %v10300_v25 }
 0x476   : > { %v3325_v52 = vmul.f32 1.442695, %v3199_v47  ;;  %v3136_v55 = vpop.xlane.xlu1 %3135  ;;  %8123 = vmatprep.mubr.msk.f32.mxu1 %vm2944_vm2, %v10408_v3 }
 0x477   : > { %8635 = vpow2.f32 %v3323_v0  ;;  %v3200_v14 = vsub.f32 %v10051_v39, %v3136_v55 }
 0x478   : > { %v10417_v11 = vpop.eup %8623  ;;  %8637 = vpow2.f32 %v3325_v52 }
 0x479   : > { %v10419_v49 = vpop.eup %8625  ;;  %v3327_v48 = vmul.f32 1.442695, %v3200_v14  ;;  %8124 = vmatmul.mubr.msk.f32.gmra.mxu1 %vm2944_vm2, %v10417_v11 }
 0x47a   : > { %8126 = vmatprep.mubr.msk.f32.mxu1 %vm2944_vm2, %v10419_v49 }
 0x47b   : > { %8639 = vpow2.f32 %v3327_v48  ;;  %v11678_v48 = vpack.c.bf16 %v10105_v45, %v10097_v12  ;;  %v11684_v12 = vpack.c.bf16 %v10182_v4, %v10172_v59  ;;  %v11685_v45 = vpack.c.bf16 %v10194_v16, %v10184_v31  ;;  %v8509_v4 = vld [vmem:[%s11485_s14 + $0x8] sm:$0xff]  }
 0x47c   : > { %v10427_v18 = vpop.eup %8627  ;;  %8306 = vmatprep.subr.bf16.mxu0 %v8509_v4 }
 0x47d   : > { %v10429_v56 = vpop.eup %8629  ;;  %8127 = vmatmul.mubr.msk.f32.gmra.mxu1 %vm2944_vm2, %v10427_v18 }
 0x47e   : > { %8129 = vmatprep.mubr.msk.f32.mxu1 %vm2944_vm2, %v10429_v56 }
 0x480   : > { %v10437_v52 = vpop.eup %8631 }
 0x481   : > { %v10439_v55 = vpop.eup %8633  ;;  %8130 = vmatmul.mubr.msk.f32.gmra.mxu1 %vm2944_vm2, %v10437_v52 }
 0x482   : > { %11675 = vst [vmem:[#allocation70_spill] sm:$0xff] %v10439_v55  ;;  %8132 = vmatprep.mubr.msk.f32.mxu1 %vm2944_vm2, %v10439_v55  ;;  %v11679_v55 = vpack.c.bf16 %v10117_v5, %v10107_v8  ;;  %v11686_v8 = vpack.c.bf16 %v10206_v37, %v10196_v50  ;;  %v11687_v5 = vpack.c.bf16 %v10218_v27, %v10208_v6 }
 0x483   : > { %v11695_v37 = vpack.c.bf16 %v10322_v7, %v10312_v1  ;;  %v11696_v6 = vpack.c.bf16 %v10334_v10, %v10324_v13  ;;  %v11699_v1 = vld [vmem:[#allocation67_spill] sm:$0xff]  ;;  %v11702_v10 = vld [vmem:[#allocation68_spill] sm:$0xff] }
 0x484   : > { %v10447_v0 = vpop.eup %8635  ;;  %v11700_v7 = vpack.c.bf16 %v10370_v22, %v11699_v1 }
 0x485   : > { %v10449_v14 = vpop.eup %8637  ;;  %8133 = vmatmul.mubr.msk.f32.gmra.mxu1 %vm2944_vm2, %v10447_v0 }
 0x486   : > { %8135 = vmatprep.mubr.msk.f32.mxu1 %vm2944_vm2, %v10449_v14 }
 0x488   : > { %v10457_v39 = vpop.eup %8639 }
 0x489   : > { %8136 = vmatmul.mubr.msk.f32.gmra.mxu1 %vm2944_vm2, %v10457_v39  ;;  %v4589_v47 = vpack.c.bf16 %v10457_v39, %v10449_v14 }
 0x48a   : > { %8242 = vmatprep.mubr.msk.bf16.mxu1 %vm2944_vm2, %v11676_v2 }
 0x48d   : > { %8243 = vmatmul.mubr.msk.bf16.vlgmr.msra.gmra.mxu1 %vm2944_vm2, %v11677_v9  ;;  %v11701_v9 = vld [vmem:[#allocation69_spill] sm:$0xff] }
 0x48e   : > { %8246 = vmatprep.mubr.msk.bf16.mxu1 %vm2944_vm2, %v11678_v48  ;;  %v11703_v32 = vpack.c.bf16 %v11701_v9, %v11702_v10 }
 0x495   : > { %8247 = vmatmul.mubr.msk.bf16.gmra.mxu1 %vm2944_vm2, %v11679_v55 }
 0x496   : > { %8250 = vmatprep.mubr.msk.bf16.mxu1 %vm2944_vm2, %v11680_v44  ;;  %v11704_v44 = vld [vmem:[#allocation71_spill] sm:$0xff] }
 0x49d   : > { %8251 = vmatmul.mubr.msk.bf16.gmra.mxu1 %vm2944_vm2, %v11681_v20  ;;  %v11705_v20 = vpack.c.bf16 %v10394_v51, %v11704_v44 }
 0x49e   : > { %8254 = vmatprep.mubr.msk.bf16.mxu1 %vm2944_vm2, %v11682_v19 }
 0x4a5   : > { %8255 = vmatmul.mubr.msk.bf16.gmra.mxu1 %vm2944_vm2, %v11683_v57  ;;  %v11706_v57 = vpack.c.bf16 %v10406_v35, %v10396_v28  ;;  %v11707_v28 = vpack.c.bf16 %v10417_v11, %v10408_v3 }
 0x4a6   : > { %8258 = vmatprep.mubr.msk.bf16.mxu1 %vm2944_vm2, %v11684_v12 }
 0x4ad   : > { %8259 = vmatmul.mubr.msk.bf16.gmra.mxu1 %vm2944_vm2, %v11685_v45 }
 0x4ae   : > { %8262 = vmatprep.mubr.msk.bf16.mxu1 %vm2944_vm2, %v11686_v8 }
 0x4b5   : > { %8263 = vmatmul.mubr.msk.bf16.gmra.mxu1 %vm2944_vm2, %v11687_v5 }
 0x4b6   : > { %8266 = vmatprep.mubr.msk.bf16.mxu1 %vm2944_vm2, %v11688_v33 }
 0x4bd   : > { %8267 = vmatmul.mubr.msk.bf16.gmra.mxu1 %vm2944_vm2, %v11689_v42 }
 0x4be   : > { %8270 = vmatprep.mubr.msk.bf16.mxu1 %vm2944_vm2, %v11690_v15  ;;  %v11708_v15 = vpack.c.bf16 %v10427_v18, %v10419_v49  ;;  %v11709_v49 = vpack.c.bf16 %v10437_v52, %v10429_v56 }
 0x4c5   : > { %8271 = vmatmul.mubr.msk.bf16.gmra.mxu1 %vm2944_vm2, %v11691_v53 }
 0x4c6   : > { %8274 = vmatprep.mubr.msk.bf16.mxu1 %vm2944_vm2, %v11692_v40 }
 0x4cd   : > { %v8044_v41 = vpop.f32.mrf.mxu0  ;;  %8275 = vmatmul.mubr.msk.bf16.gmra.mxu1 %vm2944_vm2, %v11693_v61 }
 0x4ce   : > { %8278 = vmatprep.mubr.msk.bf16.mxu1 %vm2944_vm2, %v11694_v46 }
 0x4cf   : > { %v3592_v59 = vpop.f32.mrf.mxu0 }
 0x4d0   : > { %8641 = vrcp.f32 %v3592_v59  ;;  %v11710_v59 = vld [vmem:[#allocation70_spill] sm:$0xff] }
 0x4d1   : > { %8643 = vrcp.f32 %v8044_v41  ;;  %v8047_v31 = vpop.f32.mrf.mxu0 }
 0x4d3   : > { %v3602_v16 = vpop.f32.mrf.mxu0 }
 0x4d4   : > { %8645 = vrcp.f32 %v3602_v16 }
 0x4d5   : > { %8647 = vrcp.f32 %v8047_v31  ;;  %v8050_v50 = vpop.f32.mrf.mxu0  ;;  %8279 = vmatmul.mubr.msk.bf16.gmra.mxu1 %vm2944_vm2, %v11695_v37 }
 0x4d6   : > { %8282 = vmatprep.mubr.msk.bf16.mxu1 %vm2944_vm2, %v11696_v6 }
 0x4d7   : > { %v3612_v27 = vpop.f32.mrf.mxu0 }
 0x4d8   : > { %8649 = vrcp.f32 %v3612_v27 }
 0x4d9   : > { %8651 = vrcp.f32 %v8050_v50  ;;  %v8053_v21 = vpop.f32.mrf.mxu0 }
 0x4db   : > { %v3622_v24 = vpop.f32.mrf.mxu0 }
 0x4dc   : > { %8653 = vrcp.f32 %v3622_v24 }
 0x4dd   : > { %v8642_v58 = vpop.eup %8641  ;;  %8655 = vrcp.f32 %v8053_v21  ;;  %v8056_v38 = vpop.f32.mrf.mxu0  ;;  %8283 = vmatmul.mubr.msk.bf16.gmra.mxu1 %vm2944_vm2, %v11697_v62 }
 0x4de   : > { %v8644_v34 = vpop.eup %8643  ;;  %8140 = vmatprep.mubr.msk.f32.mxu0 %vm3976_vm4, %v8642_v58  ;;  %8286 = vmatprep.mubr.msk.bf16.mxu1 %vm2944_vm2, %v11698_v63 }
 0x4df   : > { %v3632_v29 = vpop.f32.mrf.mxu0  ;;  %8141 = vmatmul.mubr.msk.f32.vlgmr.msra.gmra.mxu0 %vm3976_vm4, %v8644_v34  ;;  %v8510_v34 = vld [vmem:[%s11485_s14] sm:$0xff]  }
 0x4e0   : > { %8657 = vrcp.f32 %v3632_v29  ;;  %8307 = vmatpush3.bf16.msra.mxu0 %v8509_v4  ;;  %v11711_v4 = vpack.c.bf16 %v10447_v0, %v11710_v59 }
 0x4e1   : > { %v8646_v26 = vpop.eup %8645  ;;  %8659 = vrcp.f32 %v8056_v38  ;;  %v8059_v23 = vpop.f32.mrf.mxu0  ;;  %8308 = vmatprep.subr.bf16.mxu0 %v8510_v34 }
 0x4e2   : > { %v8648_v43 = vpop.eup %8647  ;;  %8143 = vmatprep.mubr.msk.f32.mxu0 %vm3976_vm4, %v8646_v26 }
 0x4e3   : > { %v3642_v60 = vpop.f32.mrf.mxu0  ;;  %8144 = vmatmul.mubr.msk.f32.gmra.mxu0 %vm3976_vm4, %v8648_v43 }
 0x4e4   : > { %8661 = vrcp.f32 %v3642_v60  ;;  %8309 = vmatpush3.bf16.msra.mxu0 %v8510_v34 }
 0x4e5   : > { %v8650_v25 = vpop.eup %8649  ;;  %8663 = vrcp.f32 %v8059_v23  ;;  %v8062_v36 = vpop.f32.mrf.mxu0  ;;  %8287 = vmatmul.mubr.msk.bf16.gmra.mxu1 %vm2944_vm2, %v11700_v7 }
 0x4e6   : > { %v8652_v13 = vpop.eup %8651  ;;  %8146 = vmatprep.mubr.msk.f32.mxu0 %vm3976_vm4, %v8650_v25  ;;  %8290 = vmatprep.mubr.msk.bf16.mxu1 %vm2944_vm2, %v11703_v32 }
 0x4e7   : > { %v3652_v54 = vpop.f32.mrf.mxu0  ;;  %8147 = vmatmul.mubr.msk.f32.gmra.mxu0 %vm3976_vm4, %v8652_v13 }
 0x4e8   : > { %8665 = vrcp.f32 %v3652_v54 }
 0x4e9   : > { %v8654_v17 = vpop.eup %8653  ;;  %8667 = vrcp.f32 %v8062_v36  ;;  %v8065_v30 = vpop.f32.mrf.mxu0 }
 0x4ea   : > { %v8656_v2 = vpop.eup %8655  ;;  %8149 = vmatprep.mubr.msk.f32.mxu0 %vm3976_vm4, %v8654_v17 }
 0x4eb   : > { %v3662_v22 = vpop.f32.mrf.mxu0  ;;  %8150 = vmatmul.mubr.msk.f32.gmra.mxu0 %vm3976_vm4, %v8656_v2 }
 0x4ec   : > { %8669 = vrcp.f32 %v3662_v22 }
 0x4ed   : > { %v8658_v55 = vpop.eup %8657  ;;  %8671 = vrcp.f32 %v8065_v30  ;;  %v8068_v48 = vpop.f32.mrf.mxu0  ;;  %8291 = vmatmul.mubr.msk.bf16.gmra.mxu1 %vm2944_vm2, %v11705_v20 }
 0x4ee   : > { %v8660_v19 = vpop.eup %8659  ;;  %8152 = vmatprep.mubr.msk.f32.mxu0 %vm3976_vm4, %v8658_v55  ;;  %8294 = vmatprep.mubr.msk.bf16.mxu1 %vm2944_vm2, %v11706_v57 }
 0x4ef   : > { %v3672_v12 = vpop.f32.mrf.mxu0  ;;  %8153 = vmatmul.mubr.msk.f32.gmra.mxu0 %vm3976_vm4, %v8660_v19 }
 0x4f0   : > { %8673 = vrcp.f32 %v3672_v12 }
 0x4f1   : > { %v8662_v45 = vpop.eup %8661  ;;  %8675 = vrcp.f32 %v8068_v48  ;;  %v8071_v8 = vpop.f32.mrf.mxu0 }
 0x4f2   : > { %v8664_v5 = vpop.eup %8663  ;;  %8155 = vmatprep.mubr.msk.f32.mxu0 %vm3976_vm4, %v8662_v45 }
 0x4f3   : > { %v3682_v51 = vpop.f32.mrf.mxu0  ;;  %8156 = vmatmul.mubr.msk.f32.gmra.mxu0 %vm3976_vm4, %v8664_v5 }
 0x4f4   : > { %8677 = vrcp.f32 %v3682_v51 }
 0x4f5   : > { %v8666_v33 = vpop.eup %8665  ;;  %8679 = vrcp.f32 %v8071_v8  ;;  %v8074_v42 = vpop.f32.mrf.mxu0  ;;  %8295 = vmatmul.mubr.msk.bf16.gmra.mxu1 %vm2944_vm2, %v11707_v28 }
 0x4f6   : > { %v8668_v35 = vpop.eup %8667  ;;  %8158 = vmatprep.mubr.msk.f32.mxu0 %vm3976_vm4, %v8666_v33  ;;  %8298 = vmatprep.mubr.msk.bf16.mxu1 %vm2944_vm2, %v11708_v15 }
 0x4f7   : > { %v3692_v53 = vpop.f32.mrf.mxu0  ;;  %8159 = vmatmul.mubr.msk.f32.gmra.mxu0 %vm3976_vm4, %v8668_v35 }
 0x4f8   : > { %8681 = vrcp.f32 %v3692_v53 }
 0x4f9   : > { %v8670_v40 = vpop.eup %8669  ;;  %8683 = vrcp.f32 %v8074_v42  ;;  %v8077_v41 = vpop.f32.mrf.mxu0 }
 0x4fa   : > { %v8672_v61 = vpop.eup %8671  ;;  %8161 = vmatprep.mubr.msk.f32.mxu0 %vm3976_vm4, %v8670_v40 }
 0x4fb   : > { %v3702_v3 = vpop.f32.mrf.mxu0  ;;  %8162 = vmatmul.mubr.msk.f32.gmra.mxu0 %vm3976_vm4, %v8672_v61 }
 0x4fc   : > { %8685 = vrcp.f32 %v3702_v3 }
 0x4fd   : > { %v8674_v11 = vpop.eup %8673  ;;  %8687 = vrcp.f32 %v8077_v41  ;;  %v8080_v46 = vpop.f32.mrf.mxu0  ;;  %8299 = vmatmul.mubr.msk.bf16.gmra.mxu1 %vm2944_vm2, %v11709_v49 }
 0x4fe   : > { %v8676_v18 = vpop.eup %8675  ;;  %8164 = vmatprep.mubr.msk.f32.mxu0 %vm3976_vm4, %v8674_v11  ;;  %8302 = vmatprep.mubr.msk.bf16.mxu1 %vm2944_vm2, %v11711_v4 }
 0x4ff   : > { %v3712_v31 = vpop.f32.mrf.mxu0  ;;  %8165 = vmatmul.mubr.msk.f32.gmra.mxu0 %vm3976_vm4, %v8676_v18 }
 0x500   : > { %8689 = vrcp.f32 %v3712_v31 }
 0x501   : > { %v8678_v16 = vpop.eup %8677  ;;  %8691 = vrcp.f32 %v8080_v46  ;;  %v8083_v50 = vpop.f32.mrf.mxu1 }
 0x502   : > { %v8680_v37 = vpop.eup %8679  ;;  %8167 = vmatprep.mubr.msk.f32.mxu0 %vm3976_vm4, %v8678_v16 }
 0x503   : > { %v3722_v56 = vpop.f32.mrf.mxu1  ;;  %8168 = vmatmul.mubr.msk.f32.gmra.mxu0 %vm3976_vm4, %v8680_v37 }
 0x504   : > { %8693 = vrcp.f32 %v3722_v56 }
 0x505   : > { %v8682_v52 = vpop.eup %8681  ;;  %8695 = vrcp.f32 %v8083_v50  ;;  %v8086_v6 = vpop.f32.mrf.mxu1  ;;  %8303 = vmatmul.mubr.msk.bf16.gmra.mxu1 %vm2944_vm2, %v4589_v47 }
 0x506   : > { %v8684_v0 = vpop.eup %8683  ;;  %8170 = vmatprep.mubr.msk.f32.mxu0 %vm3976_vm4, %v8682_v52 }
 0x507   : > { %v3732_v27 = vpop.f32.mrf.mxu1  ;;  %8171 = vmatmul.mubr.msk.f32.gmra.mxu0 %vm3976_vm4, %v8684_v0 }
 0x508   : > { %8697 = vrcp.f32 %v3732_v27 }
 0x509   : > { %v8686_v21 = vpop.eup %8685  ;;  %8699 = vrcp.f32 %v8086_v6  ;;  %v8089_v24 = vpop.f32.mrf.mxu1 }
 0x50a   : > { %v8688_v58 = vpop.eup %8687  ;;  %8173 = vmatprep.mubr.msk.f32.mxu0 %vm3976_vm4, %v8686_v21 }
 0x50b   : > { %v3742_v38 = vpop.f32.mrf.mxu1  ;;  %8174 = vmatmul.mubr.msk.f32.gmra.mxu0 %vm3976_vm4, %v8688_v58 }
 0x50c   : > { %8701 = vrcp.f32 %v3742_v38 }
 0x50d   : > { %v8690_v39 = vpop.eup %8689  ;;  %8703 = vrcp.f32 %v8089_v24  ;;  %v8092_v47 = vpop.f32.mrf.mxu1 }
 0x50e   : > { %v8692_v14 = vpop.eup %8691  ;;  %8176 = vmatprep.mubr.msk.f32.mxu0 %vm3976_vm4, %v8690_v39 }
 0x50f   : > { %v3752_v62 = vpop.f32.mrf.mxu1  ;;  %8177 = vmatmul.mubr.msk.f32.gmra.mxu0 %vm3976_vm4, %v8692_v14 }
 0x510   : > { %8705 = vrcp.f32 %v3752_v62 }
 0x511   : > { %v8694_v63 = vpop.eup %8693  ;;  %8707 = vrcp.f32 %v8092_v47  ;;  %v8095_v29 = vpop.f32.mrf.mxu1 }
 0x512   : > { %v8696_v26 = vpop.eup %8695  ;;  %8179 = vmatprep.mubr.msk.f32.mxu0 %vm3976_vm4, %v8694_v63 }
 0x513   : > { %v3762_v23 = vpop.f32.mrf.mxu1  ;;  %8180 = vmatmul.mubr.msk.f32.gmra.mxu0 %vm3976_vm4, %v8696_v26 }
 0x514   : > { %8709 = vrcp.f32 %v3762_v23 }
 0x515   : > { %v8698_v43 = vpop.eup %8697  ;;  %8711 = vrcp.f32 %v8095_v29  ;;  %v8098_v60 = vpop.f32.mrf.mxu1 }
 0x516   : > { %v8700_v25 = vpop.eup %8699  ;;  %8182 = vmatprep.mubr.msk.f32.mxu0 %vm3976_vm4, %v8698_v43 }
 0x517   : > { %v3772_v36 = vpop.f32.mrf.mxu1  ;;  %8183 = vmatmul.mubr.msk.f32.gmra.mxu0 %vm3976_vm4, %v8700_v25 }
 0x518   : > { %8713 = vrcp.f32 %v3772_v36 }
 0x519   : > { %v8702_v1 = vpop.eup %8701  ;;  %8715 = vrcp.f32 %v8098_v60  ;;  %v8101_v7 = vpop.f32.mrf.mxu1 }
 0x51a   : > { %v8704_v13 = vpop.eup %8703  ;;  %8185 = vmatprep.mubr.msk.f32.mxu0 %vm3976_vm4, %v8702_v1 }
 0x51b   : > { %v3782_v9 = vpop.f32.mrf.mxu1  ;;  %8186 = vmatmul.mubr.msk.f32.gmra.mxu0 %vm3976_vm4, %v8704_v13 }
 0x51c   : > { %8717 = vrcp.f32 %v3782_v9 }
 0x51d   : > { %v8706_v10 = vpop.eup %8705  ;;  %8719 = vrcp.f32 %v8101_v7  ;;  %v8104_v32 = vpop.f32.mrf.mxu1 }
 0x51e   : > { %v8708_v54 = vpop.eup %8707  ;;  %8188 = vmatprep.mubr.msk.f32.mxu0 %vm3976_vm4, %v8706_v10 }
 0x51f   : > { %v3792_v17 = vpop.f32.mrf.mxu1  ;;  %8189 = vmatmul.mubr.msk.f32.gmra.mxu0 %vm3976_vm4, %v8708_v54 }
 0x520   : > { %8721 = vrcp.f32 %v3792_v17 }
 0x521   : > { %v8710_v30 = vpop.eup %8709  ;;  %8723 = vrcp.f32 %v8104_v32  ;;  %v8107_v2 = vpop.f32.mrf.mxu1 }
 0x522   : > { %v8712_v22 = vpop.eup %8711  ;;  %8191 = vmatprep.mubr.msk.f32.mxu0 %vm3976_vm4, %v8710_v30 }
 0x523   : > { %v3802_v55 = vpop.f32.mrf.mxu1  ;;  %8192 = vmatmul.mubr.msk.f32.gmra.mxu0 %vm3976_vm4, %v8712_v22 }
 0x524   : > { %8725 = vrcp.f32 %v3802_v55 }
 0x525   : > { %v8714_v48 = vpop.eup %8713  ;;  %8727 = vrcp.f32 %v8107_v2  ;;  %v8110_v44 = vpop.f32.mrf.mxu1 }
 0x526   : > { %v8716_v20 = vpop.eup %8715  ;;  %8194 = vmatprep.mubr.msk.f32.mxu0 %vm3976_vm4, %v8714_v48 }
 0x527   : > { %v3812_v19 = vpop.f32.mrf.mxu1  ;;  %8195 = vmatmul.mubr.msk.f32.gmra.mxu0 %vm3976_vm4, %v8716_v20 }
 0x528   : > { %8729 = vrcp.f32 %v3812_v19 }
 0x529   : > { %v8718_v57 = vpop.eup %8717  ;;  %8731 = vrcp.f32 %v8110_v44  ;;  %v8113_v12 = vpop.f32.mrf.mxu1 }
 0x52a   : > { %v8720_v45 = vpop.eup %8719  ;;  %8197 = vmatprep.mubr.msk.f32.mxu0 %vm3976_vm4, %v8718_v57 }
 0x52b   : > { %v3822_v8 = vpop.f32.mrf.mxu1  ;;  %8198 = vmatmul.mubr.msk.f32.gmra.mxu0 %vm3976_vm4, %v8720_v45 }
 0x52c   : > { %8733 = vrcp.f32 %v3822_v8 }
 0x52d   : > { %v8722_v5 = vpop.eup %8721  ;;  %8735 = vrcp.f32 %v8113_v12  ;;  %v8116_v51 = vpop.f32.mrf.mxu1 }
 0x52e   : > { %v8724_v33 = vpop.eup %8723  ;;  %8200 = vmatprep.mubr.msk.f32.mxu0 %vm3976_vm4, %v8722_v5 }
 0x52f   : > { %v3832_v42 = vpop.f32.mrf.mxu1  ;;  %8201 = vmatmul.mubr.msk.f32.gmra.mxu0 %vm3976_vm4, %v8724_v33 }
 0x530   : > { %8737 = vrcp.f32 %v3832_v42 }
 0x531   : > { %v8726_v28 = vpop.eup %8725  ;;  %8739 = vrcp.f32 %v8116_v51  ;;  %v8119_v35 = vpop.f32.mrf.mxu1 }
 0x532   : > { %v8728_v15 = vpop.eup %8727  ;;  %8203 = vmatprep.mubr.msk.f32.mxu0 %vm3976_vm4, %v8726_v28 }
 0x533   : > { %v3842_v53 = vpop.f32.mrf.mxu1  ;;  %8204 = vmatmul.mubr.msk.f32.gmra.mxu0 %vm3976_vm4, %v8728_v15 }
 0x534   : > { %8741 = vrcp.f32 %v3842_v53 }
 0x535   : > { %v8730_v40 = vpop.eup %8729  ;;  %8743 = vrcp.f32 %v8119_v35  ;;  %v8122_v41 = vpop.f32.mrf.mxu1 }
 0x536   : > { %v8732_v61 = vpop.eup %8731  ;;  %8206 = vmatprep.mubr.msk.f32.mxu0 %vm3976_vm4, %v8730_v40 }
 0x537   : > { %v3852_v3 = vpop.f32.mrf.mxu1  ;;  %8207 = vmatmul.mubr.msk.f32.gmra.mxu0 %vm3976_vm4, %v8732_v61  ;;  %v10720_v61 = vld [vmem:[%s11484_s13] ss:$0 sm:$0xff] }
 0x538   : > { %8745 = vrcp.f32 %v3852_v3 }
 0x539   : > { %v8734_v11 = vpop.eup %8733  ;;  %8747 = vrcp.f32 %v8122_v41  ;;  %v8125_v46 = vpop.f32.mrf.mxu1 }
 0x53a   : > { %v8736_v49 = vpop.eup %8735  ;;  %8209 = vmatprep.mubr.msk.f32.mxu0 %vm3976_vm4, %v8734_v11 }
 0x53b   : > { %v3862_v18 = vpop.f32.mrf.mxu1  ;;  %8210 = vmatmul.mubr.msk.f32.gmra.mxu0 %vm3976_vm4, %v8736_v49 }
 0x53c   : > { %8749 = vrcp.f32 %v3862_v18 }
 0x53d   : > { %v8738_v59 = vpop.eup %8737  ;;  %8751 = vrcp.f32 %v8125_v46  ;;  %v8128_v4 = vpop.f32.mrf.mxu1 }
 0x53e   : > { %v8740_v31 = vpop.eup %8739  ;;  %8212 = vmatprep.mubr.msk.f32.mxu0 %vm3976_vm4, %v8738_v59 }
 0x53f   : > { %v3872_v16 = vpop.f32.mrf.mxu1  ;;  %8213 = vmatmul.mubr.msk.f32.gmra.mxu0 %vm3976_vm4, %v8740_v31 }
 0x540   : > { %8753 = vrcp.f32 %v3872_v16 }
 0x541   : > { %v8742_v50 = vpop.eup %8741  ;;  %8755 = vrcp.f32 %v8128_v4  ;;  %v8131_v37 = vpop.f32.mrf.mxu1 }
 0x542   : > { %v8744_v56 = vpop.eup %8743  ;;  %8215 = vmatprep.mubr.msk.f32.mxu0 %vm3976_vm4, %v8742_v50 }
 0x543   : > { %v3882_v52 = vpop.f32.mrf.mxu1  ;;  %8216 = vmatmul.mubr.msk.f32.gmra.mxu0 %vm3976_vm4, %v8744_v56 }
 0x544   : > { %8757 = vrcp.f32 %v3882_v52 }
 0x545   : > { %v8746_v6 = vpop.eup %8745  ;;  %8759 = vrcp.f32 %v8131_v37  ;;  %v8134_v0 = vpop.f32.mrf.mxu1 }
 0x546   : > { %v8748_v27 = vpop.eup %8747  ;;  %8218 = vmatprep.mubr.msk.f32.mxu0 %vm3976_vm4, %v8746_v6 }
 0x547   : > { %v3892_v21 = vpop.f32.mrf.mxu1  ;;  %8219 = vmatmul.mubr.msk.f32.gmra.mxu0 %vm3976_vm4, %v8748_v27 }
 0x548   : > { %8761 = vrcp.f32 %v3892_v21 }
 0x549   : > { %v8750_v24 = vpop.eup %8749  ;;  %8763 = vrcp.f32 %v8134_v0  ;;  %v8137_v58 = vpop.f32.mrf.mxu1 }
 0x54a   : > { %v8752_v38 = vpop.eup %8751  ;;  %8221 = vmatprep.mubr.msk.f32.mxu0 %vm3976_vm4, %v8750_v24 }
 0x54b   : > { %v3902_v39 = vpop.f32.mrf.mxu1  ;;  %8222 = vmatmul.mubr.msk.f32.gmra.mxu0 %vm3976_vm4, %v8752_v38 }
 0x54c   : > { %8765 = vrcp.f32 %v3902_v39 }
 0x54d   : > { %v8754_v47 = vpop.eup %8753  ;;  %8767 = vrcp.f32 %v8137_v58  ;;  %v10653_v14 = vpop.f32.mrf.mxu1 }
 0x54e   : > { %v8756_v62 = vpop.eup %8755  ;;  %8224 = vmatprep.mubr.msk.f32.mxu0 %vm3976_vm4, %v8754_v47 }
 0x54f   : > { %8225 = vmatmul.mubr.msk.f32.gmra.mxu0 %vm3976_vm4, %v8756_v62  ;;  %v4743_v34 = vpop.f32.mrf.mxu1 }
 0x551   : > { %v8758_v63 = vpop.eup %8757  ;;  %v8245_v29 = vpop.f32.mrf.mxu1 }
 0x552   : > { %v8760_v26 = vpop.eup %8759  ;;  %8227 = vmatprep.mubr.msk.f32.mxu0 %vm3976_vm4, %v8758_v63 }
 0x553   : > { %8228 = vmatmul.mubr.msk.f32.gmra.mxu0 %vm3976_vm4, %v8760_v26  ;;  %v4746_v23 = vpop.f32.mrf.mxu1 }
 0x555   : > { %v8762_v43 = vpop.eup %8761  ;;  %v10659_v60 = vpop.f32.mrf.mxu1 }
 0x556   : > { %v8764_v25 = vpop.eup %8763  ;;  %8230 = vmatprep.mubr.msk.f32.mxu0 %vm3976_vm4, %v8762_v43 }
 0x557   : > { %8231 = vmatmul.mubr.msk.f32.gmra.mxu0 %vm3976_vm4, %v8764_v25  ;;  %v4759_v36 = vpop.f32.mrf.mxu1 }
 0x559   : > { %v8766_v1 = vpop.eup %8765  ;;  %v10663_v7 = vpop.f32.mrf.mxu1 }
 0x55a   : > { %v8768_v13 = vpop.eup %8767  ;;  %8233 = vmatprep.mubr.msk.f32.mxu0 %vm3976_vm4, %v8766_v1 }
 0x55b   : > { %8234 = vmatmul.mubr.msk.f32.gmra.mxu0 %vm3976_vm4, %v8768_v13  ;;  %v4762_v9 = vpop.f32.mrf.mxu1 }
 0x55d   : > { %v10667_v10 = vpop.f32.mrf.mxu1 }
 0x55f   : > { %v10669_v32 = vpop.f32.mrf.mxu1 }
 0x561   : > { %v10671_v54 = vpop.f32.mrf.mxu1 }
 0x563   : > { %v10673_v17 = vpop.f32.mrf.mxu1 }
 0x565   : > { %v10675_v30 = vpop.f32.mrf.mxu1 }
 0x567   : > { %v10677_v2 = vpop.f32.mrf.mxu1 }
 0x569   : > { %v10679_v22 = vpop.f32.mrf.mxu1 }
 0x56b   : > { %v10681_v55 = vpop.f32.mrf.mxu1 }
 0x56d   : > { %v10683_v48 = vpop.f32.mrf.mxu1 }
 0x56f   : > { %v10685_v44 = vpop.f32.mrf.mxu1 }
 0x571   : > { %v10687_v20 = vpop.f32.mrf.mxu1 }
 0x573   : > { %v10689_v19 = vpop.f32.mrf.mxu1 }
 0x575   : > { %v10691_v57 = vpop.f32.mrf.mxu1 }
 0x577   : > { %v10693_v12 = vpop.f32.mrf.mxu1 }
 0x579   : > { %v10695_v45 = vpop.f32.mrf.mxu1 }
 0x57b   : > { %v10697_v8 = vpop.f32.mrf.mxu1 }
 0x57d   : > { %v10699_v5 = vpop.f32.mrf.mxu1 }
 0x57f   : > { %v10701_v51 = vpop.f32.mrf.mxu1 }
 0x581   : > { %v10703_v33 = vpop.f32.mrf.mxu1 }
 0x583   : > { %v10705_v42 = vpop.f32.mrf.mxu1 }
 0x585   : > { %v10707_v28 = vpop.f32.mrf.mxu1 }
 0x587   : > { %v10709_v35 = vpop.f32.mrf.mxu1 }
 0x589   : > { %v10711_v15 = vpop.f32.mrf.mxu1 }
 0x58b   : > { %v10713_v53 = vpop.f32.mrf.mxu1 }
 0x58d   : > { %v10715_v40 = vpop.f32.mrf.mxu1 }
 0x58f   : > { %v10722_v46 = vpop.f32.mrf.mxu1 }
 0x591   : > { %v10726_v37 = vpop.f32.mrf.mxu1 }
 0x593   : > { %v10731_v47 = vpop.f32.mrf.mxu1 }
 0x595   : > { %v10736_v13 = vpop.f32.mrf.mxu1 }
 0x59f   : > { %v8142_v41 = vpop.f32.mrf.mxu0 }
 0x5a0   : > { %v4999_v3 = vmul.f32 %v8142_v41, %v4746_v23 }
 0x5a1   : > { %v4239_v11 = vpop.f32.mrf.mxu0 }
 0x5a2   : > { %v5070_v49 = vadd.f32 %v10720_v61, %v4999_v3  ;;  %v4998_v18 = vmul.f32 %v4743_v34, %v4239_v11 }
 0x5a3   : > { %v8145_v59 = vpop.f32.mrf.mxu0 }
 0x5a4   : > { %v5134_v4 = vsub.f32 0.0, %v5070_v49  ;;  %v5069_v31 = vadd.f32 %v10720_v61, %v4998_v18  ;;  %v5001_v16 = vmul.f32 %v8245_v29, %v8145_v59 }
 0x5a5   : > { %v4249_v50 = vpop.f32.mrf.mxu0 }
 0x5a6   : > { %v5199_v56 = vmul.f32 1.442695, %v5134_v4  ;;  %v5133_v52 = vsub.f32 0.0, %v5069_v31  ;;  %v5072_v6 = vadd.f32 %v10720_v61, %v5001_v16  ;;  %v5000_v0 = vmul.f32 %v10653_v14, %v4249_v50  ;;  %v10742_v31 = vpop.f32.mrf.mxu1 }
 0x5a7   : > { %v8148_v27 = vpop.f32.mrf.mxu0 }
 0x5a8   : > { %8769 = vpow2.f32 %v5199_v56  ;;  %v5197_v21 = vmul.f32 1.442695, %v5133_v52  ;;  %v5136_v24 = vsub.f32 0.0, %v5072_v6  ;;  %v5071_v58 = vadd.f32 %v10720_v61, %v5000_v0 }
 0x5a9   : > { %v5003_v38 = vmul.f32 %v8148_v27, %v4762_v9  ;;  %v4259_v39 = vpop.f32.mrf.mxu0 }
 0x5aa   : > { %8771 = vpow2.f32 %v5197_v21  ;;  %v5203_v62 = vmul.f32 1.442695, %v5136_v24  ;;  %v5135_v34 = vsub.f32 0.0, %v5071_v58  ;;  %v5002_v63 = vmul.f32 %v4759_v36, %v4259_v39  ;;  %v10748_v58 = vpop.f32.mrf.mxu1 }
 0x5ab   : > { %v5074_v29 = vadd.f32 %v10720_v61, %v5003_v38  ;;  %v8151_v26 = vpop.f32.mrf.mxu0 }
 0x5ac   : > { %8773 = vpow2.f32 %v5203_v62  ;;  %v5201_v23 = vmul.f32 1.442695, %v5135_v34  ;;  %v5073_v14 = vadd.f32 %v10720_v61, %v5002_v63  ;;  %v5005_v43 = vmul.f32 %v10663_v7, %v8151_v26 }
 0x5ad   : > { %v5138_v25 = vsub.f32 0.0, %v5074_v29  ;;  %v4269_v1 = vpop.f32.mrf.mxu0 }
 0x5ae   : > { %8775 = vpow2.f32 %v5201_v23  ;;  %v5137_v9 = vsub.f32 0.0, %v5073_v14  ;;  %v5076_v41 = vadd.f32 %v10720_v61, %v5005_v43  ;;  %v5004_v3 = vmul.f32 %v10659_v60, %v4269_v1 }
 0x5af   : > { %v5207_v36 = vmul.f32 1.442695, %v5138_v25  ;;  %v8154_v11 = vpop.f32.mrf.mxu0 }
 0x5b0   : > { %v5205_v49 = vmul.f32 1.442695, %v5137_v9  ;;  %v5140_v18 = vsub.f32 0.0, %v5076_v41  ;;  %v5075_v59 = vadd.f32 %v10720_v61, %v5004_v3  ;;  %v5007_v4 = vmul.f32 %v8154_v11, %v10673_v17  ;;  %v10754_v9 = vpop.f32.mrf.mxu1 }
 0x5b1   : > { %8777 = vpow2.f32 %v5207_v36  ;;  %v4279_v7 = vpop.f32.mrf.mxu0 }
 0x5b2   : > { %8779 = vpow2.f32 %v5205_v49  ;;  %v5211_v16 = vmul.f32 1.442695, %v5140_v18  ;;  %v5139_v50 = vsub.f32 0.0, %v5075_v59  ;;  %v5078_v56 = vadd.f32 %v10720_v61, %v5007_v4 }
 0x5b3   : > { %v5006_v52 = vmul.f32 %v10669_v32, %v4279_v7  ;;  %v8157_v60 = vpop.f32.mrf.mxu0  ;;  %v8511_v7 = vld [vmem:[%s11487_s16 + $0x8] sm:$0xff]  }
 0x5b4   : > { %8781 = vpow2.f32 %v5211_v16  ;;  %v5209_v6 = vmul.f32 1.442695, %v5139_v50  ;;  %v5142_v0 = vsub.f32 0.0, %v5078_v56  ;;  %v5009_v27 = vmul.f32 %v10671_v54, %v8157_v60  ;;  %v10763_v60 = vpop.f32.mrf.mxu1  ;;  %8374 = vmatprep.subr.bf16.mxu1 %v8511_v7 }
 0x5b5   : > { %v8770_v21 = vpop.eup %8769  ;;  %v5077_v17 = vadd.f32 %v10720_v61, %v5006_v52  ;;  %v4289_v24 = vpop.f32.mrf.mxu0  ;;  %8375 = vmatpush3.bf16.msra.mxu1 %v8511_v7 }
 0x5b6   : > { %v5326_v38 = vadd.f32 1.0, %v8770_v21  ;;  %8783 = vpow2.f32 %v5209_v6  ;;  %v5215_v39 = vmul.f32 1.442695, %v5142_v0  ;;  %v5080_v62 = vadd.f32 %v10720_v61, %v5009_v27 }
 0x5b7   : > { %v8772_v34 = vpop.eup %8771  ;;  %v5141_v63 = vsub.f32 0.0, %v5077_v17  ;;  %v5008_v32 = vmul.f32 %v10667_v10, %v4289_v24  ;;  %v8160_v29 = vpop.f32.mrf.mxu0 }
 0x5b8   : > { %8785 = vrcp.f32 %v5326_v38  ;;  %v5325_v26 = vadd.f32 1.0, %v8772_v34  ;;  %v5144_v23 = vsub.f32 0.0, %v5080_v62  ;;  %v5011_v54 = vmul.f32 %v8160_v29, %v10681_v55  ;;  %v10769_v29 = vpop.f32.mrf.mxu1 }
 0x5b9   : > { %v8774_v14 = vpop.eup %8773  ;;  %8787 = vpow2.f32 %v5215_v39  ;;  %v5213_v43 = vmul.f32 1.442695, %v5141_v63  ;;  %v5079_v25 = vadd.f32 %v10720_v61, %v5008_v32  ;;  %v4299_v1 = vpop.f32.mrf.mxu0 }
 0x5ba   : > { %8789 = vrcp.f32 %v5325_v26  ;;  %v5328_v41 = vadd.f32 1.0, %v8774_v14  ;;  %v5219_v3 = vmul.f32 1.442695, %v5144_v23  ;;  %v5082_v36 = vadd.f32 %v10720_v61, %v5011_v54 }
 0x5bb   : > { %v8776_v10 = vpop.eup %8775  ;;  %8791 = vpow2.f32 %v5213_v43  ;;  %v5143_v11 = vsub.f32 0.0, %v5079_v25  ;;  %v5010_v49 = vmul.f32 %v10677_v2, %v4299_v1  ;;  %v8163_v18 = vpop.f32.mrf.mxu0 }
 0x5bc   : > { %8793 = vrcp.f32 %v5328_v41  ;;  %v5327_v55 = vadd.f32 1.0, %v8776_v10  ;;  %v5146_v59 = vsub.f32 0.0, %v5082_v36  ;;  %v5013_v4 = vmul.f32 %v10679_v22, %v8163_v18  ;;  %v10775_v18 = vpop.f32.mrf.mxu1 }
 0x5bd   : > { %8795 = vpow2.f32 %v5219_v3  ;;  %v5217_v16 = vmul.f32 1.442695, %v5143_v11  ;;  %v5081_v50 = vadd.f32 %v10720_v61, %v5010_v49  ;;  %v4309_v56 = vpop.f32.mrf.mxu0 }
 0x5be   : > { %v8778_v52 = vpop.eup %8777  ;;  %8797 = vrcp.f32 %v5327_v55  ;;  %v5223_v2 = vmul.f32 1.442695, %v5146_v59  ;;  %v5084_v6 = vadd.f32 %v10720_v61, %v5013_v4  ;;  %v5012_v0 = vmul.f32 %v10675_v30, %v4309_v56 }
 0x5bf   : > { %v8780_v22 = vpop.eup %8779  ;;  %v5330_v27 = vadd.f32 1.0, %v8778_v52  ;;  %8799 = vpow2.f32 %v5217_v16  ;;  %v5145_v21 = vsub.f32 0.0, %v5081_v50  ;;  %v8166_v17 = vpop.f32.mrf.mxu0 }
 0x5c0   : > { %v5329_v24 = vadd.f32 1.0, %v8780_v22  ;;  %8801 = vpow2.f32 %v5223_v2  ;;  %v5148_v38 = vsub.f32 0.0, %v5084_v6  ;;  %v5083_v39 = vadd.f32 %v10720_v61, %v5012_v0  ;;  %v11712_v6 = vld [vmem:[#allocation5_spill] sm:$0xff] }
 0x5c1   : > { %v8782_v62 = vpop.eup %8781  ;;  %8803 = vrcp.f32 %v5330_v27  ;;  %v5221_v34 = vmul.f32 1.442695, %v5145_v21  ;;  %v5015_v63 = vmul.f32 %v8166_v17, %v10689_v19  ;;  %v4319_v32 = vpop.f32.mrf.mxu0 }
 0x5c2   : > { %8805 = vrcp.f32 %v5329_v24  ;;  %v5332_v30 = vadd.f32 1.0, %v8782_v62  ;;  %v5227_v26 = vmul.f32 1.442695, %v5148_v38  ;;  %v5147_v23 = vsub.f32 0.0, %v5083_v39  ;;  %v11714_v39 = vld [vmem:[#allocation3_spill] sm:$0xff] }
 0x5c3   : > { %v8784_v54 = vpop.eup %8783  ;;  %8807 = vpow2.f32 %v5221_v34  ;;  %v5086_v14 = vadd.f32 %v10720_v61, %v5015_v63  ;;  %v5014_v43 = vmul.f32 %v10685_v44, %v4319_v32  ;;  %v8169_v25 = vpop.f32.mrf.mxu0 }
 0x5c4   : > { %8809 = vrcp.f32 %v5332_v30  ;;  %v5331_v1 = vadd.f32 1.0, %v8784_v54  ;;  %v5225_v41 = vmul.f32 1.442695, %v5147_v23  ;;  %v5017_v3 = vmul.f32 %v10687_v20, %v8169_v25  ;;  %v10784_v34 = vpop.f32.mrf.mxu1 }
 0x5c5   : > { %v8786_v19 = vpop.eup %8785  ;;  %8811 = vpow2.f32 %v5227_v26  ;;  %v5150_v36 = vsub.f32 0.0, %v5086_v14  ;;  %v5085_v10 = vadd.f32 %v10720_v61, %v5014_v43  ;;  %v4329_v11 = vpop.f32.mrf.mxu0  ;;  %v11715_v43 = vld [vmem:[#allocation6_spill] sm:$0xff] }
 0x5c6   : > { %v8788_v49 = vpop.eup %8787  ;;  %8813 = vrcp.f32 %v5331_v1  ;;  %v5088_v55 = vadd.f32 %v10720_v61, %v5017_v3  ;;  %v5016_v44 = vmul.f32 %v10683_v48, %v4329_v11  ;;  %v5454_v0 = vmul.f32 %v8786_v19, %v11712_v6  ;;  %v11713_v48 = vld [vmem:[#allocation4_spill] sm:$0xff] }
 0x5c7   : > { %v8790_v59 = vpop.eup %8789  ;;  %v5334_v4 = vadd.f32 1.0, %v8788_v49  ;;  %8815 = vpow2.f32 %v5225_v41  ;;  %v5231_v7 = vmul.f32 1.442695, %v5150_v36  ;;  %v5149_v16 = vsub.f32 0.0, %v5085_v10  ;;  %v8172_v20 = vpop.f32.mrf.mxu0 }
 0x5c8   : > { %v8792_v50 = vpop.eup %8791  ;;  %v5152_v56 = vsub.f32 0.0, %v5088_v55  ;;  %v5087_v52 = vadd.f32 %v10720_v61, %v5016_v44  ;;  %v5019_v2 = vmul.f32 %v8172_v20, %v10697_v8  ;;  %v5453_v24 = vmul.f32 %v8790_v59, %v11713_v48  ;;  %v10791_v55 = vpop.f32.mrf.mxu1 }
 0x5c9   : > { %v8794_v22 = vpop.eup %8793  ;;  %8817 = vrcp.f32 %v5334_v4  ;;  %v5333_v27 = vadd.f32 1.0, %v8792_v50  ;;  %v5229_v21 = vmul.f32 1.442695, %v5149_v16  ;;  %v4339_v17 = vpop.f32.mrf.mxu0 }
 0x5ca   : > { %v8796_v38 = vpop.eup %8795  ;;  %v5456_v62 = vmul.f32 %v8794_v22, %v11714_v39  ;;  %8819 = vpow2.f32 %v5231_v7  ;;  %v5235_v63 = vmul.f32 1.442695, %v5152_v56  ;;  %v5151_v32 = vsub.f32 0.0, %v5087_v52  ;;  %v10798_v48 = vpop.f32.mrf.mxu1 }
 0x5cb   : > { %v8798_v30 = vpop.eup %8797  ;;  %8821 = vrcp.f32 %v5333_v27  ;;  %v5336_v8 = vadd.f32 1.0, %v8796_v38  ;;  %v5090_v26 = vadd.f32 %v10720_v61, %v5019_v2  ;;  %v5018_v23 = vmul.f32 %v10693_v12, %v4339_v17  ;;  %v8175_v54 = vpop.f32.mrf.mxu0 }
 0x5cc   : > { %v8800_v14 = vpop.eup %8799  ;;  %v5455_v25 = vmul.f32 %v8798_v30, %v11715_v43  ;;  %8823 = vpow2.f32 %v5229_v21  ;;  %v5233_v1 = vmul.f32 1.442695, %v5151_v32  ;;  %v5021_v41 = vmul.f32 %v10695_v45, %v8175_v54  ;;  %v11716_v32 = vld [vmem:[#allocation8_spill] sm:$0xff] }
 0x5cd   : > { %v8802_v3 = vpop.eup %8801  ;;  %8825 = vrcp.f32 %v5336_v8  ;;  %v5335_v19 = vadd.f32 1.0, %v8800_v14  ;;  %v5154_v36 = vsub.f32 0.0, %v5090_v26  ;;  %v5089_v10 = vadd.f32 %v10720_v61, %v5018_v23  ;;  %v4349_v11 = vpop.f32.mrf.mxu0  ;;  %v8512_v8 = vld [vmem:[%s11487_s16] sm:$0xff]  }
 0x5ce   : > { %v8804_v49 = vpop.eup %8803  ;;  %v5338_v44 = vadd.f32 1.0, %v8802_v3  ;;  %8827 = vpow2.f32 %v5235_v63  ;;  %v5092_v12 = vadd.f32 %v10720_v61, %v5021_v41  ;;  %v5517_v59 = vpack.c.bf16 %v5454_v0, %v5453_v24  ;;  %8376 = vmatprep.subr.bf16.mxu1 %v8512_v8 }
 0x5cf   : > { %v8806_v4 = vpop.eup %8805  ;;  %8829 = vrcp.f32 %v5335_v19  ;;  %v5239_v7 = vmul.f32 1.442695, %v5154_v36  ;;  %v5153_v16 = vsub.f32 0.0, %v5089_v10  ;;  %v5020_v45 = vmul.f32 %v10691_v57, %v4349_v11  ;;  %v8178_v20 = vpop.f32.mrf.mxu0  ;;  %8377 = vmatpush3.bf16.msra.mxu1 %v8512_v8 }
 0x5d0   : > { %v8808_v50 = vpop.eup %8807  ;;  %8831 = vrcp.f32 %v5338_v44  ;;  %v5156_v56 = vsub.f32 0.0, %v5092_v12  ;;  %8310 = vmatprep.mubr.msk.bf16.mxu0 %vm1429_vm0, %v5517_v59  ;;  %v5023_v52 = vmul.f32 %v8178_v20, %v10705_v42  ;;  %v5518_v2 = vpack.c.bf16 %v5456_v62, %v5455_v25  ;;  %v11717_v25 = vld [vmem:[#allocation9_spill] sm:$0xff]  ;;  %v10810_v19 = vpop.f32.mrf.mxu1 }
 0x5d1   : > { %v8810_v6 = vpop.eup %8809  ;;  %v5337_v22 = vadd.f32 1.0, %v8808_v50  ;;  %8833 = vpow2.f32 %v5233_v1  ;;  %v5237_v27 = vmul.f32 1.442695, %v5153_v16  ;;  %v5091_v0 = vadd.f32 %v10720_v61, %v5020_v45  ;;  %v4359_v21 = vpop.f32.mrf.mxu0 }
 0x5d2   : > { %v8812_v17 = vpop.eup %8811  ;;  %8835 = vpow2.f32 %v5239_v7  ;;  %v5243_v57 = vmul.f32 1.442695, %v5156_v56  ;;  %v5094_v24 = vadd.f32 %v10720_v61, %v5023_v52  ;;  %8311 = vmatmul.mubr.msk.bf16.vlgmr.msra.gmra.mxu0 %vm1429_vm0, %v5518_v2  ;;  %v5022_v38 = vmul.f32 %v10701_v51, %v4359_v21  ;;  %v11719_v2 = vld [vmem:[#allocation7_spill] sm:$0xff] }
 0x5d3   : > { %v8814_v42 = vpop.eup %8813  ;;  %8837 = vrcp.f32 %v5337_v22  ;;  %v5340_v39 = vadd.f32 1.0, %v8812_v17  ;;  %v5155_v62 = vsub.f32 0.0, %v5091_v0  ;;  %v8181_v63 = vpop.f32.mrf.mxu0  ;;  %v5457_v30 = vmul.f32 %v8806_v4, %v11716_v32  ;;  %v11718_v4 = vld [vmem:[#allocation10_spill] sm:$0xff] }
 0x5d4   : > { %v8816_v26 = vpop.eup %8815  ;;  %8839 = vpow2.f32 %v5237_v27  ;;  %v5158_v23 = vsub.f32 0.0, %v5094_v24  ;;  %v5093_v54 = vadd.f32 %v10720_v61, %v5022_v38  ;;  %v5025_v14 = vmul.f32 %v10703_v33, %v8181_v63  ;;  %v10819_v0 = vpop.f32.mrf.mxu1 }
 0x5d5   : > { %8841 = vrcp.f32 %v5340_v39  ;;  %v5339_v51 = vadd.f32 1.0, %v8816_v26  ;;  %v5241_v43 = vmul.f32 1.442695, %v5155_v62  ;;  %v5458_v1 = vmul.f32 %v8804_v49, %v11717_v25  ;;  %v4369_v41 = vpop.f32.mrf.mxu0 }
 0x5d6   : > { %v8818_v3 = vpop.eup %8817  ;;  %8843 = vpow2.f32 %v5243_v57  ;;  %v5247_v36 = vmul.f32 1.442695, %v5158_v23  ;;  %v5157_v10 = vsub.f32 0.0, %v5093_v54  ;;  %v5096_v11 = vadd.f32 %v10720_v61, %v5025_v14 }
 0x5d7   : > { %v8820_v44 = vpop.eup %8819  ;;  %8845 = vrcp.f32 %v5339_v51  ;;  %v5519_v12 = vpack.c.bf16 %v5458_v1, %v5457_v30  ;;  %v5024_v33 = vmul.f32 %v10699_v5, %v4369_v41  ;;  %v8184_v59 = vpop.f32.mrf.mxu0  ;;  %v5459_v7 = vmul.f32 %v8814_v42, %v11718_v4  ;;  %v11721_v1 = vld [vmem:[#allocation13_spill] sm:$0xff] }
 0x5d8   : > { %v8822_v49 = vpop.eup %8821  ;;  %v5342_v16 = vadd.f32 1.0, %v8820_v44  ;;  %8847 = vpow2.f32 %v5241_v43  ;;  %v5245_v45 = vmul.f32 1.442695, %v5157_v10  ;;  %v5160_v20 = vsub.f32 0.0, %v5096_v11  ;;  %v10829_v51 = vpop.f32.mrf.mxu1 }
 0x5d9   : > { %v8824_v50 = vpop.eup %8823  ;;  %8849 = vpow2.f32 %v5247_v36  ;;  %8314 = vmatprep.mubr.msk.bf16.mxu0 %vm1429_vm0, %v5519_v12  ;;  %v5095_v56 = vadd.f32 %v10720_v61, %v5024_v33  ;;  %v5027_v52 = vmul.f32 %v8184_v59, %v10713_v53  ;;  %v5460_v22 = vmul.f32 %v8810_v6, %v11719_v2  ;;  %v4379_v27 = vpop.f32.mrf.mxu0 }
 0x5da   : > { %v8826_v5 = vpop.eup %8825  ;;  %8851 = vrcp.f32 %v5342_v16  ;;  %v5341_v21 = vadd.f32 1.0, %v8824_v50  ;;  %v5251_v17 = vmul.f32 1.442695, %v5160_v20  ;;  %v5026_v57 = vmul.f32 %v10709_v35, %v4379_v27  ;;  %v11720_v35 = vld [vmem:[#allocation12_spill] sm:$0xff]  ;;  %v11722_v20 = vld [vmem:[#allocation14_spill] sm:$0xff] }
 0x5db   : > { %v8828_v24 = vpop.eup %8827  ;;  %8853 = vpow2.f32 %v5245_v45  ;;  %v5159_v38 = vsub.f32 0.0, %v5095_v56  ;;  %v5098_v42 = vadd.f32 %v10720_v61, %v5027_v52  ;;  %v5520_v39 = vpack.c.bf16 %v5460_v22, %v5459_v7  ;;  %v8187_v62 = vpop.f32.mrf.mxu0  ;;  %v11723_v22 = vld [vmem:[#allocation11_spill] sm:$0xff] }
 0x5dc   : > { %v8830_v63 = vpop.eup %8829  ;;  %8855 = vrcp.f32 %v5341_v21  ;;  %v5344_v53 = vadd.f32 1.0, %v8828_v24  ;;  %v5097_v6 = vadd.f32 %v10720_v61, %v5026_v57  ;;  %v5029_v32 = vmul.f32 %v10711_v15, %v8187_v62  ;;  %v10839_v52 = vpop.f32.mrf.mxu1 }
 0x5dd   : > { %v10825_v30 = vpop.eup %8831  ;;  %8857 = vpow2.f32 %v5251_v17  ;;  %v5249_v8 = vmul.f32 1.442695, %v5159_v38  ;;  %v5162_v26 = vsub.f32 0.0, %v5098_v42  ;;  %8315 = vmatmul.mubr.msk.bf16.gmra.mxu0 %vm1429_vm0, %v5520_v39  ;;  %v5461_v23 = vmul.f32 %v8822_v49, %v11720_v35  ;;  %v4389_v54 = vpop.f32.mrf.mxu0 }
 0x5de   : > { %v8834_v14 = vpop.eup %8833  ;;  %8859 = vrcp.f32 %v5344_v53  ;;  %v5161_v43 = vsub.f32 0.0, %v5097_v6  ;;  %v5100_v25 = vadd.f32 %v10720_v61, %v5029_v32  ;;  %v5462_v41 = vmul.f32 %v8818_v3, %v11721_v1 }
 0x5df   : > { %v8836_v15 = vpop.eup %8835  ;;  %v5343_v36 = vadd.f32 1.0, %v8834_v14  ;;  %8861 = vpow2.f32 %v5249_v8  ;;  %v5255_v10 = vmul.f32 1.442695, %v5162_v26  ;;  %v5028_v11 = vmul.f32 %v10707_v28, %v4389_v54  ;;  %v8190_v44 = vpop.f32.mrf.mxu0 }
 0x5e0   : > { %v8838_v12 = vpop.eup %8837  ;;  %v5346_v33 = vadd.f32 1.0, %v8836_v15  ;;  %v5253_v59 = vmul.f32 1.442695, %v5161_v43  ;;  %v5164_v4 = vsub.f32 0.0, %v5100_v25  ;;  %v5521_v7 = vpack.c.bf16 %v5462_v41, %v5461_v23  ;;  %v10847_v26 = vpop.f32.mrf.mxu1  ;;  %v11724_v23 = vld [vmem:[#allocation16_spill] sm:$0xff] }
 0x5e1   : > { %v8840_v49 = vpop.eup %8839  ;;  %8863 = vrcp.f32 %v5343_v36  ;;  %v5099_v16 = vadd.f32 %v10720_v61, %v5028_v11  ;;  %v5031_v45 = vmul.f32 %v8190_v44, %v10731_v47  ;;  %v5463_v3 = vmul.f32 %v8830_v63, %v11722_v20  ;;  %v4399_v50 = vpop.f32.mrf.mxu0  ;;  %v11725_v36 = vld [vmem:[#allocation17_spill] sm:$0xff] }
 0x5e2   : > { %v10837_v56 = vpop.eup %8841  ;;  %8865 = vrcp.f32 %v5346_v33  ;;  %v5345_v28 = vadd.f32 1.0, %v8840_v49  ;;  %v5259_v2 = vmul.f32 1.442695, %v5164_v4  ;;  %8318 = vmatprep.mubr.msk.bf16.mxu0 %vm1429_vm0, %v5521_v7  ;;  %v5464_v27 = vmul.f32 %v8826_v5, %v11723_v22  ;;  %v10856_v49 = vpop.f32.mrf.mxu1 }
 0x5e3   : > { %v8844_v21 = vpop.eup %8843  ;;  %8867 = vpow2.f32 %v5255_v10  ;;  %v5163_v17 = vsub.f32 0.0, %v5099_v16  ;;  %v5102_v57 = vadd.f32 %v10720_v61, %v5031_v45  ;;  %v5030_v47 = vmul.f32 %v10722_v46, %v4399_v50  ;;  %v8193_v24 = vpop.f32.mrf.mxu0  ;;  %v11726_v50 = vld [vmem:[#allocation18_spill] sm:$0xff] }
 0x5e4   : > { %v8846_v38 = vpop.eup %8845  ;;  %8869 = vrcp.f32 %v5345_v28  ;;  %v5348_v42 = vadd.f32 1.0, %v8844_v21  ;;  %v5522_v39 = vpack.c.bf16 %v5464_v27, %v5463_v3  ;;  %v5033_v62 = vmul.f32 %v10726_v37, %v8193_v24  ;;  %v11727_v27 = vld [vmem:[#allocation15_spill] sm:$0xff] }
 0x5e5   : > { %v8848_v63 = vpop.eup %8847  ;;  %8871 = vpow2.f32 %v5253_v59  ;;  %v5257_v53 = vmul.f32 1.442695, %v5163_v17  ;;  %v5166_v6 = vsub.f32 0.0, %v5102_v57  ;;  %v5101_v5 = vadd.f32 %v10720_v61, %v5030_v47  ;;  %v4409_v32 = vpop.f32.mrf.mxu0 }
 0x5e6   : > { %v8850_v8 = vpop.eup %8849  ;;  %8873 = vrcp.f32 %v5348_v42  ;;  %v5347_v35 = vadd.f32 1.0, %v8848_v63  ;;  %8319 = vmatmul.mubr.msk.bf16.gmra.mxu0 %vm1429_vm0, %v5522_v39  ;;  %v5104_v46 = vadd.f32 %v10720_v61, %v5033_v62  ;;  %v5465_v54 = vmul.f32 %v8838_v12, %v11724_v23  ;;  %v10866_v62 = vpop.f32.mrf.mxu1 }
 0x5e7   : > { %v8852_v14 = vpop.eup %8851  ;;  %v5350_v37 = vadd.f32 1.0, %v8850_v8  ;;  %8875 = vpow2.f32 %v5259_v2  ;;  %v5263_v43 = vmul.f32 1.442695, %v5166_v6  ;;  %v5165_v25 = vsub.f32 0.0, %v5101_v5  ;;  %v8196_v1 = vpop.f32.mrf.mxu0 }
 0x5e8   : > { %v8854_v41 = vpop.eup %8853  ;;  %8877 = vrcp.f32 %v5347_v35  ;;  %v5168_v15 = vsub.f32 0.0, %v5104_v46  ;;  %v5466_v10 = vmul.f32 %v10825_v30, %v11725_v36  ;;  %v5032_v11 = vmul.f32 %v10715_v40, %v4409_v32  ;;  %v11729_v46 = vld [vmem:[#allocation21_spill] sm:$0xff]  ;;  %v10875_v36 = vpop.f32.mrf.mxu1 }
 0x5e9   : > { %v8856_v44 = vpop.eup %8855  ;;  %8879 = vrcp.f32 %v5350_v37  ;;  %v5349_v33 = vadd.f32 1.0, %v8854_v41  ;;  %v5261_v59 = vmul.f32 1.442695, %v5165_v25  ;;  %v5035_v12 = vmul.f32 %v8196_v1, %v10754_v9  ;;  %v4419_v4 = vpop.f32.mrf.mxu0 }
 0x5ea   : > { %v8858_v7 = vpop.eup %8857  ;;  %8881 = vpow2.f32 %v5257_v53  ;;  %v5267_v16 = vmul.f32 1.442695, %v5168_v15  ;;  %v5523_v45 = vpack.c.bf16 %v5466_v10, %v5465_v54  ;;  %v5103_v20 = vadd.f32 %v10720_v61, %v5032_v11 }
 0x5eb   : > { %v8860_v3 = vpop.eup %8859  ;;  %8883 = vrcp.f32 %v5349_v33  ;;  %v5352_v30 = vadd.f32 1.0, %v8858_v7  ;;  %v5106_v40 = vadd.f32 %v10720_v61, %v5035_v12  ;;  %v5467_v28 = vmul.f32 %v8846_v38, %v11726_v50  ;;  %v8199_v2 = vpop.f32.mrf.mxu0  ;;  %v11730_v7 = vld [vmem:[#allocation22_spill] sm:$0xff] }
 0x5ec   : > { %v8862_v22 = vpop.eup %8861  ;;  %8885 = vpow2.f32 %v5263_v43  ;;  %8322 = vmatprep.mubr.msk.bf16.mxu0 %vm1429_vm0, %v5523_v45  ;;  %v5167_v9 = vsub.f32 0.0, %v5103_v20  ;;  %v5468_v21 = vmul.f32 %v10837_v56, %v11727_v27  ;;  %v5034_v17 = vmul.f32 %v10742_v31, %v4419_v4  ;;  %v11728_v31 = vld [vmem:[#allocation20_spill] sm:$0xff]  ;;  %v11731_v45 = vld [vmem:[#allocation19_spill] sm:$0xff] }
 0x5ed   : > { %8887 = vrcp.f32 %v5352_v30  ;;  %v5351_v57 = vadd.f32 1.0, %v8862_v22  ;;  %v5170_v47 = vsub.f32 0.0, %v5106_v40  ;;  %v5037_v24 = vmul.f32 %v10748_v58, %v8199_v2  ;;  %v4429_v42 = vpop.f32.mrf.mxu0 }
 0x5ee   : > { %v8864_v39 = vpop.eup %8863  ;;  %8889 = vpow2.f32 %v5261_v59  ;;  %v5265_v38 = vmul.f32 1.442695, %v5167_v9  ;;  %v5524_v63 = vpack.c.bf16 %v5468_v21, %v5467_v28  ;;  %v5105_v53 = vadd.f32 %v10720_v61, %v5034_v17  ;;  %v10885_v9 = vpop.f32.mrf.mxu1 }
 0x5ef   : > { %v8866_v6 = vpop.eup %8865  ;;  %8891 = vrcp.f32 %v5351_v57  ;;  %v5271_v5 = vmul.f32 1.442695, %v5170_v47  ;;  %v5108_v56 = vadd.f32 %v10720_v61, %v5037_v24  ;;  %v5469_v32 = vmul.f32 %v8856_v44, %v11728_v31  ;;  %v8202_v8 = vpop.f32.mrf.mxu0  ;;  %v11732_v24 = vld [vmem:[#allocation24_spill] sm:$0xff] }
 0x5f0   : > { %v8868_v35 = vpop.eup %8867  ;;  %8893 = vpow2.f32 %v5267_v16  ;;  %8323 = vmatmul.mubr.msk.bf16.gmra.mxu0 %vm1429_vm0, %v5524_v63  ;;  %v5169_v58 = vsub.f32 0.0, %v5105_v53  ;;  %v5470_v23 = vmul.f32 %v8852_v14, %v11729_v46  ;;  %v5036_v54 = vmul.f32 %v10736_v13, %v4429_v42  ;;  %v11733_v53 = vld [vmem:[#allocation25_spill] sm:$0xff] }
 0x5f1   : > { %v8870_v37 = vpop.eup %8869  ;;  %v5354_v43 = vadd.f32 1.0, %v8868_v35  ;;  %8895 = vpow2.f32 %v5265_v38  ;;  %v5172_v25 = vsub.f32 0.0, %v5108_v56  ;;  %v5039_v1 = vmul.f32 %v8202_v8, %v10784_v34  ;;  %v4439_v41 = vpop.f32.mrf.mxu0 }
 0x5f2   : > { %v8872_v15 = vpop.eup %8871  ;;  %8897 = vpow2.f32 %v5271_v5  ;;  %v5269_v10 = vmul.f32 1.442695, %v5169_v58  ;;  %v5525_v11 = vpack.c.bf16 %v5470_v23, %v5469_v32  ;;  %v5107_v44 = vadd.f32 %v10720_v61, %v5036_v54  ;;  %v10897_v58 = vpop.f32.mrf.mxu1 }
 0x5f3   : > { %v8874_v33 = vpop.eup %8873  ;;  %8899 = vrcp.f32 %v5354_v43  ;;  %v5353_v14 = vadd.f32 1.0, %v8872_v15  ;;  %v5275_v59 = vmul.f32 1.442695, %v5172_v25  ;;  %v5110_v13 = vadd.f32 %v10720_v61, %v5039_v1  ;;  %v8205_v12 = vpop.f32.mrf.mxu0  ;;  %v11734_v1 = vld [vmem:[#allocation26_spill] sm:$0xff] }
 0x5f4   : > { %v8876_v4 = vpop.eup %8875  ;;  %8901 = vpow2.f32 %v5269_v10  ;;  %8326 = vmatprep.mubr.msk.bf16.mxu0 %vm1429_vm0, %v5525_v11  ;;  %v5171_v34 = vsub.f32 0.0, %v5107_v44  ;;  %v5471_v16 = vmul.f32 %v8864_v39, %v11730_v7  ;;  %v5472_v20 = vmul.f32 %v8860_v3, %v11731_v45  ;;  %v11735_v11 = vld [vmem:[#allocation23_spill] sm:$0xff]  ;;  %v10905_v7 = vpop.f32.mrf.mxu1 }
 0x5f5   : > { %v8878_v30 = vpop.eup %8877  ;;  %8903 = vrcp.f32 %v5353_v14  ;;  %v5356_v40 = vadd.f32 1.0, %v8876_v4  ;;  %v5174_v50 = vsub.f32 0.0, %v5110_v13  ;;  %v5038_v28 = vmul.f32 %v10769_v29, %v4439_v41  ;;  %v4449_v2 = vpop.f32.mrf.mxu0 }
 0x5f6   : > { %v10883_v22 = vpop.eup %8879  ;;  %8905 = vpow2.f32 %v5275_v59  ;;  %v5273_v27 = vmul.f32 1.442695, %v5171_v34  ;;  %v5526_v21 = vpack.c.bf16 %v5472_v20, %v5471_v16  ;;  %v5041_v17 = vmul.f32 %v10775_v18, %v8205_v12 }
 0x5f7   : > { %v8882_v57 = vpop.eup %8881  ;;  %8907 = vrcp.f32 %v5356_v40  ;;  %v5279_v47 = vmul.f32 1.442695, %v5174_v50  ;;  %v5109_v3 = vadd.f32 %v10720_v61, %v5038_v28  ;;  %v5473_v42 = vmul.f32 %v8870_v37, %v11732_v24  ;;  %v8208_v39 = vpop.f32.mrf.mxu0 }
 0x5f8   : > { %v8884_v38 = vpop.eup %8883  ;;  %v5355_v29 = vadd.f32 1.0, %v8882_v57  ;;  %8909 = vpow2.f32 %v5273_v27  ;;  %8327 = vmatmul.mubr.msk.bf16.gmra.mxu0 %vm1429_vm0, %v5526_v21  ;;  %v5112_v63 = vadd.f32 %v10720_v61, %v5041_v17  ;;  %v5474_v5 = vmul.f32 %v8866_v6, %v11733_v53  ;;  %v11736_v57 = vld [vmem:[#allocation28_spill] sm:$0xff] }
 0x5f9   : > { %v8886_v56 = vpop.eup %8885  ;;  %8911 = vpow2.f32 %v5279_v47  ;;  %v5173_v18 = vsub.f32 0.0, %v5109_v3  ;;  %v5040_v31 = vmul.f32 %v10763_v60, %v4449_v2  ;;  %v5043_v32 = vmul.f32 %v8208_v39, %v10819_v0  ;;  %v4459_v8 = vpop.f32.mrf.mxu0 }
 0x5fa   : > { %v10895_v35 = vpop.eup %8887  ;;  %8913 = vrcp.f32 %v5355_v29  ;;  %v5358_v46 = vadd.f32 1.0, %v8886_v56  ;;  %v5176_v23 = vsub.f32 0.0, %v5112_v63  ;;  %v5527_v54 = vpack.c.bf16 %v5474_v5, %v5473_v42  ;;  %v10915_v29 = vpop.f32.mrf.mxu1 }
 0x5fb   : > { %v8890_v37 = vpop.eup %8889  ;;  %v5277_v43 = vmul.f32 1.442695, %v5173_v18  ;;  %v5111_v6 = vadd.f32 %v10720_v61, %v5040_v31  ;;  %v5114_v25 = vadd.f32 %v10720_v61, %v5043_v32  ;;  %v5475_v41 = vmul.f32 %v8878_v30, %v11734_v1  ;;  %v8211_v60 = vpop.f32.mrf.mxu0 }
 0x5fc   : > { %v8892_v15 = vpop.eup %8891  ;;  %8915 = vrcp.f32 %v5358_v46  ;;  %v5357_v0 = vadd.f32 1.0, %v8890_v37  ;;  %v5283_v10 = vmul.f32 1.442695, %v5176_v23  ;;  %8330 = vmatprep.mubr.msk.bf16.mxu0 %vm1429_vm0, %v5527_v54  ;;  %v5476_v44 = vmul.f32 %v8874_v33, %v11735_v11  ;;  %v10925_v37 = vld [vmem:[%s11484_s13] ss:$0 sm:$0xff]  ;;  %v10929_v1 = vpop.f32.mrf.mxu1 }
 0x5fd   : > { %v8894_v14 = vpop.eup %8893  ;;  %8917 = vpow2.f32 %v5277_v43  ;;  %v5175_v59 = vsub.f32 0.0, %v5111_v6  ;;  %v5178_v13 = vsub.f32 0.0, %v5114_v25  ;;  %v5042_v12 = vmul.f32 %v10798_v48, %v4459_v8  ;;  %v4469_v4 = vpop.f32.mrf.mxu0 }
 0x5fe   : > { %v8896_v34 = vpop.eup %8895  ;;  %8919 = vrcp.f32 %v5357_v0  ;;  %v5360_v16 = vadd.f32 1.0, %v8894_v14  ;;  %v5528_v45 = vpack.c.bf16 %v5476_v44, %v5475_v41  ;;  %v5045_v20 = vmul.f32 %v10810_v19, %v8211_v60  ;;  %v11737_v19 = vld [vmem:[#allocation29_spill] sm:$0xff]  ;;  %v11739_v60 = vld [vmem:[#allocation27_spill] sm:$0xff] }
 0x5ff   : > { %v8898_v30 = vpop.eup %8897  ;;  %v5359_v40 = vadd.f32 1.0, %v8896_v34  ;;  %8921 = vpow2.f32 %v5283_v10  ;;  %v5281_v50 = vmul.f32 1.442695, %v5175_v59  ;;  %v5287_v33 = vmul.f32 1.442695, %v5178_v13  ;;  %v8214_v28 = vpop.f32.mrf.mxu0 }
 0x600   : > { %v8900_v2 = vpop.eup %8899  ;;  %8923 = vrcp.f32 %v5360_v16  ;;  %v5362_v27 = vadd.f32 1.0, %v8898_v30  ;;  %8331 = vmatmul.mubr.msk.bf16.gmra.mxu0 %vm1429_vm0, %v5528_v45  ;;  %v5113_v48 = vadd.f32 %v10720_v61, %v5042_v12  ;;  %v5116_v21 = vadd.f32 %v10720_v61, %v5045_v20  ;;  %v11740_v45 = vld [vmem:[#allocation32_spill] sm:$0xff] }
 0x601   : > { %v8902_v17 = vpop.eup %8901  ;;  %8925 = vrcp.f32 %v5359_v40  ;;  %v5477_v47 = vmul.f32 %v8884_v38, %v11736_v57  ;;  %v5478_v3 = vmul.f32 %v10883_v22, %v11737_v19  ;;  %v5044_v24 = vmul.f32 %v10791_v55, %v4469_v4  ;;  %v4479_v42 = vpop.f32.mrf.mxu0 }
 0x602   : > { %v8904_v39 = vpop.eup %8903  ;;  %8927 = vrcp.f32 %v5362_v27  ;;  %v5361_v63 = vadd.f32 1.0, %v8902_v17  ;;  %v5177_v53 = vsub.f32 0.0, %v5113_v48  ;;  %v5180_v5 = vsub.f32 0.0, %v5116_v21 }
 0x603   : > { %v8906_v56 = vpop.eup %8905  ;;  %8929 = vpow2.f32 %v5281_v50  ;;  %v5529_v18 = vpack.c.bf16 %v5478_v3, %v5477_v47  ;;  %v5115_v31 = vadd.f32 %v10720_v61, %v5044_v24  ;;  %v5047_v38 = vmul.f32 %v8214_v28, %v10856_v49  ;;  %v8217_v32 = vpop.f32.mrf.mxu0  ;;  %v11738_v49 = vld [vmem:[#allocation30_spill] sm:$0xff] }
 0x604   : > { %v10919_v8 = vpop.eup %8907  ;;  %8931 = vrcp.f32 %v5361_v63  ;;  %v5364_v55 = vadd.f32 1.0, %v8906_v56  ;;  %v5285_v22 = vmul.f32 1.442695, %v5177_v53  ;;  %v5291_v46 = vmul.f32 1.442695, %v5180_v5  ;;  %v4970_v50 = vpop.f32.mrf.mxu1 }
 0x605   : > { %v8910_v23 = vpop.eup %8909  ;;  %8933 = vpow2.f32 %v5287_v33  ;;  %8334 = vmatprep.mubr.msk.bf16.mxu0 %vm1429_vm0, %v5529_v18  ;;  %v5179_v54 = vsub.f32 0.0, %v5115_v31  ;;  %v5118_v61 = vadd.f32 %v10925_v37, %v5047_v38  ;;  %v5479_v43 = vmul.f32 %v8892_v15, %v11738_v49  ;;  %v4489_v6 = vpop.f32.mrf.mxu0  ;;  %v11743_v31 = vld [vmem:[#allocation31_spill] sm:$0xff] }
 0x606   : > { %v8912_v25 = vpop.eup %8911  ;;  %8935 = vrcp.f32 %v5364_v55  ;;  %v5363_v41 = vadd.f32 1.0, %v8910_v23  ;;  %v5480_v0 = vmul.f32 %v10895_v35, %v11739_v60  ;;  %v5046_v10 = vmul.f32 %v10839_v52, %v4479_v42  ;;  %v11741_v35 = vld [vmem:[#allocation33_spill] sm:$0xff]  ;;  %v10946_v56 = vpop.f32.mrf.mxu1 }
 0x607   : > { %v8914_v11 = vpop.eup %8913  ;;  %v5366_v44 = vadd.f32 1.0, %v8912_v25  ;;  %8937 = vpow2.f32 %v5285_v22  ;;  %v5289_v14 = vmul.f32 1.442695, %v5179_v54  ;;  %v5182_v59 = vsub.f32 0.0, %v5118_v61  ;;  %v8220_v13 = vpop.f32.mrf.mxu0 }
 0x608   : > { %8939 = vrcp.f32 %v5363_v41  ;;  %v5530_v12 = vpack.c.bf16 %v5480_v0, %v5479_v43  ;;  %v5117_v15 = vadd.f32 %v10925_v37, %v5046_v10  ;;  %v5049_v4 = vmul.f32 %v10847_v26, %v8217_v32  ;;  %v11744_v43 = vld [vmem:[#allocation36_spill] sm:$0xff] }
 0x609   : > { %v8916_v34 = vpop.eup %8915  ;;  %8941 = vrcp.f32 %v5366_v44  ;;  %v5295_v16 = vmul.f32 1.442695, %v5182_v59  ;;  %v5481_v20 = vmul.f32 %v8904_v39, %v11740_v45  ;;  %v5482_v30 = vmul.f32 %v8900_v2, %v11741_v35  ;;  %v4499_v52 = vpop.f32.mrf.mxu0  ;;  %v11742_v39 = vld [vmem:[#allocation34_spill] sm:$0xff] }
 0x60a   : > { %v8918_v40 = vpop.eup %8917  ;;  %8943 = vpow2.f32 %v5291_v46  ;;  %8335 = vmatmul.mubr.msk.bf16.gmra.mxu0 %vm1429_vm0, %v5530_v12  ;;  %v5181_v33 = vsub.f32 0.0, %v5117_v15  ;;  %v5120_v28 = vadd.f32 %v10925_v37, %v5049_v4  ;;  %v5048_v27 = vmul.f32 %v10829_v51, %v4489_v6  ;;  %v10957_v44 = vpop.f32.mrf.mxu1 }
 0x60b   : > { %v8920_v48 = vpop.eup %8919  ;;  %v5365_v26 = vadd.f32 1.0, %v8918_v40  ;;  %8945 = vpow2.f32 %v5289_v14  ;;  %v5531_v21 = vpack.c.bf16 %v5482_v30, %v5481_v20  ;;  %v5051_v17 = vmul.f32 %v8220_v13, %v10897_v58  ;;  %v8223_v57 = vpop.f32.mrf.mxu0 }
 0x60c   : > { %v8922_v47 = vpop.eup %8921  ;;  %8947 = vpow2.f32 %v5295_v16  ;;  %v5293_v2 = vmul.f32 1.442695, %v5181_v33  ;;  %v5184_v19 = vsub.f32 0.0, %v5120_v28  ;;  %v5119_v3 = vadd.f32 %v10925_v37, %v5048_v27  ;;  %v8305_v28 = vpop.f32.mrf.mxu1 }
 0x60d   : > { %v8924_v24 = vpop.eup %8923  ;;  %8949 = vrcp.f32 %v5365_v26  ;;  %v5368_v42 = vadd.f32 1.0, %v8922_v47  ;;  %8338 = vmatprep.mubr.msk.bf16.mxu0 %vm1429_vm0, %v5531_v21  ;;  %v5122_v51 = vadd.f32 %v10925_v37, %v5051_v17  ;;  %v5483_v63 = vmul.f32 %v8914_v11, %v11742_v39  ;;  %v4509_v53 = vpop.f32.mrf.mxu0  ;;  %v11746_v26 = vld [vmem:[#allocation38_spill] sm:$0xff]  ;;  %v11747_v17 = vld [vmem:[#allocation35_spill] sm:$0xff] }
 0x60e   : > { %v8926_v5 = vpop.eup %8925  ;;  %8951 = vpow2.f32 %v5293_v2  ;;  %v5299_v58 = vmul.f32 1.442695, %v5184_v19  ;;  %v5183_v18 = vsub.f32 0.0, %v5119_v3  ;;  %v5484_v38 = vmul.f32 %v10919_v8, %v11743_v31  ;;  %v11748_v3 = vld [vmem:[#allocation40_spill] sm:$0xff] }
 0x60f   : > { %v10950_v32 = vpop.eup %8927  ;;  %8953 = vrcp.f32 %v5368_v42  ;;  %v5186_v55 = vsub.f32 0.0, %v5122_v51  ;;  %v5050_v22 = vmul.f32 %v10875_v36, %v4499_v52  ;;  %v5053_v46 = vmul.f32 %v10885_v9, %v8223_v57  ;;  %v8226_v23 = vpop.f32.mrf.mxu0  ;;  %v11745_v36 = vld [vmem:[#allocation37_spill] sm:$0xff] }
 0x610   : > { %v8930_v54 = vpop.eup %8929  ;;  %8955 = vpow2.f32 %v5299_v58  ;;  %v5297_v61 = vmul.f32 1.442695, %v5183_v18  ;;  %v5532_v49 = vpack.c.bf16 %v5484_v38, %v5483_v63  ;;  %v5485_v6 = vmul.f32 %v8920_v48, %v11744_v43 }
 0x611   : > { %v8932_v25 = vpop.eup %8931  ;;  %v5367_v41 = vadd.f32 1.0, %v8930_v54  ;;  %v5303_v60 = vmul.f32 1.442695, %v5186_v55  ;;  %v5121_v8 = vadd.f32 %v10925_v37, %v5050_v22  ;;  %v5124_v0 = vadd.f32 %v10925_v37, %v5053_v46  ;;  %v4519_v10 = vpop.f32.mrf.mxu0  ;;  %v11749_v46 = vld [vmem:[#allocation41_spill] sm:$0xff] }
 0x612   : > { %v8934_v11 = vpop.eup %8933  ;;  %8957 = vpow2.f32 %v5297_v61  ;;  %8339 = vmatmul.mubr.msk.bf16.gmra.mxu0 %vm1429_vm0, %v5532_v49  ;;  %v5486_v9 = vmul.f32 %v8916_v34, %v11745_v36  ;;  %v5052_v14 = vmul.f32 %v10866_v62, %v4509_v53  ;;  %v5055_v59 = vmul.f32 %v8226_v23, %v4970_v50  ;;  %v4986_v22 = vpop.f32.mrf.mxu1 }
 0x613   : > { %v10962_v13 = vpop.eup %8935  ;;  %8959 = vrcp.f32 %v5367_v41  ;;  %v5370_v12 = vadd.f32 1.0, %v8934_v11  ;;  %v5185_v15 = vsub.f32 0.0, %v5121_v8  ;;  %v5188_v4 = vsub.f32 0.0, %v5124_v0  ;;  %v8229_v16 = vpop.f32.mrf.mxu0 }
 0x614   : > { %v8938_v45 = vpop.eup %8937  ;;  %8961 = vpow2.f32 %v5303_v60  ;;  %v5533_v20 = vpack.c.bf16 %v5486_v9, %v5485_v6  ;;  %v5123_v35 = vadd.f32 %v10925_v37, %v5052_v14  ;;  %v5126_v30 = vadd.f32 %v10925_v37, %v5055_v59 }
 0x615   : > { %v8940_v52 = vpop.eup %8939  ;;  %8963 = vrcp.f32 %v5370_v12  ;;  %v5369_v34 = vadd.f32 1.0, %v8938_v45  ;;  %v5301_v40 = vmul.f32 1.442695, %v5185_v15  ;;  %v5307_v62 = vmul.f32 1.442695, %v5188_v4  ;;  %v4529_v50 = vpop.f32.mrf.mxu0  ;;  %v11751_v4 = vld [vmem:[#allocation39_spill] sm:$0xff] }
 0x616   : > { %v10966_v33 = vpop.eup %8941  ;;  %8342 = vmatprep.mubr.msk.bf16.mxu0 %vm1429_vm0, %v5533_v20  ;;  %v5187_v27 = vsub.f32 0.0, %v5123_v35  ;;  %v5190_v48 = vsub.f32 0.0, %v5126_v30  ;;  %v5487_v21 = vmul.f32 %v8926_v5, %v11746_v26  ;;  %v5488_v57 = vmul.f32 %v8924_v24, %v11747_v17 }
 0x617   : > { %v8944_v47 = vpop.eup %8943  ;;  %8965 = vrcp.f32 %v5369_v34  ;;  %v5054_v2 = vmul.f32 %v10915_v29, %v4519_v10  ;;  %v5057_v19 = vmul.f32 %v10929_v1, %v8229_v16  ;;  %v5489_v42 = vmul.f32 %v8932_v25, %v11748_v3  ;;  %v8232_v51 = vpop.f32.mrf.mxu0  ;;  %v11754_v3 = vld [vmem:[#allocation46_spill] sm:$0xff] }
 0x618   : > { %v8946_v39 = vpop.eup %8945  ;;  %v5372_v63 = vadd.f32 1.0, %v8944_v47  ;;  %8967 = vpow2.f32 %v5301_v40  ;;  %v5305_v53 = vmul.f32 1.442695, %v5187_v27  ;;  %v5311_v58 = vmul.f32 1.442695, %v5190_v48 }
 0x619   : > { %v8948_v18 = vpop.eup %8947  ;;  %v5371_v31 = vadd.f32 1.0, %v8946_v39  ;;  %8969 = vpow2.f32 %v5307_v62  ;;  %v5534_v5 = vpack.c.bf16 %v5488_v57, %v5487_v21  ;;  %v5125_v24 = vadd.f32 %v10925_v37, %v5054_v2  ;;  %v4539_v38 = vpop.f32.mrf.mxu0 }
 0x61a   : > { %v8950_v55 = vpop.eup %8949  ;;  %8971 = vrcp.f32 %v5372_v63  ;;  %v5374_v29 = vadd.f32 1.0, %v8948_v18  ;;  %v5128_v1 = vadd.f32 %v10925_v37, %v5057_v19  ;;  %v5490_v23 = vmul.f32 %v10950_v32, %v11749_v46  ;;  %v11757_v46 = vld [vmem:[#allocation49_spill] sm:$0xff] }
 0x61b   : > { %v8952_v54 = vpop.eup %8951  ;;  %8973 = vrcp.f32 %v5371_v31  ;;  %8343 = vmatmul.mubr.msk.bf16.gmra.mxu0 %vm1429_vm0, %v5534_v5  ;;  %v5189_v61 = vsub.f32 0.0, %v5125_v24  ;;  %v5056_v49 = vmul.f32 %v10905_v7, %v4529_v50  ;;  %v5059_v43 = vmul.f32 %v8232_v51, %v4986_v22  ;;  %v8235_v8 = vpop.f32.mrf.mxu0  ;;  %v11750_v7 = vld [vmem:[#allocation42_spill] sm:$0xff]  ;;  %v11756_v22 = vld [vmem:[#allocation48_spill] sm:$0xff] }
 0x61c   : > { %v8954_v6 = vpop.eup %8953  ;;  %8975 = vrcp.f32 %v5374_v29  ;;  %v5373_v25 = vadd.f32 1.0, %v8952_v54  ;;  %v5192_v41 = vsub.f32 0.0, %v5128_v1  ;;  %v5535_v60 = vpack.c.bf16 %v5490_v23, %v5489_v42 }
 0x61d   : > { %v8956_v0 = vpop.eup %8955  ;;  %8977 = vpow2.f32 %v5305_v53  ;;  %v5309_v10 = vmul.f32 1.442695, %v5189_v61  ;;  %v5127_v11 = vadd.f32 %v10925_v37, %v5056_v49  ;;  %v5130_v32 = vadd.f32 %v10925_v37, %v5059_v43  ;;  %v4549_v34 = vpop.f32.mrf.mxu0  ;;  %v11755_v53 = vld [vmem:[#allocation43_spill] sm:$0xff] }
 0x61e   : > { %8979 = vrcp.f32 %v5373_v25  ;;  %v5376_v36 = vadd.f32 1.0, %v8956_v0  ;;  %v5315_v9 = vmul.f32 1.442695, %v5192_v41  ;;  %8346 = vmatprep.mubr.msk.bf16.mxu0 %vm1429_vm0, %v5535_v60  ;;  %v5491_v14 = vmul.f32 %v8940_v52, %v11750_v7  ;;  %v11758_v25 = vld [vmem:[#allocation50_spill] sm:$0xff]  ;;  %v11761_v7 = vld [vmem:[#allocation53_spill] sm:$0xff] }
 0x61f   : > { %v8958_v59 = vpop.eup %8957  ;;  %8981 = vpow2.f32 %v5311_v58  ;;  %v5191_v12 = vsub.f32 0.0, %v5127_v11  ;;  %v5194_v15 = vsub.f32 0.0, %v5130_v32  ;;  %v5492_v16 = vmul.f32 %v10962_v13, %v11751_v4  ;;  %v11752_v13 = vld [vmem:[#allocation44_spill] sm:$0xff]  ;;  %v11760_v32 = vld [vmem:[#allocation47_spill] sm:$0xff] }
 0x620   : > { %v8960_v45 = vpop.eup %8959  ;;  %8983 = vrcp.f32 %v5376_v36  ;;  %v5375_v20 = vadd.f32 1.0, %v8958_v59  ;;  %v5058_v35 = vmul.f32 %v10957_v44, %v4539_v38  ;;  %v5061_v30 = vmul.f32 %v8305_v28, %v8235_v8  ;;  %v11753_v44 = vld [vmem:[#allocation45_spill] sm:$0xff]  ;;  %v11759_v8 = vld [vmem:[#allocation52_spill] sm:$0xff] }
 0x621   : > { %v8962_v40 = vpop.eup %8961  ;;  %8985 = vpow2.f32 %v5309_v10  ;;  %v5313_v62 = vmul.f32 1.442695, %v5191_v12  ;;  %v5319_v50 = vmul.f32 1.442695, %v5194_v15  ;;  %v5536_v27 = vpack.c.bf16 %v5492_v16, %v5491_v14 }
 0x622   : > { %v8964_v52 = vpop.eup %8963  ;;  %8987 = vrcp.f32 %v5375_v20  ;;  %v5378_v48 = vadd.f32 1.0, %v8962_v40  ;;  %v5129_v26 = vadd.f32 %v10925_v37, %v5058_v35  ;;  %v5132_v21 = vadd.f32 %v10925_v37, %v5061_v30  ;;  %v11762_v40 = vld [vmem:[#allocation54_spill] sm:$0xff] }
 0x623   : > { %8989 = vpow2.f32 %v5315_v9  ;;  %8347 = vmatmul.mubr.msk.bf16.gmra.mxu0 %vm1429_vm0, %v5536_v27  ;;  %v5493_v17 = vmul.f32 %v8950_v55, %v11752_v13  ;;  %v5494_v28 = vmul.f32 %v10966_v33, %v11753_v44  ;;  %v5060_v57 = vmul.f32 %v10946_v56, %v4549_v34 }
 0x624   : > { %v8966_v47 = vpop.eup %8965  ;;  %8991 = vrcp.f32 %v5378_v48  ;;  %v5193_v2 = vsub.f32 0.0, %v5129_v26  ;;  %v5196_v19 = vsub.f32 0.0, %v5132_v21  ;;  %v5495_v42 = vmul.f32 %v8960_v45, %v11754_v3  ;;  %v11764_v21 = vld [vmem:[#allocation56_spill] sm:$0xff] }
 0x625   : > { %v8968_v51 = vpop.eup %8967  ;;  %8993 = vpow2.f32 %v5313_v62  ;;  %v5537_v39 = vpack.c.bf16 %v5494_v28, %v5493_v17  ;;  %v5131_v63 = vadd.f32 %v10925_v37, %v5060_v57  ;;  %v5496_v58 = vmul.f32 %v8954_v6, %v11755_v53  ;;  %v11765_v17 = vld [vmem:[#allocation57_spill] sm:$0xff] }
 0x626   : > { %v8970_v18 = vpop.eup %8969  ;;  %v5377_v31 = vadd.f32 1.0, %v8968_v51  ;;  %8995 = vpow2.f32 %v5319_v50  ;;  %v5317_v5 = vmul.f32 1.442695, %v5193_v2  ;;  %v5323_v33 = vmul.f32 1.442695, %v5196_v19 }
 0x627   : > { %v8972_v24 = vpop.eup %8971  ;;  %v5380_v56 = vadd.f32 1.0, %v8970_v18  ;;  %8350 = vmatprep.mubr.msk.bf16.mxu0 %vm1429_vm0, %v5537_v39  ;;  %v5195_v38 = vsub.f32 0.0, %v5131_v63  ;;  %v5538_v55 = vpack.c.bf16 %v5496_v58, %v5495_v42  ;;  %v5497_v29 = vmul.f32 %v8966_v47, %v11756_v22  ;;  %v11766_v63 = vld [vmem:[#allocation58_spill] sm:$0xff]  ;;  %v11767_v18 = vld [vmem:[#allocation55_spill] sm:$0xff] }
 0x628   : > { %v8974_v1 = vpop.eup %8973  ;;  %8997 = vrcp.f32 %v5377_v31  ;;  %v5498_v23 = vmul.f32 %v8964_v52, %v11757_v46  ;;  %v5500_v36 = vmul.f32 %v8972_v24, %v11760_v32  ;;  %v11763_v52 = vld [vmem:[#allocation51_spill] sm:$0xff]  ;;  %v11768_v24 = vld [vmem:[#allocation60_spill] sm:$0xff]  ;;  %v11770_v46 = vld [vmem:[#allocation62_spill] sm:$0xff] }
 0x629   : > { %v8976_v37 = vpop.eup %8975  ;;  %8999 = vrcp.f32 %v5380_v56  ;;  %v5321_v54 = vmul.f32 1.442695, %v5195_v38  ;;  %v5499_v41 = vmul.f32 %v8974_v1, %v11758_v25  ;;  %v11769_v38 = vld [vmem:[#allocation61_spill] sm:$0xff] }
 0x62a   : > { %v8978_v61 = vpop.eup %8977  ;;  %9001 = vpow2.f32 %v5317_v5  ;;  %v5539_v49 = vpack.c.bf16 %v5498_v23, %v5497_v29  ;;  %v5502_v14 = vmul.f32 %v8976_v37, %v11761_v7 }
 0x62b   : > { %v8980_v43 = vpop.eup %8979  ;;  %v5379_v6 = vadd.f32 1.0, %v8978_v61  ;;  %9003 = vpow2.f32 %v5323_v33  ;;  %8351 = vmatmul.mubr.msk.bf16.gmra.mxu0 %vm1429_vm0, %v5538_v55  ;;  %v5540_v15 = vpack.c.bf16 %v5500_v36, %v5499_v41  ;;  %v11773_v41 = vld [vmem:[#allocation65_spill] sm:$0xff]  ;;  %v11775_v36 = vld [vmem:[#allocation63_spill] sm:$0xff] }
 0x62c   : > { %v8982_v60 = vpop.eup %8981  ;;  %9005 = vpow2.f32 %v5321_v54  ;;  %8354 = vmatprep.mubr.msk.bf16.mxu0 %vm1429_vm0, %v5539_v49  ;;  %v5501_v0 = vmul.f32 %v8980_v43, %v11759_v8  ;;  %v11771_v54 = vld [vmem:[#allocation59_spill] sm:$0xff] }
 0x62d   : > { %v8984_v10 = vpop.eup %8983  ;;  %9007 = vrcp.f32 %v5379_v6  ;;  %v5382_v11 = vadd.f32 1.0, %v8982_v60  ;;  %v11772_v6 = vld [vmem:[#allocation64_spill] sm:$0xff] }
 0x62e   : > { %v8986_v9 = vpop.eup %8985  ;;  %v5541_v16 = vpack.c.bf16 %v5502_v14, %v5501_v0  ;;  %v5504_v48 = vmul.f32 %v8984_v10, %v11763_v52 }
 0x62f   : > { %v8988_v59 = vpop.eup %8987  ;;  %9009 = vrcp.f32 %v5382_v11  ;;  %v5381_v12 = vadd.f32 1.0, %v8986_v9  ;;  %v11774_v11 = vld [vmem:[#allocation66_spill] sm:$0xff] }
 0x630   : > { %v8990_v4 = vpop.eup %8989  ;;  %v5503_v62 = vmul.f32 %v8988_v59, %v11762_v40  ;;  %v11032_v59 = vld [vmem:[%s11486_s15] ss:$0 sm:$0xff] }
 0x631   : > { %v8992_v45 = vpop.eup %8991  ;;  %9011 = vrcp.f32 %v5381_v12  ;;  %v5384_v20 = vadd.f32 1.0, %v8990_v4 }
 0x632   : > { %v8994_v35 = vpop.eup %8993  ;;  %v5506_v44 = vmul.f32 %v8992_v45, %v11765_v17  ;;  %v5542_v57 = vpack.c.bf16 %v5504_v48, %v5503_v62 }
 0x633   : > { %v8996_v30 = vpop.eup %8995  ;;  %v5383_v34 = vadd.f32 1.0, %v8994_v35  ;;  %8355 = vmatmul.mubr.msk.bf16.gmra.mxu0 %vm1429_vm0, %v5540_v15  ;;  %9013 = vrcp.f32 %v5384_v20 }
 0x634   : > { %v5386_v50 = vadd.f32 1.0, %v8996_v30  ;;  %8358 = vmatprep.mubr.msk.bf16.mxu0 %vm1429_vm0, %v5541_v16 }
 0x635   : > { %v8998_v27 = vpop.eup %8997  ;;  %9015 = vrcp.f32 %v5383_v34 }
 0x636   : > { %v9000_v26 = vpop.eup %8999  ;;  %v5505_v13 = vmul.f32 %v8998_v27, %v11764_v21  ;;  %9017 = vrcp.f32 %v5386_v50 }
 0x637   : > { %v9002_v28 = vpop.eup %9001  ;;  %v5508_v31 = vmul.f32 %v9000_v26, %v11767_v18 }
 0x638   : > { %v9004_v47 = vpop.eup %9003  ;;  %v5385_v2 = vadd.f32 1.0, %v9002_v28  ;;  %v5543_v19 = vpack.c.bf16 %v5506_v44, %v5505_v13 }
 0x639   : > { %v9006_v3 = vpop.eup %9005  ;;  %v5388_v42 = vadd.f32 1.0, %v9004_v47 }
 0x63a   : > { %v9008_v51 = vpop.eup %9007  ;;  %9019 = vrcp.f32 %v5385_v2  ;;  %v5387_v39 = vadd.f32 1.0, %v9006_v3 }
 0x63b   : > { %8359 = vmatmul.mubr.msk.bf16.gmra.mxu0 %vm1429_vm0, %v5542_v57  ;;  %v5507_v53 = vmul.f32 %v9008_v51, %v11766_v63 }
 0x63c   : > { %v9010_v58 = vpop.eup %9009  ;;  %9021 = vrcp.f32 %v5387_v39  ;;  %8362 = vmatprep.mubr.msk.bf16.mxu0 %vm1429_vm0, %v5543_v19 }
 0x63d   : > { %9023 = vrcp.f32 %v5388_v42  ;;  %v5544_v33 = vpack.c.bf16 %v5508_v31, %v5507_v53  ;;  %v5510_v55 = vmul.f32 %v9010_v58, %v11769_v38 }
 0x63e   : > { %v9012_v5 = vpop.eup %9011 }
 0x63f   : > { %v5509_v56 = vmul.f32 %v9012_v5, %v11768_v24 }
 0x640   : > { %v9014_v22 = vpop.eup %9013 }
 0x641   : > { %v5545_v29 = vpack.c.bf16 %v5510_v55, %v5509_v56  ;;  %v5512_v61 = vmul.f32 %v9014_v22, %v11771_v54 }
 0x642   : > { %v9016_v1 = vpop.eup %9015 }
 0x643   : > { %8363 = vmatmul.mubr.msk.bf16.gmra.mxu0 %vm1429_vm0, %v5544_v33  ;;  %v5511_v23 = vmul.f32 %v9016_v1, %v11770_v46  ;;  %v9018_v37 = vpop.eup %9017 }
 0x644   : > { %8366 = vmatprep.mubr.msk.bf16.mxu0 %vm1429_vm0, %v5545_v29  ;;  %v5514_v60 = vmul.f32 %v9018_v37, %v11773_v41 }
 0x645   : > { %v5546_v43 = vpack.c.bf16 %v5512_v61, %v5511_v23 }
 0x647   : > { %v9020_v49 = vpop.eup %9019 }
 0x648   : > { %v5513_v25 = vmul.f32 %v9020_v49, %v11772_v6 }
 0x649   : > { %v9022_v8 = vpop.eup %9021 }
 0x64a   : > { %v9024_v0 = vpop.eup %9023  ;;  %v5547_v10 = vpack.c.bf16 %v5514_v60, %v5513_v25  ;;  %v5515_v32 = vmul.f32 %v9022_v8, %v11774_v11 }
 0x64b   : > { %8367 = vmatmul.mubr.msk.bf16.gmra.mxu0 %vm1429_vm0, %v5546_v43  ;;  %v5516_v9 = vmul.f32 %v9024_v0, %v11775_v36 }
 0x64c   : > { %8370 = vmatprep.mubr.msk.bf16.mxu0 %vm1429_vm0, %v5547_v10 }
 0x64d   : > { %v5548_v7 = vpack.c.bf16 %v5516_v9, %v5515_v32 }
 0x653   : > { %8371 = vmatmul.mubr.msk.bf16.gmra.mxu0 %vm1429_vm0, %v5548_v7 }
 0x692   : > { %v8312_v14 = vpop.f32.mrf.mxu0 }
 0x693   : > { %v5711_v4 = vadd.f32 %v8312_v14, %v11032_v59 }
 0x694   : > { %v5702_v12 = vpop.f32.mrf.mxu0 }
 0x695   : > { %v5703_v15 = vadd.f32 %v11032_v59, %v5702_v12  ;;  %v5959_v40 = vmul.f32 0.01, %v5711_v4 }
 0x696   : > { %v8313_v16 = vpop.f32.mrf.mxu0 }
 0x697   : > { %v5714_v45 = vadd.f32 %v8313_v16, %v11032_v59  ;;  %v5957_v35 = vmul.f32 0.01, %v5703_v15  ;;  %v6023_v26 = vmax.f32 %v5711_v4, %v5959_v40 }
 0x698   : > { %v5705_v20 = vpop.f32.mrf.mxu0 }
 0x699   : > { %v5960_v30 = vmul.f32 0.01, %v5714_v45  ;;  %v5706_v34 = vadd.f32 %v11032_v59, %v5705_v20  ;;  %v6021_v27 = vmax.f32 %v5703_v15, %v5957_v35 }
 0x69b   : > { %v5958_v62 = vmul.f32 0.01, %v5706_v34  ;;  %v6024_v50 = vmax.f32 %v5714_v45, %v5960_v30 }
 0x69d   : > { %v6022_v52 = vmax.f32 %v5706_v34, %v5958_v62  ;;  %v8316_v48 = vpop.f32.mrf.mxu0  ;;  %v6086_v17 = vpack.c.bf16 %v6024_v50, %v6023_v26 }
 0x69e   : > { %v5727_v28 = vadd.f32 %v8316_v48, %v11032_v59 }
 0x69f   : > { %v6085_v21 = vpack.c.bf16 %v6022_v52, %v6021_v27  ;;  %v5718_v13 = vpop.f32.mrf.mxu0 }
 0x6a0   : > { %v5719_v44 = vadd.f32 %v11032_v59, %v5718_v13  ;;  %v5963_v51 = vmul.f32 0.01, %v5727_v28 }
 0x6a1   : > { %v8317_v57 = vpop.f32.mrf.mxu0  ;;  %8378 = vmatprep.mubr.msk.bf16.mxu1 %vm1429_vm0, %v6085_v21 }
 0x6a2   : > { %v5730_v47 = vadd.f32 %v8317_v57, %v11032_v59  ;;  %8379 = vmatmul.mubr.msk.bf16.vlgmr.msra.gmra.mxu1 %vm1429_vm0, %v6086_v17  ;;  %v5961_v19 = vmul.f32 0.01, %v5719_v44  ;;  %v6027_v5 = vmax.f32 %v5727_v28, %v5963_v51 }
 0x6a3   : > { %v5721_v2 = vpop.f32.mrf.mxu0 }
 0x6a4   : > { %v5964_v3 = vmul.f32 0.01, %v5730_v47  ;;  %v5722_v42 = vadd.f32 %v11032_v59, %v5721_v2  ;;  %v6025_v58 = vmax.f32 %v5719_v44, %v5961_v19 }
 0x6a6   : > { %v5962_v39 = vmul.f32 0.01, %v5722_v42  ;;  %v8320_v63 = vpop.f32.mrf.mxu0  ;;  %v6028_v53 = vmax.f32 %v5730_v47, %v5964_v3 }
 0x6a7   : > { %v5743_v56 = vadd.f32 %v8320_v63, %v11032_v59 }
 0x6a8   : > { %v6026_v18 = vmax.f32 %v5722_v42, %v5962_v39  ;;  %v5734_v31 = vpop.f32.mrf.mxu0  ;;  %v6088_v55 = vpack.c.bf16 %v6028_v53, %v6027_v5 }
 0x6a9   : > { %v5735_v33 = vadd.f32 %v11032_v59, %v5734_v31  ;;  %v5967_v37 = vmul.f32 0.01, %v5743_v56 }
 0x6aa   : > { %v6087_v24 = vpack.c.bf16 %v6026_v18, %v6025_v58  ;;  %v8321_v38 = vpop.f32.mrf.mxu0 }
 0x6ab   : > { %v5746_v22 = vadd.f32 %v8321_v38, %v11032_v59  ;;  %v5965_v1 = vmul.f32 0.01, %v5735_v33  ;;  %v6031_v25 = vmax.f32 %v5743_v56, %v5967_v37 }
 0x6ac   : > { %v5737_v29 = vpop.f32.mrf.mxu0  ;;  %8382 = vmatprep.mubr.msk.bf16.mxu1 %vm1429_vm0, %v6087_v24 }
 0x6ad   : > { %v5968_v46 = vmul.f32 0.01, %v5746_v22  ;;  %v5738_v23 = vadd.f32 %v11032_v59, %v5737_v29  ;;  %8383 = vmatmul.mubr.msk.bf16.gmra.mxu1 %vm1429_vm0, %v6088_v55  ;;  %v6029_v43 = vmax.f32 %v5735_v33, %v5965_v1 }
 0x6af   : > { %v5966_v54 = vmul.f32 0.01, %v5738_v23  ;;  %v6032_v61 = vmax.f32 %v5746_v22, %v5968_v46 }
 0x6b0   : > { %v8324_v49 = vpop.f32.mrf.mxu0 }
 0x6b1   : > { %v6030_v6 = vmax.f32 %v5738_v23, %v5966_v54  ;;  %v6090_v0 = vpack.c.bf16 %v6032_v61, %v6031_v25  ;;  %v5759_v10 = vadd.f32 %v8324_v49, %v11032_v59 }
 0x6b2   : > { %v5750_v41 = vpop.f32.mrf.mxu0 }
 0x6b3   : > { %v6089_v60 = vpack.c.bf16 %v6030_v6, %v6029_v43  ;;  %v5751_v8 = vadd.f32 %v11032_v59, %v5750_v41  ;;  %v5971_v12 = vmul.f32 0.01, %v5759_v10 }
 0x6b4   : > { %v8325_v11 = vpop.f32.mrf.mxu0 }
 0x6b5   : > { %v5762_v32 = vadd.f32 %v8325_v11, %v11032_v59  ;;  %8386 = vmatprep.mubr.msk.bf16.mxu1 %vm1429_vm0, %v6089_v60  ;;  %v5969_v9 = vmul.f32 0.01, %v5751_v8  ;;  %v6035_v34 = vmax.f32 %v5759_v10, %v5971_v12 }
 0x6b6   : > { %v5753_v36 = vpop.f32.mrf.mxu0  ;;  %8387 = vmatmul.mubr.msk.bf16.gmra.mxu1 %vm1429_vm0, %v6090_v0 }
 0x6b7   : > { %v5972_v7 = vmul.f32 0.01, %v5762_v32  ;;  %v5754_v14 = vadd.f32 %v11032_v59, %v5753_v36  ;;  %v6033_v20 = vmax.f32 %v5751_v8, %v5969_v9 }
 0x6b8   : > { %v8328_v15 = vpop.f32.mrf.mxu0 }
 0x6b9   : > { %v5970_v4 = vmul.f32 0.01, %v5754_v14  ;;  %v6036_v16 = vmax.f32 %v5762_v32, %v5972_v7  ;;  %v5775_v40 = vadd.f32 %v8328_v15, %v11032_v59 }
 0x6ba   : > { %v5766_v45 = vpop.f32.mrf.mxu0 }
 0x6bb   : > { %v6034_v35 = vmax.f32 %v5754_v14, %v5970_v4  ;;  %v5767_v30 = vadd.f32 %v11032_v59, %v5766_v45  ;;  %v6092_v52 = vpack.c.bf16 %v6036_v16, %v6035_v34  ;;  %v5975_v17 = vmul.f32 0.01, %v5775_v40 }
 0x6bc   : > { %v8329_v62 = vpop.f32.mrf.mxu0 }
 0x6bd   : > { %v6091_v50 = vpack.c.bf16 %v6034_v35, %v6033_v20  ;;  %v5778_v27 = vadd.f32 %v8329_v62, %v11032_v59  ;;  %v5973_v26 = vmul.f32 0.01, %v5767_v30  ;;  %v6039_v42 = vmax.f32 %v5775_v40, %v5975_v17 }
 0x6be   : > { %v5769_v48 = vpop.f32.mrf.mxu0 }
 0x6bf   : > { %v5976_v21 = vmul.f32 0.01, %v5778_v27  ;;  %v5770_v13 = vadd.f32 %v11032_v59, %v5769_v48  ;;  %8390 = vmatprep.mubr.msk.bf16.mxu1 %vm1429_vm0, %v6091_v50  ;;  %v6037_v2 = vmax.f32 %v5767_v30, %v5973_v26 }
 0x6c0   : > { %v8332_v44 = vpop.f32.mrf.mxu0  ;;  %8391 = vmatmul.mubr.msk.bf16.gmra.mxu1 %vm1429_vm0, %v6092_v52 }
 0x6c1   : > { %v5974_v28 = vmul.f32 0.01, %v5770_v13  ;;  %v6040_v57 = vmax.f32 %v5778_v27, %v5976_v21  ;;  %v5791_v51 = vadd.f32 %v8332_v44, %v11032_v59 }
 0x6c2   : > { %v5782_v47 = vpop.f32.mrf.mxu0 }
 0x6c3   : > { %v6038_v19 = vmax.f32 %v5770_v13, %v5974_v28  ;;  %v5783_v3 = vadd.f32 %v11032_v59, %v5782_v47  ;;  %v6094_v58 = vpack.c.bf16 %v6040_v57, %v6039_v42  ;;  %v5979_v24 = vmul.f32 0.01, %v5791_v51 }
 0x6c4   : > { %v8333_v39 = vpop.f32.mrf.mxu0 }
 0x6c5   : > { %v6093_v63 = vpack.c.bf16 %v6038_v19, %v6037_v2  ;;  %v5794_v53 = vadd.f32 %v8333_v39, %v11032_v59  ;;  %v5977_v31 = vmul.f32 0.01, %v5783_v3  ;;  %v6043_v1 = vmax.f32 %v5791_v51, %v5979_v24 }
 0x6c6   : > { %v5785_v18 = vpop.f32.mrf.mxu0 }
 0x6c7   : > { %v5980_v5 = vmul.f32 0.01, %v5794_v53  ;;  %v5786_v33 = vadd.f32 %v11032_v59, %v5785_v18  ;;  %8394 = vmatprep.mubr.msk.bf16.mxu1 %vm1429_vm0, %v6093_v63  ;;  %v6041_v22 = vmax.f32 %v5783_v3, %v5977_v31 }
 0x6c8   : > { %8395 = vmatmul.mubr.msk.bf16.gmra.mxu1 %vm1429_vm0, %v6094_v58 }
 0x6c9   : > { %v5978_v56 = vmul.f32 0.01, %v5786_v33  ;;  %v6044_v38 = vmax.f32 %v5794_v53, %v5980_v5 }
 0x6ca   : > { %v8336_v55 = vpop.f32.mrf.mxu0 }
 0x6cb   : > { %v6042_v29 = vmax.f32 %v5786_v33, %v5978_v56  ;;  %v6096_v54 = vpack.c.bf16 %v6044_v38, %v6043_v1  ;;  %v5807_v61 = vadd.f32 %v8336_v55, %v11032_v59 }
 0x6cc   : > { %v5798_v46 = vpop.f32.mrf.mxu0 }
 0x6cd   : > { %v6095_v23 = vpack.c.bf16 %v6042_v29, %v6041_v22  ;;  %v5799_v37 = vadd.f32 %v11032_v59, %v5798_v46  ;;  %v5983_v8 = vmul.f32 0.01, %v5807_v61 }
 0x6ce   : > { %v8337_v49 = vpop.f32.mrf.mxu0 }
 0x6cf   : > { %v5810_v43 = vadd.f32 %v8337_v49, %v11032_v59  ;;  %8398 = vmatprep.mubr.msk.bf16.mxu1 %vm1429_vm0, %v6095_v23  ;;  %v5981_v25 = vmul.f32 0.01, %v5799_v37  ;;  %v6047_v14 = vmax.f32 %v5807_v61, %v5983_v8 }
 0x6d0   : > { %v5801_v6 = vpop.f32.mrf.mxu0  ;;  %8399 = vmatmul.mubr.msk.bf16.gmra.mxu1 %vm1429_vm0, %v6096_v54 }
 0x6d1   : > { %v5984_v41 = vmul.f32 0.01, %v5810_v43  ;;  %v5802_v60 = vadd.f32 %v11032_v59, %v5801_v6  ;;  %v6045_v36 = vmax.f32 %v5799_v37, %v5981_v25 }
 0x6d2   : > { %v8340_v0 = vpop.f32.mrf.mxu0 }
 0x6d3   : > { %v5982_v10 = vmul.f32 0.01, %v5802_v60  ;;  %v6048_v11 = vmax.f32 %v5810_v43, %v5984_v41  ;;  %v5823_v12 = vadd.f32 %v8340_v0, %v11032_v59 }
 0x6d4   : > { %v5814_v32 = vpop.f32.mrf.mxu0 }
 0x6d5   : > { %v6046_v9 = vmax.f32 %v5802_v60, %v5982_v10  ;;  %v5815_v7 = vadd.f32 %v11032_v59, %v5814_v32  ;;  %v6098_v45 = vpack.c.bf16 %v6048_v11, %v6047_v14  ;;  %v5987_v40 = vmul.f32 0.01, %v5823_v12 }
 0x6d6   : > { %v8341_v15 = vpop.f32.mrf.mxu0 }
 0x6d7   : > { %v6097_v4 = vpack.c.bf16 %v6046_v9, %v6045_v36  ;;  %v5826_v16 = vadd.f32 %v8341_v15, %v11032_v59  ;;  %v5985_v35 = vmul.f32 0.01, %v5815_v7  ;;  %v6051_v21 = vmax.f32 %v5823_v12, %v5987_v40 }
 0x6d8   : > { %v5817_v20 = vpop.f32.mrf.mxu0 }
 0x6d9   : > { %v5988_v30 = vmul.f32 0.01, %v5826_v16  ;;  %v5818_v34 = vadd.f32 %v11032_v59, %v5817_v20  ;;  %8402 = vmatprep.mubr.msk.bf16.mxu1 %vm1429_vm0, %v6097_v4  ;;  %v6049_v52 = vmax.f32 %v5815_v7, %v5985_v35 }
 0x6da   : > { %8403 = vmatmul.mubr.msk.bf16.gmra.mxu1 %vm1429_vm0, %v6098_v45 }
 0x6db   : > { %v5986_v62 = vmul.f32 0.01, %v5818_v34  ;;  %v8344_v50 = vpop.f32.mrf.mxu0  ;;  %v6052_v27 = vmax.f32 %v5826_v16, %v5988_v30 }
 0x6dc   : > { %v5839_v44 = vadd.f32 %v8344_v50, %v11032_v59 }
 0x6dd   : > { %v6050_v48 = vmax.f32 %v5818_v34, %v5986_v62  ;;  %v5830_v26 = vpop.f32.mrf.mxu0  ;;  %v6100_v57 = vpack.c.bf16 %v6052_v27, %v6051_v21 }
 0x6de   : > { %v5831_v13 = vadd.f32 %v11032_v59, %v5830_v26  ;;  %v5991_v51 = vmul.f32 0.01, %v5839_v44 }
 0x6df   : > { %v6099_v17 = vpack.c.bf16 %v6050_v48, %v6049_v52  ;;  %v8345_v28 = vpop.f32.mrf.mxu0 }
 0x6e0   : > { %v5842_v47 = vadd.f32 %v8345_v28, %v11032_v59  ;;  %v5989_v19 = vmul.f32 0.01, %v5831_v13  ;;  %v6055_v33 = vmax.f32 %v5839_v44, %v5991_v51 }
 0x6e1   : > { %v5833_v2 = vpop.f32.mrf.mxu0  ;;  %8406 = vmatprep.mubr.msk.bf16.mxu1 %vm1429_vm0, %v6099_v17 }
 0x6e2   : > { %v5992_v3 = vmul.f32 0.01, %v5842_v47  ;;  %v5834_v42 = vadd.f32 %v11032_v59, %v5833_v2  ;;  %8407 = vmatmul.mubr.msk.bf16.gmra.mxu1 %vm1429_vm0, %v6100_v57  ;;  %v6053_v18 = vmax.f32 %v5831_v13, %v5989_v19 }
 0x6e3   : > { %v8348_v39 = vpop.f32.mrf.mxu0 }
 0x6e4   : > { %v5990_v63 = vmul.f32 0.01, %v5834_v42  ;;  %v6056_v53 = vmax.f32 %v5842_v47, %v5992_v3  ;;  %v5855_v24 = vadd.f32 %v8348_v39, %v11032_v59 }
 0x6e5   : > { %v5846_v58 = vpop.f32.mrf.mxu0 }
 0x6e6   : > { %v6054_v31 = vmax.f32 %v5834_v42, %v5990_v63  ;;  %v5847_v5 = vadd.f32 %v11032_v59, %v5846_v58  ;;  %v6102_v22 = vpack.c.bf16 %v6056_v53, %v6055_v33  ;;  %v5995_v37 = vmul.f32 0.01, %v5855_v24 }
 0x6e7   : > { %v8349_v56 = vpop.f32.mrf.mxu0 }
 0x6e8   : > { %v6101_v38 = vpack.c.bf16 %v6054_v31, %v6053_v18  ;;  %v5858_v55 = vadd.f32 %v8349_v56, %v11032_v59  ;;  %v5993_v1 = vmul.f32 0.01, %v5847_v5  ;;  %v6059_v60 = vmax.f32 %v5855_v24, %v5995_v37 }
 0x6e9   : > { %v5849_v29 = vpop.f32.mrf.mxu0 }
 0x6ea   : > { %v5996_v46 = vmul.f32 0.01, %v5858_v55  ;;  %v5850_v23 = vadd.f32 %v11032_v59, %v5849_v29  ;;  %8410 = vmatprep.mubr.msk.bf16.mxu1 %vm1429_vm0, %v6101_v38  ;;  %v6057_v6 = vmax.f32 %v5847_v5, %v5993_v1 }
 0x6eb   : > { %v8352_v54 = vpop.f32.mrf.mxu0  ;;  %8411 = vmatmul.mubr.msk.bf16.gmra.mxu1 %vm1429_vm0, %v6102_v22 }
 0x6ec   : > { %v5994_v61 = vmul.f32 0.01, %v5850_v23  ;;  %v6060_v49 = vmax.f32 %v5858_v55, %v5996_v46  ;;  %v5871_v8 = vadd.f32 %v8352_v54, %v11032_v59 }
 0x6ed   : > { %v5862_v43 = vpop.f32.mrf.mxu0 }
 0x6ee   : > { %v6058_v25 = vmax.f32 %v5850_v23, %v5994_v61  ;;  %v5863_v41 = vadd.f32 %v11032_v59, %v5862_v43  ;;  %v6104_v32 = vpack.c.bf16 %v6060_v49, %v6059_v60  ;;  %v5999_v12 = vmul.f32 0.01, %v5871_v8 }
 0x6ef   : > { %v8353_v0 = vpop.f32.mrf.mxu0 }
 0x6f0   : > { %v6103_v10 = vpack.c.bf16 %v6058_v25, %v6057_v6  ;;  %v5874_v11 = vadd.f32 %v8353_v0, %v11032_v59  ;;  %v5997_v9 = vmul.f32 0.01, %v5863_v41  ;;  %v6063_v34 = vmax.f32 %v5871_v8, %v5999_v12 }
 0x6f1   : > { %v5865_v36 = vpop.f32.mrf.mxu0 }
 0x6f2   : > { %v6000_v7 = vmul.f32 0.01, %v5874_v11  ;;  %v5866_v14 = vadd.f32 %v11032_v59, %v5865_v36  ;;  %8414 = vmatprep.mubr.msk.bf16.mxu1 %vm1429_vm0, %v6103_v10  ;;  %v6061_v20 = vmax.f32 %v5863_v41, %v5997_v9 }
 0x6f3   : > { %v8356_v15 = vpop.f32.mrf.mxu0  ;;  %8415 = vmatmul.mubr.msk.bf16.gmra.mxu1 %vm1429_vm0, %v6104_v32 }
 0x6f4   : > { %v5998_v4 = vmul.f32 0.01, %v5866_v14  ;;  %v6064_v16 = vmax.f32 %v5874_v11, %v6000_v7  ;;  %v5887_v40 = vadd.f32 %v8356_v15, %v11032_v59 }
 0x6f5   : > { %v5878_v45 = vpop.f32.mrf.mxu0 }
 0x6f6   : > { %v6062_v35 = vmax.f32 %v5866_v14, %v5998_v4  ;;  %v5879_v30 = vadd.f32 %v11032_v59, %v5878_v45  ;;  %v6106_v52 = vpack.c.bf16 %v6064_v16, %v6063_v34  ;;  %v6003_v17 = vmul.f32 0.01, %v5887_v40 }
 0x6f7   : > { %v8357_v62 = vpop.f32.mrf.mxu0 }
 0x6f8   : > { %v6105_v50 = vpack.c.bf16 %v6062_v35, %v6061_v20  ;;  %v5890_v27 = vadd.f32 %v8357_v62, %v11032_v59  ;;  %v6001_v26 = vmul.f32 0.01, %v5879_v30  ;;  %v6067_v42 = vmax.f32 %v5887_v40, %v6003_v17 }
 0x6f9   : > { %v5881_v48 = vpop.f32.mrf.mxu0 }
 0x6fa   : > { %v6004_v21 = vmul.f32 0.01, %v5890_v27  ;;  %v5882_v13 = vadd.f32 %v11032_v59, %v5881_v48  ;;  %8418 = vmatprep.mubr.msk.bf16.mxu1 %vm1429_vm0, %v6105_v50  ;;  %v6065_v2 = vmax.f32 %v5879_v30, %v6001_v26 }
 0x6fb   : > { %v8360_v44 = vpop.f32.mrf.mxu0  ;;  %8419 = vmatmul.mubr.msk.bf16.gmra.mxu1 %vm1429_vm0, %v6106_v52 }
 0x6fc   : > { %v6002_v28 = vmul.f32 0.01, %v5882_v13  ;;  %v6068_v57 = vmax.f32 %v5890_v27, %v6004_v21  ;;  %v5903_v51 = vadd.f32 %v8360_v44, %v11032_v59 }
 0x6fd   : > { %v5894_v47 = vpop.f32.mrf.mxu0 }
 0x6fe   : > { %v6066_v19 = vmax.f32 %v5882_v13, %v6002_v28  ;;  %v5895_v3 = vadd.f32 %v11032_v59, %v5894_v47  ;;  %v6108_v58 = vpack.c.bf16 %v6068_v57, %v6067_v42  ;;  %v6007_v24 = vmul.f32 0.01, %v5903_v51 }
 0x6ff   : > { %v8361_v39 = vpop.f32.mrf.mxu0 }
 0x700   : > { %v6107_v63 = vpack.c.bf16 %v6066_v19, %v6065_v2  ;;  %v5906_v53 = vadd.f32 %v8361_v39, %v11032_v59  ;;  %v6005_v31 = vmul.f32 0.01, %v5895_v3  ;;  %v6071_v23 = vmax.f32 %v5903_v51, %v6007_v24 }
 0x701   : > { %v5897_v18 = vpop.f32.mrf.mxu0 }
 0x702   : > { %v6008_v5 = vmul.f32 0.01, %v5906_v53  ;;  %v5898_v33 = vadd.f32 %v11032_v59, %v5897_v18  ;;  %8422 = vmatprep.mubr.msk.bf16.mxu1 %vm1429_vm0, %v6107_v63  ;;  %v6069_v29 = vmax.f32 %v5895_v3, %v6005_v31 }
 0x703   : > { %v8364_v56 = vpop.f32.mrf.mxu0  ;;  %8423 = vmatmul.mubr.msk.bf16.gmra.mxu1 %vm1429_vm0, %v6108_v58 }
 0x704   : > { %v6006_v38 = vmul.f32 0.01, %v5898_v33  ;;  %v6072_v55 = vmax.f32 %v5906_v53, %v6008_v5  ;;  %v5919_v37 = vadd.f32 %v8364_v56, %v11032_v59 }
 0x705   : > { %v5910_v22 = vpop.f32.mrf.mxu0 }
 0x706   : > { %v6070_v1 = vmax.f32 %v5898_v33, %v6006_v38  ;;  %v5911_v46 = vadd.f32 %v11032_v59, %v5910_v22  ;;  %v6110_v43 = vpack.c.bf16 %v6072_v55, %v6071_v23  ;;  %v6011_v8 = vmul.f32 0.01, %v5919_v37 }
 0x707   : > { %v8365_v54 = vpop.f32.mrf.mxu0  ;;  %v11143_v22 = vstv %s6653_s27 }
 0x708   : > { %v6109_v61 = vpack.c.bf16 %v6070_v1, %v6069_v29  ;;  %v5922_v49 = vadd.f32 %v8365_v54, %v11032_v59  ;;  %v6009_v25 = vmul.f32 0.01, %v5911_v46  ;;  %v6075_v14 = vmax.f32 %v5919_v37, %v6011_v8  ;;  %v6721_v37 = vld [vmem:[%s11140_s23 + $0x10] sm:$0xff] }
 0x709   : > { %v5913_v6 = vpop.f32.mrf.mxu0 }
 0x70a   : > { %v6012_v41 = vmul.f32 0.01, %v5922_v49  ;;  %v5914_v60 = vadd.f32 %v11032_v59, %v5913_v6  ;;  %8426 = vmatprep.mubr.msk.bf16.mxu1 %vm1429_vm0, %v6109_v61  ;;  %v6073_v36 = vmax.f32 %v5911_v46, %v6009_v25  ;;  %v6719_v25 = vld [vmem:[%s11140_s23] sm:$0xff] }
 0x70b   : > { %v8368_v0 = vpop.f32.mrf.mxu0  ;;  %8427 = vmatmul.mubr.msk.bf16.gmra.mxu1 %vm1429_vm0, %v6110_v43 }
 0x70c   : > { %v6010_v10 = vmul.f32 0.01, %v5914_v60  ;;  %v6076_v11 = vmax.f32 %v5922_v49, %v6012_v41  ;;  %v5935_v12 = vadd.f32 %v8368_v0, %v11032_v59 }
 0x70d   : > { %v5926_v32 = vpop.f32.mrf.mxu0 }
 0x70e   : > { %v6074_v9 = vmax.f32 %v5914_v60, %v6010_v10  ;;  %v5927_v7 = vadd.f32 %v11032_v59, %v5926_v32  ;;  %v6112_v45 = vpack.c.bf16 %v6076_v11, %v6075_v14  ;;  %v6015_v40 = vmul.f32 0.01, %v5935_v12  ;;  %v6722_v10 = vld [vmem:[%s11140_s23 + $0x18] sm:$0xff] }
 0x70f   : > { %v8369_v15 = vpop.f32.mrf.mxu0 }
 0x710   : > { %v6111_v4 = vpack.c.bf16 %v6074_v9, %v6073_v36  ;;  %v5938_v16 = vadd.f32 %v8369_v15, %v11032_v59  ;;  %v6013_v35 = vmul.f32 0.01, %v5927_v7  ;;  %v6079_v13 = vmax.f32 %v5935_v12, %v6015_v40 }
 0x711   : > { %v5929_v20 = vpop.f32.mrf.mxu0 }
 0x712   : > { %v6016_v30 = vmul.f32 0.01, %v5938_v16  ;;  %v5930_v34 = vadd.f32 %v11032_v59, %v5929_v20  ;;  %8430 = vmatprep.mubr.msk.bf16.mxu1 %vm1429_vm0, %v6111_v4  ;;  %v6077_v48 = vmax.f32 %v5927_v7, %v6013_v35  ;;  %v6720_v7 = vld [vmem:[%s11140_s23 + $0x8] sm:$0xff] }
 0x713   : > { %v8372_v62 = vpop.f32.mrf.mxu0  ;;  %8431 = vmatmul.mubr.msk.bf16.gmra.mxu1 %vm1429_vm0, %v6112_v45 }
 0x714   : > { %v6014_v50 = vmul.f32 0.01, %v5930_v34  ;;  %v6080_v27 = vmax.f32 %v5938_v16, %v6016_v30  ;;  %v5951_v17 = vadd.f32 %v8372_v62, %v11032_v59  ;;  %v6725_v62 = vld [vmem:[%s11140_s23 + $0x30] sm:$0xff] }
 0x715   : > { %v5942_v52 = vpop.f32.mrf.mxu0 }
 0x716   : > { %v6078_v26 = vmax.f32 %v5930_v34, %v6014_v50  ;;  %v5943_v21 = vadd.f32 %v11032_v59, %v5942_v52  ;;  %v6114_v47 = vpack.c.bf16 %v6080_v27, %v6079_v13  ;;  %v6019_v51 = vmul.f32 0.01, %v5951_v17 }
 0x717   : > { %v8373_v44 = vpop.f32.mrf.mxu0 }
 0x718   : > { %v6113_v28 = vpack.c.bf16 %v6078_v26, %v6077_v48  ;;  %v5954_v57 = vadd.f32 %v8373_v44, %v11032_v59  ;;  %v6017_v19 = vmul.f32 0.01, %v5943_v21  ;;  %v6083_v18 = vmax.f32 %v5951_v17, %v6019_v51 }
 0x719   : > { %v5945_v2 = vpop.f32.mrf.mxu0 }
 0x71a   : > { %v6020_v3 = vmul.f32 0.01, %v5954_v57  ;;  %v5946_v42 = vadd.f32 %v11032_v59, %v5945_v2  ;;  %8434 = vmatprep.mubr.msk.bf16.mxu1 %vm1429_vm0, %v6113_v28  ;;  %v6081_v53 = vmax.f32 %v5943_v21, %v6017_v19  ;;  %v11133_v59 = vld [vmem:[%s11488_s17] ss:$0 sm:$0xff] }
 0x71b   : > { %8435 = vmatmul.mubr.msk.bf16.gmra.mxu1 %vm1429_vm0, %v6114_v47  ;;  %v6723_v21 = vld [vmem:[%s11140_s23 + $0x20] sm:$0xff]  ;;  %v6726_v47 = vld [vmem:[%s11140_s23 + $0x38] sm:$0xff] }
 0x71c   : > { %v6018_v39 = vmul.f32 0.01, %v5946_v42  ;;  %v6084_v63 = vmax.f32 %v5954_v57, %v6020_v3 }
 0x71e   : > { %v6082_v58 = vmax.f32 %v5946_v42, %v6018_v39  ;;  %v6116_v5 = vpack.c.bf16 %v6084_v63, %v6083_v18  ;;  %v6724_v39 = vld [vmem:[%s11140_s23 + $0x28] sm:$0xff] }
 0x720   : > { %v6115_v31 = vpack.c.bf16 %v6082_v58, %v6081_v53 }
 0x722   : > { %8438 = vmatprep.mubr.msk.bf16.mxu1 %vm1429_vm0, %v6115_v31 }
 0x723   : > { %8439 = vmatmul.mubr.msk.bf16.gmra.mxu1 %vm1429_vm0, %v6116_v5 }
 0x762   : > { %v8380_v33 = vpop.f32.mrf.mxu1 }
 0x763   : > { %v6279_v24 = vadd.f32 %v8380_v33, %v11133_v59 }
 0x764   : > { %v6270_v56 = vpop.f32.mrf.mxu1 }
 0x765   : > { %v6527_v38 = vmul.f32 0.01, %v6279_v24  ;;  %v6271_v55 = vadd.f32 %v11133_v59, %v6270_v56 }
 0x766   : > { %v8381_v29 = vpop.f32.mrf.mxu1 }
 0x767   : > { %v6591_v1 = vmax.f32 %v6279_v24, %v6527_v38  ;;  %v6525_v46 = vmul.f32 0.01, %v6271_v55  ;;  %v6282_v23 = vadd.f32 %v8381_v29, %v11133_v59  ;;  %v6729_v38 = vld [vmem:[%s11140_s23 + $0x50] sm:$0xff] }
 0x768   : > { %v6273_v54 = vpop.f32.mrf.mxu1 }
 0x769   : > { %v6657_v61 = vmul.f32 %v11143_v22, %v6591_v1  ;;  %v6589_v49 = vmax.f32 %v6271_v55, %v6525_v46  ;;  %v6528_v43 = vmul.f32 0.01, %v6282_v23  ;;  %v6274_v6 = vadd.f32 %v11133_v59, %v6273_v54 }
 0x76b   : > { %v6785_v41 = vadd.f32 %v6721_v37, %v6657_v61  ;;  %v6655_v60 = vmul.f32 %v11143_v22, %v6589_v49  ;;  %v6592_v8 = vmax.f32 %v6282_v23, %v6528_v43  ;;  %v6526_v0 = vmul.f32 0.01, %v6274_v6  ;;  %v6727_v37 = vld [vmem:[%s11140_s23 + $0x40] sm:$0xff] }
 0x76d   : > { %6849 = vst.msk [vmem:[%s11152_s25 + $0x10] sm:$0xff] %vm1429_vm0, %v6785_v41  ;;  %v6783_v11 = vadd.f32 %v6719_v25, %v6655_v60  ;;  %v6658_v32 = vmul.f32 %v11143_v22, %v6592_v8  ;;  %v6590_v36 = vmax.f32 %v6274_v6, %v6526_v0  ;;  %v8384_v9 = vpop.f32.mrf.mxu1  ;;  %v6730_v6 = vld [vmem:[%s11140_s23 + $0x58] sm:$0xff] }
 0x76e   : > { %v6295_v14 = vadd.f32 %v8384_v9, %v11133_v59 }
 0x76f   : > { %6847 = vst.msk [vmem:[%s11152_s25] sm:$0xff] %vm1429_vm0, %v6783_v11  ;;  %v6786_v12 = vadd.f32 %v6722_v10, %v6658_v32  ;;  %v6656_v15 = vmul.f32 %v11143_v22, %v6590_v36  ;;  %v6286_v4 = vpop.f32.mrf.mxu1  ;;  %v6728_v10 = vld [vmem:[%s11140_s23 + $0x48] sm:$0xff] }
 0x770   : > { %v6531_v16 = vmul.f32 0.01, %v6295_v14  ;;  %v6287_v45 = vadd.f32 %v11133_v59, %v6286_v4 }
 0x771   : > { %6850 = vst.msk [vmem:[%s11152_s25 + $0x18] sm:$0xff] %vm1429_vm0, %v6786_v12  ;;  %v6784_v20 = vadd.f32 %v6720_v7, %v6656_v15  ;;  %v8385_v35 = vpop.f32.mrf.mxu1 }
 0x772   : > { %v6595_v30 = vmax.f32 %v6295_v14, %v6531_v16  ;;  %v6529_v34 = vmul.f32 0.01, %v6287_v45  ;;  %v6298_v40 = vadd.f32 %v8385_v35, %v11133_v59 }
 0x773   : > { %6848 = vst.msk [vmem:[%s11152_s25 + $0x8] sm:$0xff] %vm1429_vm0, %v6784_v20  ;;  %v6289_v50 = vpop.f32.mrf.mxu1 }
 0x774   : > { %v6661_v27 = vmul.f32 %v11143_v22, %v6595_v30  ;;  %v6593_v52 = vmax.f32 %v6287_v45, %v6529_v34  ;;  %v6532_v48 = vmul.f32 0.01, %v6298_v40  ;;  %v6290_v26 = vadd.f32 %v11133_v59, %v6289_v50  ;;  %v6733_v45 = vld [vmem:[%s11140_s23 + $0x70] sm:$0xff] }
 0x776   : > { %v6789_v13 = vadd.f32 %v6725_v62, %v6661_v27  ;;  %v6659_v17 = vmul.f32 %v11143_v22, %v6593_v52  ;;  %v6596_v44 = vmax.f32 %v6298_v40, %v6532_v48  ;;  %v6530_v28 = vmul.f32 0.01, %v6290_v26  ;;  %v8388_v57 = vpop.f32.mrf.mxu1  ;;  %v6731_v62 = vld [vmem:[%s11140_s23 + $0x60] sm:$0xff] }
 0x777   : > { %v6311_v2 = vadd.f32 %v8388_v57, %v11133_v59 }
 0x778   : > { %6853 = vst.msk [vmem:[%s11152_s25 + $0x30] sm:$0xff] %vm1429_vm0, %v6789_v13  ;;  %v6787_v19 = vadd.f32 %v6723_v21, %v6659_v17  ;;  %v6662_v3 = vmul.f32 %v11143_v22, %v6596_v44  ;;  %v6594_v42 = vmax.f32 %v6290_v26, %v6530_v28  ;;  %v6302_v51 = vpop.f32.mrf.mxu1  ;;  %v6734_v21 = vld [vmem:[%s11140_s23 + $0x78] sm:$0xff] }
 0x779   : > { %v6535_v63 = vmul.f32 0.01, %v6311_v2  ;;  %v6303_v53 = vadd.f32 %v11133_v59, %v6302_v51 }
 0x77a   : > { %6851 = vst.msk [vmem:[%s11152_s25 + $0x20] sm:$0xff] %vm1429_vm0, %v6787_v19  ;;  %v6790_v58 = vadd.f32 %v6726_v47, %v6662_v3  ;;  %v6660_v18 = vmul.f32 %v11143_v22, %v6594_v42  ;;  %v8389_v31 = vpop.f32.mrf.mxu1 }
 0x77b   : > { %v6599_v5 = vmax.f32 %v6311_v2, %v6535_v63  ;;  %v6533_v33 = vmul.f32 0.01, %v6303_v53  ;;  %v6314_v24 = vadd.f32 %v8389_v31, %v11133_v59  ;;  %v6732_v2 = vld [vmem:[%s11140_s23 + $0x68] sm:$0xff]  ;;  %v6737_v31 = vld [vmem:[%s11140_s23 + $0x90] sm:$0xff] }
 0x77c   : > { %6854 = vst.msk [vmem:[%s11152_s25 + $0x38] sm:$0xff] %vm1429_vm0, %v6790_v58  ;;  %v6788_v56 = vadd.f32 %v6724_v39, %v6660_v18  ;;  %v6305_v55 = vpop.f32.mrf.mxu1 }
 0x77d   : > { %v6665_v29 = vmul.f32 %v11143_v22, %v6599_v5  ;;  %v6597_v1 = vmax.f32 %v6303_v53, %v6533_v33  ;;  %v6536_v46 = vmul.f32 0.01, %v6314_v24  ;;  %v6306_v23 = vadd.f32 %v11133_v59, %v6305_v55 }
 0x77e   : > { %6852 = vst.msk [vmem:[%s11152_s25 + $0x28] sm:$0xff] %vm1429_vm0, %v6788_v56 }
 0x77f   : > { %v6793_v54 = vadd.f32 %v6729_v38, %v6665_v29  ;;  %v6663_v61 = vmul.f32 %v11143_v22, %v6597_v1  ;;  %v6600_v49 = vmax.f32 %v6314_v24, %v6536_v46  ;;  %v6534_v43 = vmul.f32 0.01, %v6306_v23  ;;  %v6735_v38 = vld [vmem:[%s11140_s23 + $0x80] sm:$0xff] }
 0x780   : > { %v8392_v25 = vpop.f32.mrf.mxu1 }
 0x781   : > { %6857 = vst.msk [vmem:[%s11152_s25 + $0x50] sm:$0xff] %vm1429_vm0, %v6793_v54  ;;  %v6791_v41 = vadd.f32 %v6727_v37, %v6663_v61  ;;  %v6666_v60 = vmul.f32 %v11143_v22, %v6600_v49  ;;  %v6598_v8 = vmax.f32 %v6306_v23, %v6534_v43  ;;  %v6327_v0 = vadd.f32 %v8392_v25, %v11133_v59  ;;  %v6738_v54 = vld [vmem:[%s11140_s23 + $0x98] sm:$0xff] }
 0x782   : > { %v6318_v11 = vpop.f32.mrf.mxu1 }
 0x783   : > { %6855 = vst.msk [vmem:[%s11152_s25 + $0x40] sm:$0xff] %vm1429_vm0, %v6791_v41  ;;  %v6794_v32 = vadd.f32 %v6730_v6, %v6666_v60  ;;  %v6664_v36 = vmul.f32 %v11143_v22, %v6598_v8  ;;  %v6539_v9 = vmul.f32 0.01, %v6327_v0  ;;  %v6319_v7 = vadd.f32 %v11133_v59, %v6318_v11  ;;  %v6736_v41 = vld [vmem:[%s11140_s23 + $0x88] sm:$0xff] }
 0x784   : > { %v8393_v14 = vpop.f32.mrf.mxu1 }
 0x785   : > { %6858 = vst.msk [vmem:[%s11152_s25 + $0x58] sm:$0xff] %vm1429_vm0, %v6794_v32  ;;  %v6792_v12 = vadd.f32 %v6728_v10, %v6664_v36  ;;  %v6603_v15 = vmax.f32 %v6327_v0, %v6539_v9  ;;  %v6537_v4 = vmul.f32 0.01, %v6319_v7  ;;  %v6330_v16 = vadd.f32 %v8393_v14, %v11133_v59  ;;  %v6741_v36 = vld [vmem:[%s11140_s23 + $0xb0] sm:$0xff] }
 0x786   : > { %v6321_v20 = vpop.f32.mrf.mxu1 }
 0x787   : > { %6856 = vst.msk [vmem:[%s11152_s25 + $0x48] sm:$0xff] %vm1429_vm0, %v6792_v12  ;;  %v6669_v35 = vmul.f32 %v11143_v22, %v6603_v15  ;;  %v6601_v30 = vmax.f32 %v6319_v7, %v6537_v4  ;;  %v6540_v34 = vmul.f32 0.01, %v6330_v16  ;;  %v6322_v40 = vadd.f32 %v11133_v59, %v6321_v20  ;;  %v6739_v20 = vld [vmem:[%s11140_s23 + $0xa0] sm:$0xff] }
 0x788   : > { %v8396_v50 = vpop.f32.mrf.mxu1 }
 0x789   : > { %v6797_v27 = vadd.f32 %v6733_v45, %v6669_v35  ;;  %v6667_v52 = vmul.f32 %v11143_v22, %v6601_v30  ;;  %v6604_v48 = vmax.f32 %v6330_v16, %v6540_v34  ;;  %v6538_v26 = vmul.f32 0.01, %v6322_v40 }
 0x78a   : > { %v6343_v13 = vadd.f32 %v8396_v50, %v11133_v59  ;;  %v6334_v17 = vpop.f32.mrf.mxu1 }
 0x78b   : > { %6861 = vst.msk [vmem:[%s11152_s25 + $0x70] sm:$0xff] %vm1429_vm0, %v6797_v27  ;;  %v6795_v44 = vadd.f32 %v6731_v62, %v6667_v52  ;;  %v6670_v28 = vmul.f32 %v11143_v22, %v6604_v48  ;;  %v6602_v57 = vmax.f32 %v6322_v40, %v6538_v26  ;;  %v6335_v47 = vadd.f32 %v11133_v59, %v6334_v17  ;;  %v6742_v40 = vld [vmem:[%s11140_s23 + $0xb8] sm:$0xff]  ;;  %v6740_v26 = vld [vmem:[%s11140_s23 + $0xa8] sm:$0xff] }
 0x78c   : > { %v6543_v19 = vmul.f32 0.01, %v6343_v13  ;;  %v8397_v3 = vpop.f32.mrf.mxu1 }
 0x78d   : > { %6859 = vst.msk [vmem:[%s11152_s25 + $0x60] sm:$0xff] %vm1429_vm0, %v6795_v44  ;;  %v6798_v42 = vadd.f32 %v6734_v21, %v6670_v28  ;;  %v6668_v51 = vmul.f32 %v11143_v22, %v6602_v57  ;;  %v6541_v39 = vmul.f32 0.01, %v6335_v47  ;;  %v6346_v63 = vadd.f32 %v8397_v3, %v11133_v59 }
 0x78e   : > { %v6607_v53 = vmax.f32 %v6343_v13, %v6543_v19  ;;  %v6337_v58 = vpop.f32.mrf.mxu1 }
 0x78f   : > { %6862 = vst.msk [vmem:[%s11152_s25 + $0x78] sm:$0xff] %vm1429_vm0, %v6798_v42  ;;  %v6796_v18 = vadd.f32 %v6732_v2, %v6668_v51  ;;  %v6605_v5 = vmax.f32 %v6335_v47, %v6541_v39  ;;  %v6544_v33 = vmul.f32 0.01, %v6346_v63  ;;  %v6338_v24 = vadd.f32 %v11133_v59, %v6337_v58  ;;  %v6745_v42 = vld [vmem:[%s11140_s23 + $0xd0] sm:$0xff] }
 0x790   : > { %v6673_v56 = vmul.f32 %v11143_v22, %v6607_v53  ;;  %v8400_v55 = vpop.f32.mrf.mxu1 }
 0x791   : > { %6860 = vst.msk [vmem:[%s11152_s25 + $0x68] sm:$0xff] %vm1429_vm0, %v6796_v18  ;;  %v6671_v29 = vmul.f32 %v11143_v22, %v6605_v5  ;;  %v6608_v1 = vmax.f32 %v6346_v63, %v6544_v33  ;;  %v6542_v46 = vmul.f32 0.01, %v6338_v24  ;;  %v6359_v23 = vadd.f32 %v8400_v55, %v11133_v59  ;;  %v6743_v18 = vld [vmem:[%s11140_s23 + $0xc0] sm:$0xff] }
 0x792   : > { %v6801_v37 = vadd.f32 %v6737_v31, %v6673_v56  ;;  %v6350_v61 = vpop.f32.mrf.mxu1 }
 0x793   : > { %v6799_v49 = vadd.f32 %v6735_v38, %v6671_v29  ;;  %v6674_v43 = vmul.f32 %v11143_v22, %v6608_v1  ;;  %v6606_v6 = vmax.f32 %v6338_v24, %v6542_v46  ;;  %v6547_v25 = vmul.f32 0.01, %v6359_v23  ;;  %v6746_v38 = vld [vmem:[%s11140_s23 + $0xd8] sm:$0xff] }
 0x794   : > { %6865 = vst.msk [vmem:[%s11152_s25 + $0x90] sm:$0xff] %vm1429_vm0, %v6801_v37  ;;  %v6351_v60 = vadd.f32 %v11133_v59, %v6350_v61  ;;  %v8401_v8 = vpop.f32.mrf.mxu1 }
 0x795   : > { %6863 = vst.msk [vmem:[%s11152_s25 + $0x80] sm:$0xff] %vm1429_vm0, %v6799_v49  ;;  %v6802_v0 = vadd.f32 %v6738_v54, %v6674_v43  ;;  %v6672_v10 = vmul.f32 %v11143_v22, %v6606_v6  ;;  %v6611_v11 = vmax.f32 %v6359_v23, %v6547_v25  ;;  %v6362_v32 = vadd.f32 %v8401_v8, %v11133_v59  ;;  %v6744_v54 = vld [vmem:[%s11140_s23 + $0xc8] sm:$0xff] }
 0x796   : > { %v6545_v9 = vmul.f32 0.01, %v6351_v60  ;;  %v6353_v7 = vpop.f32.mrf.mxu1 }
 0x797   : > { %6866 = vst.msk [vmem:[%s11152_s25 + $0x98] sm:$0xff] %vm1429_vm0, %v6802_v0  ;;  %v6800_v14 = vadd.f32 %v6736_v41, %v6672_v10  ;;  %v6677_v12 = vmul.f32 %v11143_v22, %v6611_v11  ;;  %v6548_v15 = vmul.f32 0.01, %v6362_v32  ;;  %v6354_v4 = vadd.f32 %v11133_v59, %v6353_v7  ;;  %v6749_v10 = vld [vmem:[%s11140_s23 + $0xf0] sm:$0xff]  ;;  %v6747_v7 = vld [vmem:[%s11140_s23 + $0xe0] sm:$0xff] }
 0x798   : > { %v6609_v16 = vmax.f32 %v6351_v60, %v6545_v9 }
 0x799   : > { %6864 = vst.msk [vmem:[%s11152_s25 + $0x88] sm:$0xff] %vm1429_vm0, %v6800_v14  ;;  %v6805_v45 = vadd.f32 %v6741_v36, %v6677_v12  ;;  %v6612_v35 = vmax.f32 %v6362_v32, %v6548_v15  ;;  %v6546_v30 = vmul.f32 0.01, %v6354_v4 }
 0x79a   : > { %v6675_v34 = vmul.f32 %v11143_v22, %v6609_v16  ;;  %v8404_v62 = vpop.f32.mrf.mxu1 }
 0x79b   : > { %6869 = vst.msk [vmem:[%s11152_s25 + $0xb0] sm:$0xff] %vm1429_vm0, %v6805_v45  ;;  %v6678_v50 = vmul.f32 %v11143_v22, %v6612_v35  ;;  %v6610_v27 = vmax.f32 %v6354_v4, %v6546_v30  ;;  %v6375_v52 = vadd.f32 %v8404_v62, %v11133_v59  ;;  %v6750_v45 = vld [vmem:[%s11140_s23 + $0xf8] sm:$0xff]  ;;  %v6748_v62 = vld [vmem:[%s11140_s23 + $0xe8] sm:$0xff] }
 0x79c   : > { %v6803_v48 = vadd.f32 %v6739_v20, %v6675_v34  ;;  %v6366_v21 = vpop.f32.mrf.mxu1 }
 0x79d   : > { %v6806_v13 = vadd.f32 %v6742_v40, %v6678_v50  ;;  %v6676_v17 = vmul.f32 %v11143_v22, %v6610_v27  ;;  %v6551_v44 = vmul.f32 0.01, %v6375_v52  ;;  %v6367_v28 = vadd.f32 %v11133_v59, %v6366_v21 }
 0x79e   : > { %6867 = vst.msk [vmem:[%s11152_s25 + $0xa0] sm:$0xff] %vm1429_vm0, %v6803_v48  ;;  %v8405_v57 = vpop.f32.mrf.mxu1 }
 0x79f   : > { %6870 = vst.msk [vmem:[%s11152_s25 + $0xb8] sm:$0xff] %vm1429_vm0, %v6806_v13  ;;  %v6804_v47 = vadd.f32 %v6740_v26, %v6676_v17  ;;  %v6615_v2 = vmax.f32 %v6375_v52, %v6551_v44  ;;  %v6549_v19 = vmul.f32 0.01, %v6367_v28  ;;  %v6378_v3 = vadd.f32 %v8405_v57, %v11133_v59 }
 0x7a0   : > { %v6369_v51 = vpop.f32.mrf.mxu1 }
 0x7a1   : > { %6868 = vst.msk [vmem:[%s11152_s25 + $0xa8] sm:$0xff] %vm1429_vm0, %v6804_v47  ;;  %v6681_v39 = vmul.f32 %v11143_v22, %v6615_v2  ;;  %v6613_v63 = vmax.f32 %v6367_v28, %v6549_v19  ;;  %v6552_v53 = vmul.f32 0.01, %v6378_v3  ;;  %v6370_v58 = vadd.f32 %v11133_v59, %v6369_v51  ;;  %v6753_v28 = vld [vmem:[%s11140_s23 + $0x110] sm:$0xff] }
 0x7a2   : > { %v8408_v31 = vpop.f32.mrf.mxu1 }
 0x7a3   : > { %v6809_v5 = vadd.f32 %v6745_v42, %v6681_v39  ;;  %v6679_v33 = vmul.f32 %v11143_v22, %v6613_v63  ;;  %v6616_v24 = vmax.f32 %v6378_v3, %v6552_v53  ;;  %v6550_v56 = vmul.f32 0.01, %v6370_v58  ;;  %v6751_v42 = vld [vmem:[%s11140_s23 + $0x100] sm:$0xff] }
 0x7a4   : > { %v6391_v55 = vadd.f32 %v8408_v31, %v11133_v59  ;;  %v6382_v29 = vpop.f32.mrf.mxu1 }
 0x7a5   : > { %6873 = vst.msk [vmem:[%s11152_s25 + $0xd0] sm:$0xff] %vm1429_vm0, %v6809_v5  ;;  %v6807_v1 = vadd.f32 %v6743_v18, %v6679_v33  ;;  %v6682_v46 = vmul.f32 %v11143_v22, %v6616_v24  ;;  %v6614_v23 = vmax.f32 %v6370_v58, %v6550_v56  ;;  %v6383_v37 = vadd.f32 %v11133_v59, %v6382_v29  ;;  %v6754_v18 = vld [vmem:[%s11140_s23 + $0x118] sm:$0xff] }
 0x7a6   : > { %v6555_v61 = vmul.f32 0.01, %v6391_v55  ;;  %v8409_v49 = vpop.f32.mrf.mxu1 }
 0x7a7   : > { %6871 = vst.msk [vmem:[%s11152_s25 + $0xc0] sm:$0xff] %vm1429_vm0, %v6807_v1  ;;  %v6810_v43 = vadd.f32 %v6746_v38, %v6682_v46  ;;  %v6680_v6 = vmul.f32 %v11143_v22, %v6614_v23  ;;  %v6553_v25 = vmul.f32 0.01, %v6383_v37  ;;  %v6394_v41 = vadd.f32 %v8409_v49, %v11133_v59 }
 0x7a8   : > { %v6619_v60 = vmax.f32 %v6391_v55, %v6555_v61  ;;  %v6385_v8 = vpop.f32.mrf.mxu1  ;;  %v6752_v55 = vld [vmem:[%s11140_s23 + $0x108] sm:$0xff] }
 0x7a9   : > { %6874 = vst.msk [vmem:[%s11152_s25 + $0xd8] sm:$0xff] %vm1429_vm0, %v6810_v43  ;;  %v6808_v0 = vadd.f32 %v6744_v54, %v6680_v6  ;;  %v6617_v11 = vmax.f32 %v6383_v37, %v6553_v25  ;;  %v6556_v32 = vmul.f32 0.01, %v6394_v41  ;;  %v6386_v36 = vadd.f32 %v11133_v59, %v6385_v8  ;;  %v6757_v6 = vld [vmem:[%s11140_s23 + $0x130] sm:$0xff] }
 0x7aa   : > { %v6685_v9 = vmul.f32 %v11143_v22, %v6619_v60 }
 0x7ab   : > { %6872 = vst.msk [vmem:[%s11152_s25 + $0xc8] sm:$0xff] %vm1429_vm0, %v6808_v0  ;;  %v6683_v14 = vmul.f32 %v11143_v22, %v6617_v11  ;;  %v6620_v12 = vmax.f32 %v6394_v41, %v6556_v32  ;;  %v6554_v15 = vmul.f32 0.01, %v6386_v36  ;;  %v8412_v4 = vpop.f32.mrf.mxu1  ;;  %v6755_v0 = vld [vmem:[%s11140_s23 + $0x120] sm:$0xff] }
 0x7ac   : > { %v6813_v16 = vadd.f32 %v6749_v10, %v6685_v9  ;;  %v6407_v20 = vadd.f32 %v8412_v4, %v11133_v59 }
 0x7ad   : > { %v6811_v35 = vadd.f32 %v6747_v7, %v6683_v14  ;;  %v6686_v30 = vmul.f32 %v11143_v22, %v6620_v12  ;;  %v6618_v34 = vmax.f32 %v6386_v36, %v6554_v15  ;;  %v6398_v40 = vpop.f32.mrf.mxu1  ;;  %v6758_v14 = vld [vmem:[%s11140_s23 + $0x138] sm:$0xff] }
 0x7ae   : > { %6877 = vst.msk [vmem:[%s11152_s25 + $0xf0] sm:$0xff] %vm1429_vm0, %v6813_v16  ;;  %v6559_v50 = vmul.f32 0.01, %v6407_v20  ;;  %v6399_v27 = vadd.f32 %v11133_v59, %v6398_v40 }
 0x7af   : > { %6875 = vst.msk [vmem:[%s11152_s25 + $0xe0] sm:$0xff] %vm1429_vm0, %v6811_v35  ;;  %v6814_v52 = vadd.f32 %v6750_v45, %v6686_v30  ;;  %v6684_v48 = vmul.f32 %v11143_v22, %v6618_v34  ;;  %v8413_v26 = vpop.f32.mrf.mxu1 }
 0x7b0   : > { %v6623_v21 = vmax.f32 %v6407_v20, %v6559_v50  ;;  %v6557_v13 = vmul.f32 0.01, %v6399_v27  ;;  %v6410_v17 = vadd.f32 %v8413_v26, %v11133_v59  ;;  %v6756_v20 = vld [vmem:[%s11140_s23 + $0x128] sm:$0xff] }
 0x7b1   : > { %6878 = vst.msk [vmem:[%s11152_s25 + $0xf8] sm:$0xff] %vm1429_vm0, %v6814_v52  ;;  %v6812_v44 = vadd.f32 %v6748_v62, %v6684_v48  ;;  %v6401_v57 = vpop.f32.mrf.mxu1 }
 0x7b2   : > { %v6689_v47 = vmul.f32 %v11143_v22, %v6623_v21  ;;  %v6621_v2 = vmax.f32 %v6399_v27, %v6557_v13  ;;  %v6560_v19 = vmul.f32 0.01, %v6410_v17  ;;  %v6402_v3 = vadd.f32 %v11133_v59, %v6401_v57  ;;  %v6761_v27 = vld [vmem:[%s11140_s23 + $0x150] sm:$0xff] }
 0x7b3   : > { %6876 = vst.msk [vmem:[%s11152_s25 + $0xe8] sm:$0xff] %vm1429_vm0, %v6812_v44  ;;  %v8416_v51 = vpop.f32.mrf.mxu1 }
 0x7b4   : > { %v6817_v39 = vadd.f32 %v6753_v28, %v6689_v47  ;;  %v6687_v63 = vmul.f32 %v11143_v22, %v6621_v2  ;;  %v6624_v53 = vmax.f32 %v6410_v17, %v6560_v19  ;;  %v6558_v58 = vmul.f32 0.01, %v6402_v3  ;;  %v6759_v47 = vld [vmem:[%s11140_s23 + $0x140] sm:$0xff] }
 0x7b5   : > { %v6423_v31 = vadd.f32 %v8416_v51, %v11133_v59  ;;  %v6414_v5 = vpop.f32.mrf.mxu1  ;;  %v6762_v51 = vld [vmem:[%s11140_s23 + $0x158] sm:$0xff] }
 0x7b6   : > { %6881 = vst.msk [vmem:[%s11152_s25 + $0x110] sm:$0xff] %vm1429_vm0, %v6817_v39  ;;  %v6815_v33 = vadd.f32 %v6751_v42, %v6687_v63  ;;  %v6690_v24 = vmul.f32 %v11143_v22, %v6624_v53  ;;  %v6622_v56 = vmax.f32 %v6402_v3, %v6558_v58  ;;  %v6415_v38 = vadd.f32 %v11133_v59, %v6414_v5  ;;  %v6760_v5 = vld [vmem:[%s11140_s23 + $0x148] sm:$0xff] }
 0x7b7   : > { %v6563_v29 = vmul.f32 0.01, %v6423_v31  ;;  %v8417_v1 = vpop.f32.mrf.mxu1 }
 0x7b8   : > { %6879 = vst.msk [vmem:[%s11152_s25 + $0x100] sm:$0xff] %vm1429_vm0, %v6815_v33  ;;  %v6818_v46 = vadd.f32 %v6754_v18, %v6690_v24  ;;  %v6688_v23 = vmul.f32 %v11143_v22, %v6622_v56  ;;  %v6561_v37 = vmul.f32 0.01, %v6415_v38  ;;  %v6426_v54 = vadd.f32 %v8417_v1, %v11133_v59 }
 0x7b9   : > { %v6627_v61 = vmax.f32 %v6423_v31, %v6563_v29  ;;  %v6417_v49 = vpop.f32.mrf.mxu1  ;;  %v6765_v29 = vld [vmem:[%s11140_s23 + $0x170] sm:$0xff] }
 0x7ba   : > { %6882 = vst.msk [vmem:[%s11152_s25 + $0x118] sm:$0xff] %vm1429_vm0, %v6818_v46  ;;  %v6816_v43 = vadd.f32 %v6752_v55, %v6688_v23  ;;  %v6625_v25 = vmax.f32 %v6415_v38, %v6561_v37  ;;  %v6564_v41 = vmul.f32 0.01, %v6426_v54  ;;  %v6418_v60 = vadd.f32 %v11133_v59, %v6417_v49  ;;  %v6763_v49 = vld [vmem:[%s11140_s23 + $0x160] sm:$0xff] }
 0x7bb   : > { %v6693_v8 = vmul.f32 %v11143_v22, %v6627_v61  ;;  %v8420_v10 = vpop.f32.mrf.mxu1 }
 0x7bc   : > { %6880 = vst.msk [vmem:[%s11152_s25 + $0x108] sm:$0xff] %vm1429_vm0, %v6816_v43  ;;  %v6691_v11 = vmul.f32 %v11143_v22, %v6625_v25  ;;  %v6628_v32 = vmax.f32 %v6426_v54, %v6564_v41  ;;  %v6562_v36 = vmul.f32 0.01, %v6418_v60  ;;  %v6439_v9 = vadd.f32 %v8420_v10, %v11133_v59 }
 0x7bd   : > { %v6821_v7 = vadd.f32 %v6757_v6, %v6693_v8  ;;  %v6430_v12 = vpop.f32.mrf.mxu1 }
 0x7be   : > { %v6819_v15 = vadd.f32 %v6755_v0, %v6691_v11  ;;  %v6694_v4 = vmul.f32 %v11143_v22, %v6628_v32  ;;  %v6626_v16 = vmax.f32 %v6418_v60, %v6562_v36  ;;  %v6567_v45 = vmul.f32 0.01, %v6439_v9  ;;  %v6766_v32 = vld [vmem:[%s11140_s23 + $0x178] sm:$0xff] }
 0x7bf   : > { %6885 = vst.msk [vmem:[%s11152_s25 + $0x130] sm:$0xff] %vm1429_vm0, %v6821_v7  ;;  %v6431_v35 = vadd.f32 %v11133_v59, %v6430_v12  ;;  %v8421_v30 = vpop.f32.mrf.mxu1  ;;  %v6764_v12 = vld [vmem:[%s11140_s23 + $0x168] sm:$0xff] }
 0x7c0   : > { %6883 = vst.msk [vmem:[%s11152_s25 + $0x120] sm:$0xff] %vm1429_vm0, %v6819_v15  ;;  %v6822_v34 = vadd.f32 %v6758_v14, %v6694_v4  ;;  %v6692_v40 = vmul.f32 %v11143_v22, %v6626_v16  ;;  %v6631_v62 = vmax.f32 %v6439_v9, %v6567_v45  ;;  %v6442_v50 = vadd.f32 %v8421_v30, %v11133_v59  ;;  %v6769_v30 = vld [vmem:[%s11140_s23 + $0x190] sm:$0xff] }
 0x7c1   : > { %v6565_v52 = vmul.f32 0.01, %v6431_v35  ;;  %v6433_v48 = vpop.f32.mrf.mxu1 }
 0x7c2   : > { %6886 = vst.msk [vmem:[%s11152_s25 + $0x138] sm:$0xff] %vm1429_vm0, %v6822_v34  ;;  %v6820_v26 = vadd.f32 %v6756_v20, %v6692_v40  ;;  %v6697_v21 = vmul.f32 %v11143_v22, %v6631_v62  ;;  %v6568_v13 = vmul.f32 0.01, %v6442_v50  ;;  %v6434_v17 = vadd.f32 %v11133_v59, %v6433_v48 }
 0x7c3   : > { %v6629_v44 = vmax.f32 %v6431_v35, %v6565_v52  ;;  %v8424_v28 = vpop.f32.mrf.mxu1  ;;  %v6767_v52 = vld [vmem:[%s11140_s23 + $0x180] sm:$0xff] }
 0x7c4   : > { %6884 = vst.msk [vmem:[%s11152_s25 + $0x128] sm:$0xff] %vm1429_vm0, %v6820_v26  ;;  %v6825_v57 = vadd.f32 %v6761_v27, %v6697_v21  ;;  %v6632_v2 = vmax.f32 %v6442_v50, %v6568_v13  ;;  %v6566_v19 = vmul.f32 0.01, %v6434_v17  ;;  %v6455_v3 = vadd.f32 %v8424_v28, %v11133_v59  ;;  %v6770_v28 = vld [vmem:[%s11140_s23 + $0x198] sm:$0xff] }
 0x7c5   : > { %v6695_v42 = vmul.f32 %v11143_v22, %v6629_v44  ;;  %v6446_v39 = vpop.f32.mrf.mxu1 }
 0x7c6   : > { %6889 = vst.msk [vmem:[%s11152_s25 + $0x150] sm:$0xff] %vm1429_vm0, %v6825_v57  ;;  %v6698_v63 = vmul.f32 %v11143_v22, %v6632_v2  ;;  %v6630_v53 = vmax.f32 %v6434_v17, %v6566_v19  ;;  %v6571_v58 = vmul.f32 0.01, %v6455_v3  ;;  %v6447_v18 = vadd.f32 %v11133_v59, %v6446_v39 }
 0x7c7   : > { %v6823_v31 = vadd.f32 %v6759_v47, %v6695_v42  ;;  %v8425_v33 = vpop.f32.mrf.mxu1 }
 0x7c8   : > { %v6826_v24 = vadd.f32 %v6762_v51, %v6698_v63  ;;  %v6696_v56 = vmul.f32 %v11143_v22, %v6630_v53  ;;  %v6635_v38 = vmax.f32 %v6455_v3, %v6571_v58  ;;  %v6569_v55 = vmul.f32 0.01, %v6447_v18  ;;  %v6768_v53 = vld [vmem:[%s11140_s23 + $0x188] sm:$0xff] }
 0x7c9   : > { %6887 = vst.msk [vmem:[%s11152_s25 + $0x140] sm:$0xff] %vm1429_vm0, %v6823_v31  ;;  %v6458_v1 = vadd.f32 %v8425_v33, %v11133_v59  ;;  %v6449_v46 = vpop.f32.mrf.mxu1  ;;  %v6773_v33 = vld [vmem:[%s11140_s23 + $0x1b0] sm:$0xff] }
 0x7ca   : > { %6890 = vst.msk [vmem:[%s11152_s25 + $0x158] sm:$0xff] %vm1429_vm0, %v6826_v24  ;;  %v6824_v23 = vadd.f32 %v6760_v5, %v6696_v56  ;;  %v6701_v37 = vmul.f32 %v11143_v22, %v6635_v38  ;;  %v6633_v54 = vmax.f32 %v6447_v18, %v6569_v55  ;;  %v6450_v61 = vadd.f32 %v11133_v59, %v6449_v46  ;;  %v6771_v46 = vld [vmem:[%s11140_s23 + $0x1a0] sm:$0xff] }
 0x7cb   : > { %v6572_v43 = vmul.f32 0.01, %v6458_v1  ;;  %v8428_v6 = vpop.f32.mrf.mxu1 }
 0x7cc   : > { %6888 = vst.msk [vmem:[%s11152_s25 + $0x148] sm:$0xff] %vm1429_vm0, %v6824_v23  ;;  %v6829_v25 = vadd.f32 %v6765_v29, %v6701_v37  ;;  %v6699_v41 = vmul.f32 %v11143_v22, %v6633_v54  ;;  %v6570_v60 = vmul.f32 0.01, %v6450_v61  ;;  %v6471_v8 = vadd.f32 %v8428_v6, %v11133_v59 }
 0x7cd   : > { %v6636_v0 = vmax.f32 %v6458_v1, %v6572_v43  ;;  %v6462_v10 = vpop.f32.mrf.mxu1  ;;  %v6774_v43 = vld [vmem:[%s11140_s23 + $0x1b8] sm:$0xff] }
 0x7ce   : > { %6893 = vst.msk [vmem:[%s11152_s25 + $0x170] sm:$0xff] %vm1429_vm0, %v6829_v25  ;;  %v6827_v11 = vadd.f32 %v6763_v49, %v6699_v41  ;;  %v6634_v36 = vmax.f32 %v6450_v61, %v6570_v60  ;;  %v6575_v9 = vmul.f32 0.01, %v6471_v8  ;;  %v6463_v7 = vadd.f32 %v11133_v59, %v6462_v10  ;;  %v6772_v10 = vld [vmem:[%s11140_s23 + $0x1a8] sm:$0xff] }
 0x7cf   : > { %v6702_v14 = vmul.f32 %v11143_v22, %v6636_v0  ;;  %v8429_v15 = vpop.f32.mrf.mxu1 }
 0x7d0   : > { %6891 = vst.msk [vmem:[%s11152_s25 + $0x160] sm:$0xff] %vm1429_vm0, %v6827_v11  ;;  %v6700_v4 = vmul.f32 %v11143_v22, %v6634_v36  ;;  %v6639_v16 = vmax.f32 %v6471_v8, %v6575_v9  ;;  %v6573_v45 = vmul.f32 0.01, %v6463_v7  ;;  %v6474_v20 = vadd.f32 %v8429_v15, %v11133_v59 }
 0x7d1   : > { %v6830_v35 = vadd.f32 %v6766_v32, %v6702_v14  ;;  %v6465_v34 = vpop.f32.mrf.mxu1 }
 0x7d2   : > { %v6828_v40 = vadd.f32 %v6764_v12, %v6700_v4  ;;  %v6705_v62 = vmul.f32 %v11143_v22, %v6639_v16  ;;  %v6637_v50 = vmax.f32 %v6463_v7, %v6573_v45  ;;  %v6576_v27 = vmul.f32 0.01, %v6474_v20  ;;  %v6777_v16 = vld [vmem:[%s11140_s23 + $0x1d0] sm:$0xff] }
 0x7d3   : > { %6894 = vst.msk [vmem:[%s11152_s25 + $0x178] sm:$0xff] %vm1429_vm0, %v6830_v35  ;;  %v6466_v48 = vadd.f32 %v11133_v59, %v6465_v34  ;;  %v8432_v26 = vpop.f32.mrf.mxu1  ;;  %v6775_v34 = vld [vmem:[%s11140_s23 + $0x1c0] sm:$0xff] }
 0x7d4   : > { %6892 = vst.msk [vmem:[%s11152_s25 + $0x168] sm:$0xff] %vm1429_vm0, %v6828_v40  ;;  %v6833_v21 = vadd.f32 %v6769_v30, %v6705_v62  ;;  %v6703_v13 = vmul.f32 %v11143_v22, %v6637_v50  ;;  %v6640_v17 = vmax.f32 %v6474_v20, %v6576_v27  ;;  %v6487_v44 = vadd.f32 %v8432_v26, %v11133_v59  ;;  %v6778_v26 = vld [vmem:[%s11140_s23 + $0x1d8] sm:$0xff] }
 0x7d5   : > { %v6574_v57 = vmul.f32 0.01, %v6466_v48  ;;  %v6478_v47 = vpop.f32.mrf.mxu1 }
 0x7d6   : > { %6897 = vst.msk [vmem:[%s11152_s25 + $0x190] sm:$0xff] %vm1429_vm0, %v6833_v21  ;;  %v6831_v2 = vadd.f32 %v6767_v52, %v6703_v13  ;;  %v6706_v19 = vmul.f32 %v11143_v22, %v6640_v17  ;;  %v6579_v3 = vmul.f32 0.01, %v6487_v44  ;;  %v6479_v42 = vadd.f32 %v11133_v59, %v6478_v47 }
 0x7d7   : > { %v6638_v51 = vmax.f32 %v6466_v48, %v6574_v57  ;;  %v8433_v39 = vpop.f32.mrf.mxu1  ;;  %v6776_v57 = vld [vmem:[%s11140_s23 + $0x1c8] sm:$0xff] }
 0x7d8   : > { %6895 = vst.msk [vmem:[%s11152_s25 + $0x180] sm:$0xff] %vm1429_vm0, %v6831_v2  ;;  %v6834_v63 = vadd.f32 %v6770_v28, %v6706_v19  ;;  %v6643_v58 = vmax.f32 %v6487_v44, %v6579_v3  ;;  %v6577_v18 = vmul.f32 0.01, %v6479_v42  ;;  %v6490_v31 = vadd.f32 %v8433_v39, %v11133_v59  ;;  %v6781_v39 = vld [vmem:[%s11140_s23 + $0x1f0] sm:$0xff] }
 0x7d9   : > { %v6704_v5 = vmul.f32 %v11143_v22, %v6638_v51  ;;  %v6481_v24 = vpop.f32.mrf.mxu1 }
 0x7da   : > { %6898 = vst.msk [vmem:[%s11152_s25 + $0x198] sm:$0xff] %vm1429_vm0, %v6834_v63  ;;  %v6709_v56 = vmul.f32 %v11143_v22, %v6643_v58  ;;  %v6641_v38 = vmax.f32 %v6479_v42, %v6577_v18  ;;  %v6580_v55 = vmul.f32 0.01, %v6490_v31  ;;  %v6482_v29 = vadd.f32 %v11133_v59, %v6481_v24 }
 0x7db   : > { %v6832_v1 = vadd.f32 %v6768_v53, %v6704_v5  ;;  %v8436_v23 = vpop.f32.mrf.mxu1 }
 0x7dc   : > { %v6837_v37 = vadd.f32 %v6773_v33, %v6709_v56  ;;  %v6707_v54 = vmul.f32 %v11143_v22, %v6641_v38  ;;  %v6644_v61 = vmax.f32 %v6490_v31, %v6580_v55  ;;  %v6578_v49 = vmul.f32 0.01, %v6482_v29  ;;  %v6779_v56 = vld [vmem:[%s11140_s23 + $0x1e0] sm:$0xff] }
 0x7dd   : > { %6896 = vst.msk [vmem:[%s11152_s25 + $0x188] sm:$0xff] %vm1429_vm0, %v6832_v1  ;;  %v6503_v6 = vadd.f32 %v8436_v23, %v11133_v59  ;;  %v6494_v25 = vpop.f32.mrf.mxu1  ;;  %v6782_v1 = vld [vmem:[%s11140_s23 + $0x1f8] sm:$0xff] }
 0x7de   : > { %6901 = vst.msk [vmem:[%s11152_s25 + $0x1b0] sm:$0xff] %vm1429_vm0, %v6837_v37  ;;  %v6835_v41 = vadd.f32 %v6771_v46, %v6707_v54  ;;  %v6710_v60 = vmul.f32 %v11143_v22, %v6644_v61  ;;  %v6642_v8 = vmax.f32 %v6482_v29, %v6578_v49  ;;  %v6495_v0 = vadd.f32 %v11133_v59, %v6494_v25 }
 0x7df   : > { %v6583_v11 = vmul.f32 0.01, %v6503_v6  ;;  %v8437_v32 = vpop.f32.mrf.mxu1 }
 0x7e0   : > { %6899 = vst.msk [vmem:[%s11152_s25 + $0x1a0] sm:$0xff] %vm1429_vm0, %v6835_v41  ;;  %v6838_v36 = vadd.f32 %v6774_v43, %v6710_v60  ;;  %v6708_v9 = vmul.f32 %v11143_v22, %v6642_v8  ;;  %v6581_v7 = vmul.f32 0.01, %v6495_v0  ;;  %v6506_v14 = vadd.f32 %v8437_v32, %v11133_v59 }
 0x7e1   : > { %v6647_v12 = vmax.f32 %v6503_v6, %v6583_v11  ;;  %v6497_v15 = vpop.f32.mrf.mxu1 }
 0x7e2   : > { %6902 = vst.msk [vmem:[%s11152_s25 + $0x1b8] sm:$0xff] %vm1429_vm0, %v6838_v36  ;;  %v6836_v4 = vadd.f32 %v6772_v10, %v6708_v9  ;;  %v6645_v45 = vmax.f32 %v6495_v0, %v6581_v7  ;;  %v6584_v20 = vmul.f32 0.01, %v6506_v14  ;;  %v6498_v35 = vadd.f32 %v11133_v59, %v6497_v15 }
 0x7e3   : > { %v6713_v30 = vmul.f32 %v11143_v22, %v6647_v12  ;;  %v8440_v40 = vpop.f32.mrf.mxu1 }
 0x7e4   : > { %6900 = vst.msk [vmem:[%s11152_s25 + $0x1a8] sm:$0xff] %vm1429_vm0, %v6836_v4  ;;  %v6711_v62 = vmul.f32 %v11143_v22, %v6645_v45  ;;  %v6648_v50 = vmax.f32 %v6506_v14, %v6584_v20  ;;  %v6582_v27 = vmul.f32 0.01, %v6498_v35  ;;  %v6519_v52 = vadd.f32 %v8440_v40, %v11133_v59 }
 0x7e5   : > { %v6841_v48 = vadd.f32 %v6777_v16, %v6713_v30  ;;  %v6510_v21 = vpop.f32.mrf.mxu1 }
 0x7e6   : > { %v6839_v13 = vadd.f32 %v6775_v34, %v6711_v62  ;;  %v6714_v17 = vmul.f32 %v11143_v22, %v6648_v50  ;;  %v6646_v44 = vmax.f32 %v6498_v35, %v6582_v27  ;;  %v6587_v28 = vmul.f32 0.01, %v6519_v52 }
 0x7e7   : > { %6905 = vst.msk [vmem:[%s11152_s25 + $0x1d0] sm:$0xff] %vm1429_vm0, %v6841_v48  ;;  %v6511_v47 = vadd.f32 %v11133_v59, %v6510_v21  ;;  %v8441_v2 = vpop.f32.mrf.mxu1 }
 0x7e8   : > { %6903 = vst.msk [vmem:[%s11152_s25 + $0x1c0] sm:$0xff] %vm1429_vm0, %v6839_v13  ;;  %v6842_v19 = vadd.f32 %v6778_v26, %v6714_v17  ;;  %v6712_v3 = vmul.f32 %v11143_v22, %v6646_v44  ;;  %v6651_v42 = vmax.f32 %v6519_v52, %v6587_v28  ;;  %v6522_v51 = vadd.f32 %v8441_v2, %v11133_v59 }
 0x7e9   : > { %v6585_v63 = vmul.f32 0.01, %v6511_v47  ;;  %v6513_v53 = vpop.f32.mrf.mxu1 }
 0x7ea   : > { %6906 = vst.msk [vmem:[%s11152_s25 + $0x1d8] sm:$0xff] %vm1429_vm0, %v6842_v19  ;;  %v6840_v58 = vadd.f32 %v6776_v57, %v6712_v3  ;;  %v6717_v18 = vmul.f32 %v11143_v22, %v6651_v42  ;;  %v6588_v31 = vmul.f32 0.01, %v6522_v51  ;;  %v6514_v5 = vadd.f32 %v11133_v59, %v6513_v53  ;;  %v6780_v59 = vld [vmem:[%s11140_s23 + $0x1e8] sm:$0xff] }
 0x7eb   : > { %v6649_v33 = vmax.f32 %v6511_v47, %v6585_v63 }
 0x7ec   : > { %6904 = vst.msk [vmem:[%s11152_s25 + $0x1c8] sm:$0xff] %vm1429_vm0, %v6840_v58  ;;  %v6845_v24 = vadd.f32 %v6781_v39, %v6717_v18  ;;  %v6652_v38 = vmax.f32 %v6522_v51, %v6588_v31  ;;  %v6586_v55 = vmul.f32 0.01, %v6514_v5 }
 0x7ed   : > { %v6715_v29 = vmul.f32 %v11143_v22, %v6649_v33 }
 0x7ee   : > { %6909 = vst.msk [vmem:[%s11152_s25 + $0x1f0] sm:$0xff] %vm1429_vm0, %v6845_v24  ;;  %v6718_v46 = vmul.f32 %v11143_v22, %v6652_v38  ;;  %v6650_v23 = vmax.f32 %v6514_v5, %v6586_v55 }
 0x7ef   : > { %v6843_v37 = vadd.f32 %v6779_v56, %v6715_v29 }
 0x7f0   : > { %v6846_v54 = vadd.f32 %v6782_v1, %v6718_v46  ;;  %v6716_v61 = vmul.f32 %v11143_v22, %v6650_v23 }
 0x7f1   : > { %6907 = vst.msk [vmem:[%s11152_s25 + $0x1e0] sm:$0xff] %vm1429_vm0, %v6843_v37 }
 0x7f2   : > { %6910 = vst.msk [vmem:[%s11152_s25 + $0x1f8] sm:$0xff] %vm1429_vm0, %v6846_v54  ;;  %v6844_v49 = vadd.f32 %v6780_v59, %v6716_v61 }
 0x7f4   : > { %6908 = vst.msk [vmem:[%s11152_s25 + $0x1e8] sm:$0xff] %vm1429_vm0, %v6844_v49 }
 0x7f5 PF: > { %s30_s20 = sadd.s32 1, %s9032_s20  }
 0x7f6   : > { %p27_p4 = scmp.ge.s32.totalorder %s30_s20, 6  }
 0x7f8   :  { %29 = sbr.rel (!%p27_p4) target bundleno = 6 (0x6), region = 129 }

</bundles_post_ra>
